<compile_context>
chip_gen: v7x
topology: tpu7x:2x2x1
jax: 0.10.0
libtpu: 0.0.40
codegen_flags: <defaults>
</compile_context>

<pallas_src>
import functools

import jax
import jax.numpy as jnp
from jax.experimental import pallas as pl
from jax.experimental.pallas import tpu as pltpu


def _conv_bn_relu_kernel(x_ref, w_ref, b_ref, o_ref, *,
                         th, wo, kh, kw, stride, dilation):
    """Direct conv (tap-decomposed) + folded-BN bias + ReLU.

    x_ref: (1, Hp, Wp, Cin)     padded NHWC image for this batch element
                                (same block across h/cout tiles -> stays in VMEM)
    w_ref: (kh*kw, Cin, TN)     BN-scale-folded bf16 weight, tap-major
    b_ref: (1, TN)              folded BN bias (f32)
    o_ref: (1, th*wo, TN)       output tile (flattened output rows, lane-dense)
    """
    ht = pl.program_id(1)
    h0 = ht * (th * stride)                 # first input row of this output tile
    cin = x_ref.shape[3]
    tn = o_ref.shape[2]
    rows = (th - 1) * stride + 1
    cols = (wo - 1) * stride + 1

    acc = jnp.zeros((th * wo, tn), jnp.float32)
    for t in range(kh * kw):                # static, unrolled over taps
        i, j = t // kw, t % kw
        xs = x_ref[0,
                   pl.ds(h0 + i * dilation, rows),
                   pl.ds(j * dilation, cols),
                   :]                        # (rows, cols, Cin) bf16
        if stride > 1:
            xs = xs[::stride, ::stride, :]   # (th, wo, Cin)
        patch = xs.reshape(th * wo, cin)
        acc = acc + jnp.dot(patch, w_ref[t],
                            preferred_element_type=jnp.float32)

    y = acc + b_ref[...]                     # folded BN bias (scale already in w)
    o_ref[0, :, :] = jnp.maximum(y, 0.0).astype(o_ref.dtype)


@functools.partial(jax.jit, static_argnames=("stride", "padding", "dilation"))
def conv_bn_act(x, weight, gamma, beta, running_mean, running_var,
                *, stride=1, padding=0, dilation=1, eps=1e-5):
    """x: [N, Cin, H, W] (NCHW).  weight: [Cout, Cin, kh, kw].  Returns NCHW f32."""
    N, Cin, H, W = x.shape
    Cout, _, kh, kw = weight.shape
    Ho = (H + 2 * padding - dilation * (kh - 1) - 1) // stride + 1
    Wo = (W + 2 * padding - dilation * (kw - 1) - 1) // stride + 1

    # ---- static tiling choices ----
    coutp = ((Cout + 127) // 128) * 128            # lane-dense Cout
    tn = 256 if coutp % 256 == 0 else 128          # Cout tile (MXU N dim)
    th = max(1, min(Ho, max(1, 512 // max(Wo, 1))))  # output rows per tile
    if (th * Wo) % 8 != 0:                         # keep out block sublane aligned
        th = Ho
    hop = -(-Ho // th) * th                        # pad Ho so grid divides evenly

    # ---- input: NCHW -> padded NHWC bf16 (internal layout) ----
    x_nhwc = jnp.transpose(x, (0, 2, 3, 1))
    in_h_needed = (hop - 1) * stride + dilation * (kh - 1) + 1
    pad_h_extra = max(0, in_h_needed - (H + 2 * padding))
    xp = jnp.pad(x_nhwc, ((0, 0),
                          (padding, padding + pad_h_extra),
                          (padding, padding),
                          (0, 0))).astype(jnp.bfloat16)
    Hp, Wp = xp.shape[1], xp.shape[2]

    # ---- fold BN (inference) into the weight (f32), pad Cout, cast bf16 ----
    inv_std = jax.lax.rsqrt(running_var.astype(jnp.float32) + eps)
    scale = gamma.astype(jnp.float32) * inv_std                       # [Cout]
    bias = beta.astype(jnp.float32) - running_mean.astype(jnp.float32) * scale
    w = jnp.transpose(weight.astype(jnp.float32), (2, 3, 1, 0))       # [kh,kw,Cin,Cout]
    w = w * scale[None, None, None, :]                                # fold in f32
    w = jnp.pad(w, ((0, 0), (0, 0), (0, 0), (0, coutp - Cout)))
    w = w.reshape(kh * kw, Cin, coutp).astype(jnp.bfloat16)
    b = jnp.pad(bias, (0, coutp - Cout)).reshape(1, coutp)            # f32

    grid = (N, hop // th, coutp // tn)
    kernel = functools.partial(_conv_bn_relu_kernel, th=th, wo=Wo,
                               kh=kh, kw=kw, stride=stride, dilation=dilation)

    out = pl.pallas_call(
        kernel,
        out_shape=jax.ShapeDtypeStruct((N, hop * Wo, coutp), x.dtype),
        grid=grid,
        in_specs=[
            # whole padded image per batch element; block index constant across
            # h/cout tiles so it is fetched once and stays resident in VMEM.
            pl.BlockSpec((1, Hp, Wp, Cin), lambda n, h, c: (n, 0, 0, 0)),
            pl.BlockSpec((kh * kw, Cin, tn), lambda n, h, c: (0, 0, c)),
            pl.BlockSpec((1, tn), lambda n, h, c: (0, c)),
        ],
        out_specs=pl.BlockSpec((1, th * Wo, tn), lambda n, h, c: (n, h, c)),
        compiler_params=pltpu.CompilerParams(
            dimension_semantics=("parallel", "parallel", "parallel"),
            vmem_limit_bytes=64 * 1024 * 1024),
    )(xp, w, b)

    out = out.reshape(N, hop, Wo, coutp)[:, :Ho, :, :Cout]            # drop padding
    return jnp.transpose(out, (0, 3, 1, 2))                           # NHWC -> NCHW


def _reference(x, weight, gamma, beta, running_mean, running_var,
               *, stride, padding, dilation, eps=1e-5):
    y = jax.lax.conv_general_dilated(
        x.astype(jnp.float32), weight.astype(jnp.float32),
        window_strides=(stride, stride),
        padding=((padding, padding), (padding, padding)),
        rhs_dilation=(dilation, dilation),
        dimension_numbers=("NCHW", "OIHW", "NCHW"))
    inv_std = 1.0 / jnp.sqrt(running_var + eps)
    y = (y - running_mean[None, :, None, None]) * (gamma * inv_std)[None, :, None, None] \
        + beta[None, :, None, None]
    return jnp.maximum(y, 0.0)


if __name__ == "__main__":
    key = jax.random.PRNGKey(0)
    k_x, k_w, k_g, k_b, k_m, k_v = jax.random.split(key, 6)

    # Small deterministic shapes consistent with Conv_BN_ACT(4, 8, 3, padding=1)
    N, Cin, H, W = 2, 4, 16, 16
    Cout, ksize, stride, padding, dilation = 8, 3, 1, 1, 1

    x = jax.random.normal(k_x, (N, Cin, H, W), jnp.float32)
    weight = jax.random.normal(k_w, (Cout, Cin, ksize, ksize), jnp.float32) * 0.1
    gamma = jax.random.normal(k_g, (Cout,), jnp.float32) * 0.1 + 1.0
    beta = jax.random.normal(k_b, (Cout,), jnp.float32) * 0.1
    running_mean = jax.random.normal(k_m, (Cout,), jnp.float32) * 0.1
    running_var = jax.random.uniform(k_v, (Cout,), jnp.float32, 0.5, 1.5)

    out = conv_bn_act(x, weight, gamma, beta, running_mean, running_var,
                      stride=stride, padding=padding, dilation=dilation)
    out = jax.block_until_ready(out)

    ref = _reference(x, weight, gamma, beta, running_mean, running_var,
                     stride=stride, padding=padding, dilation=dilation)
    assert out.shape == (N, Cout, H, W), out.shape
    # bf16 matmul operands -> moderate tolerance vs. the pure-f32 reference.
    assert jnp.allclose(out, ref, atol=5e-2, rtol=5e-2), \
        float(jnp.max(jnp.abs(out - ref)))

    print("KERNEL_OK")
</pallas_src>

<mosaic_0001>
module attributes {stable_mosaic.version = 11 : i64} {
  func.func @_conv_bn_relu_kernel(%arg0: i32, %arg1: i32, %arg2: i32, %arg3: memref<1x18x18x4xbf16, #tpu.memory_space<vmem>>, %arg4: memref<9x4x128xbf16, #tpu.memory_space<vmem>>, %arg5: memref<1x128xf32, #tpu.memory_space<vmem>>, %arg6: memref<1x256x128xf32, #tpu.memory_space<vmem>>) attributes {dimension_semantics = [#tpu.dimension_semantics<parallel>, #tpu.dimension_semantics<parallel>, #tpu.dimension_semantics<parallel>], iteration_bounds = array<i64: 2, 1, 1>, scalar_prefetch = 0 : i64, scratch_operands = 0 : i64, tpu.core_type = #tpu.core_type<tc>, window_params = [{transform_indices = @transform_0, window_bounds = array<i64: 1, 18, 18, 4>}, {transform_indices = @transform_1, window_bounds = array<i64: 9, 4, 128>}, {transform_indices = @transform_2, window_bounds = array<i64: 1, 128>}, {transform_indices = @transform_3, window_bounds = array<i64: 1, 256, 128>}]} {
    %c16_i32 = arith.constant 16 : i32
    %0 = arith.muli %arg1, %c16_i32 : i32
    %cst = arith.constant 0.000000e+00 : f32
    %1 = vector.broadcast %cst : f32 to vector<256x128xf32>
    %c0_i32 = arith.constant 0 : i32
    %2 = arith.addi %0, %c0_i32 : i32
    %c0 = arith.constant 0 : index
    %3 = arith.index_cast %2 : i32 to index
    %c0_0 = arith.constant 0 : index
    %c0_1 = arith.constant 0 : index
    %4 = vector.load %arg3[%c0, %3, %c0_0, %c0_1] : memref<1x18x18x4xbf16, #tpu.memory_space<vmem>>, vector<1x16x16x4xbf16>
    %5 = vector.shape_cast %4 : vector<1x16x16x4xbf16> to vector<16x16x4xbf16>
    %6 = vector.shape_cast %5 : vector<16x16x4xbf16> to vector<256x4xbf16>
    %c0_2 = arith.constant 0 : index
    %c0_3 = arith.constant 0 : index
    %c0_4 = arith.constant 0 : index
    %7 = vector.load %arg4[%c0_2, %c0_3, %c0_4] : memref<9x4x128xbf16, #tpu.memory_space<vmem>>, vector<1x4x128xbf16>
    %8 = vector.shape_cast %7 : vector<1x4x128xbf16> to vector<4x128xbf16>
    %cst_5 = arith.constant dense<0.000000e+00> : vector<256x128xf32>
    %9 = tpu.matmul %6, %8, %cst_5 {dimension_numbers = #tpu.dot_dimension_numbers<[1], [0], [0], [1], [0, 0, 1, 1], [], []>} : vector<256x4xbf16>, vector<4x128xbf16>, vector<256x128xf32> -> vector<256x128xf32>
    %10 = arith.addf %1, %9 : vector<256x128xf32>
    %c0_i32_6 = arith.constant 0 : i32
    %11 = arith.addi %0, %c0_i32_6 : i32
    %c0_7 = arith.constant 0 : index
    %12 = arith.index_cast %11 : i32 to index
    %c1 = arith.constant 1 : index
    %c0_8 = arith.constant 0 : index
    %13 = vector.load %arg3[%c0_7, %12, %c1, %c0_8] : memref<1x18x18x4xbf16, #tpu.memory_space<vmem>>, vector<1x16x16x4xbf16>
    %14 = vector.shape_cast %13 : vector<1x16x16x4xbf16> to vector<16x16x4xbf16>
    %15 = vector.shape_cast %14 : vector<16x16x4xbf16> to vector<256x4xbf16>
    %c1_9 = arith.constant 1 : index
    %c0_10 = arith.constant 0 : index
    %c0_11 = arith.constant 0 : index
    %16 = vector.load %arg4[%c1_9, %c0_10, %c0_11] : memref<9x4x128xbf16, #tpu.memory_space<vmem>>, vector<1x4x128xbf16>
    %17 = vector.shape_cast %16 : vector<1x4x128xbf16> to vector<4x128xbf16>
    %cst_12 = arith.constant dense<0.000000e+00> : vector<256x128xf32>
    %18 = tpu.matmul %15, %17, %cst_12 {dimension_numbers = #tpu.dot_dimension_numbers<[1], [0], [0], [1], [0, 0, 1, 1], [], []>} : vector<256x4xbf16>, vector<4x128xbf16>, vector<256x128xf32> -> vector<256x128xf32>
    %19 = arith.addf %10, %18 : vector<256x128xf32>
    %c0_i32_13 = arith.constant 0 : i32
    %20 = arith.addi %0, %c0_i32_13 : i32
    %c0_14 = arith.constant 0 : index
    %21 = arith.index_cast %20 : i32 to index
    %c2 = arith.constant 2 : index
    %c0_15 = arith.constant 0 : index
    %22 = vector.load %arg3[%c0_14, %21, %c2, %c0_15] : memref<1x18x18x4xbf16, #tpu.memory_space<vmem>>, vector<1x16x16x4xbf16>
    %23 = vector.shape_cast %22 : vector<1x16x16x4xbf16> to vector<16x16x4xbf16>
    %24 = vector.shape_cast %23 : vector<16x16x4xbf16> to vector<256x4xbf16>
    %c2_16 = arith.constant 2 : index
    %c0_17 = arith.constant 0 : index
    %c0_18 = arith.constant 0 : index
    %25 = vector.load %arg4[%c2_16, %c0_17, %c0_18] : memref<9x4x128xbf16, #tpu.memory_space<vmem>>, vector<1x4x128xbf16>
    %26 = vector.shape_cast %25 : vector<1x4x128xbf16> to vector<4x128xbf16>
    %cst_19 = arith.constant dense<0.000000e+00> : vector<256x128xf32>
    %27 = tpu.matmul %24, %26, %cst_19 {dimension_numbers = #tpu.dot_dimension_numbers<[1], [0], [0], [1], [0, 0, 1, 1], [], []>} : vector<256x4xbf16>, vector<4x128xbf16>, vector<256x128xf32> -> vector<256x128xf32>
    %28 = arith.addf %19, %27 : vector<256x128xf32>
    %c1_i32 = arith.constant 1 : i32
    %29 = arith.addi %0, %c1_i32 : i32
    %c0_20 = arith.constant 0 : index
    %30 = arith.index_cast %29 : i32 to index
    %c0_21 = arith.constant 0 : index
    %c0_22 = arith.constant 0 : index
    %31 = vector.load %arg3[%c0_20, %30, %c0_21, %c0_22] : memref<1x18x18x4xbf16, #tpu.memory_space<vmem>>, vector<1x16x16x4xbf16>
    %32 = vector.shape_cast %31 : vector<1x16x16x4xbf16> to vector<16x16x4xbf16>
    %33 = vector.shape_cast %32 : vector<16x16x4xbf16> to vector<256x4xbf16>
    %c3 = arith.constant 3 : index
    %c0_23 = arith.constant 0 : index
    %c0_24 = arith.constant 0 : index
    %34 = vector.load %arg4[%c3, %c0_23, %c0_24] : memref<9x4x128xbf16, #tpu.memory_space<vmem>>, vector<1x4x128xbf16>
    %35 = vector.shape_cast %34 : vector<1x4x128xbf16> to vector<4x128xbf16>
    %cst_25 = arith.constant dense<0.000000e+00> : vector<256x128xf32>
    %36 = tpu.matmul %33, %35, %cst_25 {dimension_numbers = #tpu.dot_dimension_numbers<[1], [0], [0], [1], [0, 0, 1, 1], [], []>} : vector<256x4xbf16>, vector<4x128xbf16>, vector<256x128xf32> -> vector<256x128xf32>
    %37 = arith.addf %28, %36 : vector<256x128xf32>
    %c1_i32_26 = arith.constant 1 : i32
    %38 = arith.addi %0, %c1_i32_26 : i32
    %c0_27 = arith.constant 0 : index
    %39 = arith.index_cast %38 : i32 to index
    %c1_28 = arith.constant 1 : index
    %c0_29 = arith.constant 0 : index
    %40 = vector.load %arg3[%c0_27, %39, %c1_28, %c0_29] : memref<1x18x18x4xbf16, #tpu.memory_space<vmem>>, vector<1x16x16x4xbf16>
    %41 = vector.shape_cast %40 : vector<1x16x16x4xbf16> to vector<16x16x4xbf16>
    %42 = vector.shape_cast %41 : vector<16x16x4xbf16> to vector<256x4xbf16>
    %c4 = arith.constant 4 : index
    %c0_30 = arith.constant 0 : index
    %c0_31 = arith.constant 0 : index
    %43 = vector.load %arg4[%c4, %c0_30, %c0_31] : memref<9x4x128xbf16, #tpu.memory_space<vmem>>, vector<1x4x128xbf16>
    %44 = vector.shape_cast %43 : vector<1x4x128xbf16> to vector<4x128xbf16>
    %cst_32 = arith.constant dense<0.000000e+00> : vector<256x128xf32>
    %45 = tpu.matmul %42, %44, %cst_32 {dimension_numbers = #tpu.dot_dimension_numbers<[1], [0], [0], [1], [0, 0, 1, 1], [], []>} : vector<256x4xbf16>, vector<4x128xbf16>, vector<256x128xf32> -> vector<256x128xf32>
    %46 = arith.addf %37, %45 : vector<256x128xf32>
    %c1_i32_33 = arith.constant 1 : i32
    %47 = arith.addi %0, %c1_i32_33 : i32
    %c0_34 = arith.constant 0 : index
    %48 = arith.index_cast %47 : i32 to index
    %c2_35 = arith.constant 2 : index
    %c0_36 = arith.constant 0 : index
    %49 = vector.load %arg3[%c0_34, %48, %c2_35, %c0_36] : memref<1x18x18x4xbf16, #tpu.memory_space<vmem>>, vector<1x16x16x4xbf16>
    %50 = vector.shape_cast %49 : vector<1x16x16x4xbf16> to vector<16x16x4xbf16>
    %51 = vector.shape_cast %50 : vector<16x16x4xbf16> to vector<256x4xbf16>
    %c5 = arith.constant 5 : index
    %c0_37 = arith.constant 0 : index
    %c0_38 = arith.constant 0 : index
    %52 = vector.load %arg4[%c5, %c0_37, %c0_38] : memref<9x4x128xbf16, #tpu.memory_space<vmem>>, vector<1x4x128xbf16>
    %53 = vector.shape_cast %52 : vector<1x4x128xbf16> to vector<4x128xbf16>
    %cst_39 = arith.constant dense<0.000000e+00> : vector<256x128xf32>
    %54 = tpu.matmul %51, %53, %cst_39 {dimension_numbers = #tpu.dot_dimension_numbers<[1], [0], [0], [1], [0, 0, 1, 1], [], []>} : vector<256x4xbf16>, vector<4x128xbf16>, vector<256x128xf32> -> vector<256x128xf32>
    %55 = arith.addf %46, %54 : vector<256x128xf32>
    %c2_i32 = arith.constant 2 : i32
    %56 = arith.addi %0, %c2_i32 : i32
    %c0_40 = arith.constant 0 : index
    %57 = arith.index_cast %56 : i32 to index
    %c0_41 = arith.constant 0 : index
    %c0_42 = arith.constant 0 : index
    %58 = vector.load %arg3[%c0_40, %57, %c0_41, %c0_42] : memref<1x18x18x4xbf16, #tpu.memory_space<vmem>>, vector<1x16x16x4xbf16>
    %59 = vector.shape_cast %58 : vector<1x16x16x4xbf16> to vector<16x16x4xbf16>
    %60 = vector.shape_cast %59 : vector<16x16x4xbf16> to vector<256x4xbf16>
    %c6 = arith.constant 6 : index
    %c0_43 = arith.constant 0 : index
    %c0_44 = arith.constant 0 : index
    %61 = vector.load %arg4[%c6, %c0_43, %c0_44] : memref<9x4x128xbf16, #tpu.memory_space<vmem>>, vector<1x4x128xbf16>
    %62 = vector.shape_cast %61 : vector<1x4x128xbf16> to vector<4x128xbf16>
    %cst_45 = arith.constant dense<0.000000e+00> : vector<256x128xf32>
    %63 = tpu.matmul %60, %62, %cst_45 {dimension_numbers = #tpu.dot_dimension_numbers<[1], [0], [0], [1], [0, 0, 1, 1], [], []>} : vector<256x4xbf16>, vector<4x128xbf16>, vector<256x128xf32> -> vector<256x128xf32>
    %64 = arith.addf %55, %63 : vector<256x128xf32>
    %c2_i32_46 = arith.constant 2 : i32
    %65 = arith.addi %0, %c2_i32_46 : i32
    %c0_47 = arith.constant 0 : index
    %66 = arith.index_cast %65 : i32 to index
    %c1_48 = arith.constant 1 : index
    %c0_49 = arith.constant 0 : index
    %67 = vector.load %arg3[%c0_47, %66, %c1_48, %c0_49] : memref<1x18x18x4xbf16, #tpu.memory_space<vmem>>, vector<1x16x16x4xbf16>
    %68 = vector.shape_cast %67 : vector<1x16x16x4xbf16> to vector<16x16x4xbf16>
    %69 = vector.shape_cast %68 : vector<16x16x4xbf16> to vector<256x4xbf16>
    %c7 = arith.constant 7 : index
    %c0_50 = arith.constant 0 : index
    %c0_51 = arith.constant 0 : index
    %70 = vector.load %arg4[%c7, %c0_50, %c0_51] : memref<9x4x128xbf16, #tpu.memory_space<vmem>>, vector<1x4x128xbf16>
    %71 = vector.shape_cast %70 : vector<1x4x128xbf16> to vector<4x128xbf16>
    %cst_52 = arith.constant dense<0.000000e+00> : vector<256x128xf32>
    %72 = tpu.matmul %69, %71, %cst_52 {dimension_numbers = #tpu.dot_dimension_numbers<[1], [0], [0], [1], [0, 0, 1, 1], [], []>} : vector<256x4xbf16>, vector<4x128xbf16>, vector<256x128xf32> -> vector<256x128xf32>
    %73 = arith.addf %64, %72 : vector<256x128xf32>
    %c2_i32_53 = arith.constant 2 : i32
    %74 = arith.addi %0, %c2_i32_53 : i32
    %c0_54 = arith.constant 0 : index
    %75 = arith.index_cast %74 : i32 to index
    %c2_55 = arith.constant 2 : index
    %c0_56 = arith.constant 0 : index
    %76 = vector.load %arg3[%c0_54, %75, %c2_55, %c0_56] : memref<1x18x18x4xbf16, #tpu.memory_space<vmem>>, vector<1x16x16x4xbf16>
    %77 = vector.shape_cast %76 : vector<1x16x16x4xbf16> to vector<16x16x4xbf16>
    %78 = vector.shape_cast %77 : vector<16x16x4xbf16> to vector<256x4xbf16>
    %c8 = arith.constant 8 : index
    %c0_57 = arith.constant 0 : index
    %c0_58 = arith.constant 0 : index
    %79 = vector.load %arg4[%c8, %c0_57, %c0_58] : memref<9x4x128xbf16, #tpu.memory_space<vmem>>, vector<1x4x128xbf16>
    %80 = vector.shape_cast %79 : vector<1x4x128xbf16> to vector<4x128xbf16>
    %cst_59 = arith.constant dense<0.000000e+00> : vector<256x128xf32>
    %81 = tpu.matmul %78, %80, %cst_59 {dimension_numbers = #tpu.dot_dimension_numbers<[1], [0], [0], [1], [0, 0, 1, 1], [], []>} : vector<256x4xbf16>, vector<4x128xbf16>, vector<256x128xf32> -> vector<256x128xf32>
    %82 = arith.addf %73, %81 : vector<256x128xf32>
    %c0_60 = arith.constant 0 : index
    %c0_61 = arith.constant 0 : index
    %83 = vector.load %arg5[%c0_60, %c0_61] : memref<1x128xf32, #tpu.memory_space<vmem>>, vector<1x128xf32>
    %84 = vector.broadcast %83 : vector<1x128xf32> to vector<256x128xf32>
    %85 = arith.addf %82, %84 : vector<256x128xf32>
    %cst_62 = arith.constant 0.000000e+00 : f32
    %86 = vector.broadcast %cst_62 : f32 to vector<256x128xf32>
    %87 = arith.maximumf %85, %86 : vector<256x128xf32>
    %c0_63 = arith.constant 0 : index
    %c0_64 = arith.constant 0 : index
    %c0_65 = arith.constant 0 : index
    %88 = vector.load %arg6[%c0_63, %c0_64, %c0_65] : memref<1x256x128xf32, #tpu.memory_space<vmem>>, vector<1x256x128xf32>
    %89 = vector.shape_cast %88 : vector<1x256x128xf32> to vector<256x128xf32>
    %90 = vector.shape_cast %87 : vector<256x128xf32> to vector<1x256x128xf32>
    tpu.vector_store %arg6[%c0_63, %c0_64, %c0_65], %90 {strides = array<i32>} : memref<1x256x128xf32, #tpu.memory_space<vmem>>, vector<1x256x128xf32>,
    return
  }
  func.func @transform_0(%arg0: i32, %arg1: i32, %arg2: i32) -> (i32, i32, i32, i32) {
    %c0_i32 = arith.constant 0 : i32
    %c0_i32_0 = arith.constant 0 : i32
    %c0_i32_1 = arith.constant 0 : i32
    %c0_i32_2 = arith.constant 0 : i32
    return %arg0, %c0_i32, %c0_i32_0, %c0_i32_1 : i32, i32, i32, i32
  }
  func.func @transform_1(%arg0: i32, %arg1: i32, %arg2: i32) -> (i32, i32, i32) {
    %c0_i32 = arith.constant 0 : i32
    %c0_i32_0 = arith.constant 0 : i32
    %c0_i32_1 = arith.constant 0 : i32
    return %c0_i32, %c0_i32_0, %arg2 : i32, i32, i32
  }
  func.func @transform_2(%arg0: i32, %arg1: i32, %arg2: i32) -> (i32, i32) {
    %c0_i32 = arith.constant 0 : i32
    %c0_i32_0 = arith.constant 0 : i32
    return %c0_i32, %arg2 : i32, i32
  }
  func.func @transform_3(%arg0: i32, %arg1: i32, %arg2: i32) -> (i32, i32, i32) {
    %c0_i32 = arith.constant 0 : i32
    return %arg0, %arg1, %arg2 : i32, i32, i32
  }
}

</mosaic_0001>

<bundles_post_ra>
// kernel: conv_bn_act.1
= control target key start
LH: loop header
LB: loop body
LE: loop exit
PB: predicated region body
PF: predicated region fallthrough
CT: control target
= control target key end

     0   :  { %8 = vsyncpa [#allocation3], 0  ;;  %s8767_s0 = inlined_call_operand.hbm [shape: bf16[2,18,18,4], index: 0, kind: input, shape index: {}]   ;;  %s8768_s1 = inlined_call_operand.hbm [shape: bf16[9,4,128], index: 1, kind: input, shape index: {}]   ;;  %s8769_s2 = inlined_call_operand.hbm [shape: f32[1,128], index: 2, kind: input, shape index: {}]   ;;  %s8770_s3 = inlined_call_operand.hbm [shape: f32[2,256,128], index: 3, kind: output, shape index: {}]  }
   0x1   :  { %10 = vsyncpa [#allocation3 + $0x1], 0 }
   0x2   :  { %11 = vsyncpa [#allocation6], 0 }
   0x3   :  { %12 = vsyncpa [#allocation4], 0 }
   0x4   :  { %14 = vsyncpa [#allocation4 + $0x1], 0  ;;  %s6737_s12 = smov 0   ;;  %s6739_s13 = smov 0  }
   0x5   :  { %s6741_s14 = smov 0   ;;  %s6743_s15 = smov 0  }
   0x6   :  { %s6745_s16 = smov 0   ;;  %s6747_s17 = smov 0  }
   0x7 LB: > { %s5065_s18 = sadd.s32 4294967295, %s6705_s17   ;;  %s5066_s19 = sadd.s32 4294967294, %s6705_s17   ;;  %s6705_s17 = sphi %s6747_s17, %s20_s17   ;;  %s6701_s16 = sphi %s6745_s16, %s8878_s16   ;;  %s6697_s15 = sphi %s6743_s15, %s8877_s15   ;;  %s6693_s14 = sphi %s6741_s14, %s8876_s14   ;;  %s6689_s13 = sphi %s6739_s13, %s8875_s13   ;;  %s6685_s12 = sphi %s6737_s12, %s8874_s12  }
   0x8   : > { %p59_p0 = scmp.ne.s32.totalorder %s6689_s13, %s6685_s12  ;;  %p6771_p1 = scmp.eq.s32.totalorder %s5065_s18, 0 }
   0x9   : > { %p6775_p2 = scmp.eq.s32.totalorder %s5065_s18, 1  ;;  %p145_p3 = scmp.eq.s32.totalorder %s5066_s19, 1 }
   0xa   : > { %s8794_s20 = scalar_select %p6771_p1, 1, 0 }
   0xb   : > { %p6781_p4 = por %p6771_p1, %p59_p0  ;;  %p5067_p5 = scmp.ge.s32.totalorder %s6705_s17, 1 }
   0xc   : > { %p6786_p6 = por %p145_p3, %p59_p0  ;;  %p152_p7 = scmp.lt.s32.totalorder %s6705_s17, 3 }
   0xd   : > { %s8796_s22 = scalar_select %p6781_p4, 1, 0 }
   0xe   : > { %s8797_s23 = scalar_select %p6786_p6, 1, 0 }
   0xf   : > { %p6791_p8 = pnand %p5067_p5, %p152_p7  ;;  %s6707_s25 = smov [#allocation5]  }
  0x10   : > { %s166_s26 = sshll.u32 %s6707_s25, 4  ;;  %s6708_s28 = smov [#allocation7]   ;;  %s6795_s26 = int_to_ptr.vmem [resolvable:$true] %s166_s26 }
  0x11   : > { %p6353_p9 = pneg %p6791_p8  ;;  %s182_s29 = sshll.u32 %s6708_s28, 4  ;;  %s6806_s29 = int_to_ptr.vmem [resolvable:$true] %s182_s29 }
  0x12   : > { %s6533_s5 = scalar_lea.hbm %s8768_s1, 288 }
  0x13   : > { %p6802_p11 = pnand %p6353_p9, %p6771_p1  ;;  %p6534_p12 = scmp.ne.s32.totalorder %s8768_s1, %s6533_s5 }
  0x14   : > { %p6540_p5 = scmp.lt.u32.totalorder %s6533_s5, %s8768_s1 }
  0x15   : > { %p6535_p13 = pneg %p6802_p11 }
  0x17   : > { %p6536_p0 = pnand %p6535_p13, %p6534_p12 }
  0x19   : > { %p6537_p3 = pneg %p6536_p0 }
  0x1b   : > { %p6542_p7 = pnand %p6540_p5, %p6537_p3 }
  0x1d   : > { %6545 = shalt.err (!%p6542_p7)
}
  0x1e   : > { %s6546_s10 = scalar_lea.vmem %s6795_s26, 288  ;;  %p6554_p1 = scmp.lt.s32.totalorder %s6795_s26, %s6795_s26 }
  0x1f   : > { %p6547_p9 = scmp.ne.s32.totalorder %s6795_s26, %s6546_s10  ;;  %p6555_p12 = scmp.lt.s32.totalorder %s6546_s10, %s6546_s10 }
  0x21   : > { %p6549_p10 = pnand %p6547_p9, %p6535_p13  ;;  %p6556_p0 = por %p6555_p12, %p6554_p1 }
  0x23   : > { %p6550_p6 = pneg %p6549_p10 }
  0x25   : > { %p6557_p4 = pnand %p6556_p0, %p6550_p6 }
  0x27   : > { %6560 = shalt.err (!%p6557_p4)
}
  0x28   : > { %s6709_s11 = smov 32   ;;  %s6710_s18 = smov 2  }
  0x29   : > { %6356 = dma.hbm_to_vmem [thread:$0]  (!%p6802_p11), %s8768_s1, 288, %s6795_s26, [#allocation6], %s6709_s11, %s6709_s11, %s6710_s18  }
  0x2a   : > { %s6561_s4 = scalar_lea.hbm %s8769_s2, 16 }
  0x2b   : > { %p6562_p1 = scmp.ne.s32.totalorder %s8769_s2, %s6561_s4  ;;  %p6568_p10 = scmp.lt.u32.totalorder %s6561_s4, %s8769_s2 }
  0x2d   : > { %p6564_p4 = pnand %p6562_p1, %p6535_p13 }
  0x2f   : > { %p6565_p6 = pneg %p6564_p4 }
  0x31   : > { %p6570_p3 = pnand %p6568_p10, %p6565_p6 }
  0x33   : > { %6573 = shalt.err (!%p6570_p3)
}
  0x34   : > { %s6574_s26 = scalar_lea.vmem %s6806_s29, 16  ;;  %s6581_s9 = scalar_lea.vmem %s6806_s29, 32 }
  0x35   : > { %p6575_p5 = scmp.ne.s32.totalorder %s6806_s29, %s6574_s26  ;;  %p6582_p12 = scmp.lt.s32.totalorder %s6806_s29, %s6806_s29 }
  0x36   : > { %p6583_p0 = scmp.lt.s32.totalorder %s6581_s9, %s6574_s26 }
  0x37   : > { %p6577_p7 = pnand %p6575_p5, %p6535_p13 }
  0x38   : > { %p6584_p1 = por %p6583_p0, %p6582_p12 }
  0x39   : > { %p6578_p9 = pneg %p6577_p7 }
  0x3b   : > { %p6585_p4 = pnand %p6584_p1, %p6578_p9 }
  0x3d   : > { %6588 = shalt.err (!%p6585_p4)
}
  0x3e   : > { %6359 = dma.hbm_to_vmem [thread:$0]  (!%p6802_p11), %s8769_s2, 16, %s6806_s29, [#allocation6]  }
  0x3f   : > { %s39_s18 = sadd.s32 1, %s6701_s16  ;;  %s46_s19 = sadd.s32 1, %s6693_s14 }
  0x40   : > { %p41_p13 = scmp.ge.s32.totalorder %s39_s18, 2  ;;  %p53_p6 = scmp.ne.s32.totalorder %s6693_s14, %s6689_s13 }
  0x41   : > { %p54_p10 = scmp.eq.s32.totalorder %s6705_s17, 0  ;;  %p6370_p3 = scmp.lt.s32.totalorder %s6705_s17, 2 }
  0x42   : > { %s8880_s18 = smov (%p41_p13, %s39_s18), 0  ;;  %p6871_p7 = por %p6775_p2, %p53_p6 }
  0x43   : > { %p55_p5 = por %p54_p10, %p53_p6  ;;  %s43_s25 = ssub.s32 %s6701_s16, %s8880_s18 }
  0x44   : > { %s8800_s27 = scalar_select %p6871_p7, 1, 0 }
  0x45   : > { %s193_s28 = sand.u32 1, %s6693_s14   ;;  %p44_p9 = scmp.eq.s32.totalorder %s43_s25, 0 }
  0x46   : > { %s6338_s29 = smul.u32 216, %s193_s28  ;;  %p6878_p11 = pnand %p6370_p3, %p55_p5 }
  0x47   : > { %s6883_s4 = scalar_select %p44_p9, %s6693_s14, %s46_s19  }
  0x48   : > { %s6339_s5 = smul.u32 3456, %s6701_s16  ;;  %s197_s6 = scalar_lea.vmem [#allocation2], %s6338_s29 }
  0x49   : > { %s204_s7 = sshll.u32 %s197_s6, 4  ;;  %s6893_s9 = scalar_lea.sflag [#allocation3], %s193_s28  ;;  %s6891_s7 = int_to_ptr.vmem [resolvable:$true] %s204_s7 }
  0x4a   : > { %s6889_s26 = scalar_lea.hbm %s8767_s0, %s6339_s5  ;;  %p6591_p12 = pneg %p6878_p11 }
  0x4b   : > { %s6589_s10 = scalar_lea.hbm %s6889_s26, 3456  ;;  %s6594_s25 = scalar_lea.hbm %s8767_s0, 6912 }
  0x4c   : > { %p6590_p2 = scmp.ne.s32.totalorder %s6889_s26, %s6589_s10  ;;  %p6595_p4 = scmp.lt.u32.totalorder %s6889_s26, %s8767_s0 }
  0x4d   : > { %p6596_p13 = scmp.lt.u32.totalorder %s6594_s25, %s6589_s10  ;;  %p6598_p10 = scmp.lt.u32.totalorder %s6589_s10, %s6889_s26 }
  0x4e   : > { %p6592_p0 = pnand %p6591_p12, %p6590_p2 }
  0x4f   : > { %p6597_p6 = por %p6596_p13, %p6595_p4 }
  0x50   : > { %p6593_p1 = pneg %p6592_p0 }
  0x51   : > { %p6599_p3 = por %p6598_p10, %p6597_p6 }
  0x53   : > { %p6600_p5 = pnand %p6599_p3, %p6593_p1 }
  0x55   : > { %6603 = shalt.err (!%p6600_p5)
}
  0x56   : > { %s6604_s28 = scalar_lea.vmem %s6891_s7, 3456  ;;  %s6711_s6 = smov [#allocation2]  }
  0x57   : > { %p6605_p9 = scmp.ne.s32.totalorder %s6891_s7, %s6604_s28  ;;  %s6609_s21 = sshll.u32 %s6711_s6, 4  ;;  %s6610_s21 = int_to_ptr.vmem [resolvable:$false] %s6609_s21 }
  0x58   : > { %s6611_s8 = scalar_lea.vmem %s6610_s21, 6912  ;;  %p6612_p7 = scmp.lt.s32.totalorder %s6891_s7, %s6610_s21 }
  0x59   : > { %p6607_p2 = pnand %p6605_p9, %p6591_p12  ;;  %p6613_p4 = scmp.lt.s32.totalorder %s6611_s8, %s6604_s28 }
  0x5b   : > { %p6608_p0 = pneg %p6607_p2  ;;  %p6614_p13 = por %p6613_p4, %p6612_p7 }
  0x5d   : > { %p6615_p6 = pnand %p6614_p13, %p6608_p0 }
  0x5f   : > { %6618 = shalt.err (!%p6615_p6)
}
  0x60   : > { %s6712_s10 = smov 64   ;;  %s6713_s11 = smov 4  }
  0x61   : > { %6363 = dma.hbm_to_vmem [thread:$0]  (!%p6878_p11), %s6889_s26, 3456, %s6891_s7, %s6893_s9, %s6712_s10, %s6712_s10, %s6713_s11  }
  0x62   : > { %216 = sbr.rel (%p6791_p8) target bundleno = 698 (0x2ba), region = 32 }
  0x69   : > { %s6924_s19 = sand.u32 1, %s6689_s13   ;;  %p8802_p7 = scmp.ne.s32.totalorder %s8796_s22, 0 }
  0x6a   : > { %s6340_s25 = smul.u32 216, %s6924_s19  ;;  %s219_s29 = scalar_lea.sflag [#allocation3], %s6924_s19 }
  0x6c   : > { %s6928_s5 = scalar_lea.vmem [#allocation2], %s6340_s25 }
  0x6d   : > { %6672 = dma.done.wait (%p8802_p7), %s219_s29, 3456  }
  0x6e   : > { %6674 = vsyncadd (%p8802_p7), %s219_s29, 4294963840  ;;  %p8803_p11 = scmp.ne.s32.totalorder %s8794_s20, 0 }
  0x70   : > { %6676 = dma.done.wait (%p8803_p11), [#allocation6], 304  }
  0x71   : > { %6678 = vsyncadd (%p8803_p11), [#allocation6], 4294966992  ;;  %vm794_vm0 = vcmask 1041408   ;;  %vm308_vm1 = vsmask.f32 3328  ;;  %vm745_vm4 = vcmask 31744  }
  0x72   : > { %vm309_vm2 = vsmask.f32 7440  ;;  %v696_v0 = vld [vmem:[#allocation5 + $0x2] sm:$0x3]  ;;  %v2503_v1 = vld [vmem:[#allocation5 + $0x8] sm:$0x3] }
  0x73   : > { %v259_v2 = vld [vmem:[%s6928_s5] sm:$0xf]  ;;  %6328 = vmatprep.subr.msk.bf16.mxu1 %vm794_vm0, %v696_v0  ;;  %6332 = vmatprep.subr.msk.bf16.mxu0 %vm794_vm0, %v2503_v1  ;;  %v796_v3 = vsel %vm794_vm0, %v696_v0, 0  ;;  %v6943_v4 = vsel %vm794_vm0, %v2503_v1, 0  ;;  %v260_v5 = vld [vmem:[%s6928_s5 + $0x4] sm:$0xf]  ;;  %vm6966_vm3 = vmor %vm308_vm1, %vm309_vm2 }
  0x74   : > { %8804 = vst [vmem:[#allocation12_spill] sm:$0xff] %v6943_v4  ;;  %v292_v6 = vld [vmem:[%s6928_s5 + $0x8] sm:$0x1]  ;;  %5765 = vmatpush3.bf16.msra.mxu1 %v796_v3  ;;  %5901 = vmatpush3.bf16.msra.mxu0 %v6943_v4  ;;  %v312_v7 = vshrl.u32 %v259_v2, 16  ;;  %v315_v8 = vshll.u32 %v259_v2, 16  ;;  %v321_v9 = vshll.u32 %v260_v5, 16 }
  0x75   : > { %v325_v10 = vshrl.u32 %v260_v5, 16  ;;  %v291_v11 = vld [vmem:[#allocation5] sm:$0x3]  ;;  %v331_v12 = vshll.u32 %v292_v6, 16  ;;  %v5252_v13 = vld [vmem:[%s6928_s5 + $0xc] sm:$0xf] }
  0x76   : > { %6329 = vmatprep.subr.msk.bf16.mxu1 %vm794_vm0, %v291_v11  ;;  %v6951_v14 = vld [vmem:[%s6928_s5 + $0x10] sm:$0xf]  ;;  %v314_v15 = vrot.slane %v312_v7, 4  ;;  %v317_v16 = vrot.slane %v315_v8, 5  ;;  %v323_v17 = vrot.slane %v321_v9, 5  ;;  %v2119_v21 = vshrl.u32 %v5252_v13, 16 }
  0x77   : > { %v327_v18 = vrot.slane %v325_v10, 4  ;;  %v6954_v19 = vld [vmem:[%s6928_s5 + $0x14] sm:$0x1]  ;;  %v333_v20 = vrot.slane %v331_v12, 5  ;;  %v2122_v22 = vshll.u32 %v5252_v13, 16  ;;  %v2128_v23 = vshll.u32 %v6951_v14, 16 }
  0x78   : > { %v6957_v24 = vld [vmem:[#allocation5 + $0xa] sm:$0x3]  ;;  %v318_v25 = vor.u32 %v317_v16, %v314_v15  ;;  %v2132_v27 = vshrl.u32 %v6951_v14, 16  ;;  %v2138_v28 = vshll.u32 %v6954_v19, 16  ;;  %v261_v29 = vld [vmem:[%s6928_s5 + $0xc] sm:$0xf] }
  0x79   : > { %v328_v26 = vor.u32 %v327_v18, %v323_v17  ;;  %6334 = vmatprep.subr.msk.bf16.mxu0 %vm794_vm0, %v6957_v24  ;;  %v2121_v31 = vrot.slane %v2119_v21, 4  ;;  %v2124_v32 = vrot.slane %v2122_v22, 5  ;;  %v2130_v33 = vrot.slane %v2128_v23, 5  ;;  %v262_v34 = vld [vmem:[%s6928_s5 + $0x10] sm:$0xf]  ;;  %s5075_s20 = sshll.u32 %s6924_s19, 8 }
  0x7a   : > { %v319_v35 = vrot.slane %v318_v25, 4  ;;  %v2134_v37 = vrot.slane %v2132_v27, 4  ;;  %v2140_v39 = vrot.slane %v2138_v28, 5  ;;  %v293_v40 = vld [vmem:[%s6928_s5 + $0x14] sm:$0x1]  ;;  %v336_v41 = vshrl.u32 %v261_v29, 16 }
  0x7b   : > { %v329_v36 = vrot.slane %v328_v26, 4  ;;  %v2125_v38 = vor.u32 %v2124_v32, %v2121_v31  ;;  %v339_v42 = vshll.u32 %v261_v29, 16  ;;  %v345_v46 = vshll.u32 %v262_v34, 16  ;;  %v5255_v55 = vld [vmem:[%s6928_s5 + $0x18] sm:$0xf]  ;;  %s8645_s22 = scalar_lea.vmem [#allocation8], %s5075_s20 }
  0x7c   : > { %v324_v43 = vsel %vm6966_vm3, %v319_v35, %v323_v17  ;;  %v2135_v45 = vor.u32 %v2134_v37, %v2130_v33  ;;  %v338_v49 = vrot.slane %v336_v41, 4  ;;  %v349_v53 = vshrl.u32 %v262_v34, 16  ;;  %v6983_v60 = vld [vmem:[%s6928_s5 + $0x1c] sm:$0xf]  ;;  %v6986_v61 = vld [vmem:[%s6928_s5 + $0x20] sm:$0x1] }
  0x7d   : > { %v334_v44 = vsel %vm6966_vm3, %v329_v36, %v333_v20  ;;  %v2126_v48 = vrot.slane %v2125_v38, 4  ;;  %v341_v50 = vrot.slane %v339_v42, 5  ;;  %v347_v52 = vrot.slane %v345_v46, 5  ;;  %v263_v16 = vld [vmem:[%s6928_s5 + $0x18] sm:$0xf]  ;;  %s5610_s24 = sshll.u32 %s6697_s15, 12 }
  0x7e   : > { %v5076_v47 = vcombine.low %v324_v43, %v334_v44  ;;  %v2136_v51 = vrot.slane %v2135_v45, 4  ;;  %v355_v54 = vshll.u32 %v293_v40, 16  ;;  %v2862_v57 = vrot.slane %v6951_v14, 5  ;;  %v264_v22 = vld [vmem:[%s6928_s5 + $0x1c] sm:$0xf]  ;;  %s4944_s30 = sshll.u32 %s8645_s22, 4  ;;  %s8713_s9 = scalar_lea.hbm %s8770_s3, %s5610_s24  ;;  %s8715_s30 = int_to_ptr.vmem [resolvable:$true] %s4944_s30 }
  0x7f   : > { %v2131_v56 = vsel %vm6966_vm3, %v2126_v48, %v2130_v33  ;;  %v2865_v58 = vrot.slane %v6954_v19, 5  ;;  %v342_v59 = vor.u32 %v341_v50, %v338_v49  ;;  %v351_v63 = vrot.slane %v349_v53, 4  ;;  %v294_v28 = vld [vmem:[%s6928_s5 + $0x20] sm:$0x1]  ;;  %v5258_v34 = vld [vmem:[%s6928_s5 + $0x24] sm:$0xf] }
  0x80   : > { %5766 = vmatprep.mubr.msk.bf16.mxu1 %vm745_vm4, %v5076_v47  ;;  %v2141_v62 = vsel %vm6966_vm3, %v2136_v51, %v2140_v39  ;;  %v357_v0 = vrot.slane %v355_v54, 5  ;;  %v1088_v1 = vsel %vm794_vm0, %v291_v11, 0  ;;  %v2143_v5 = vshrl.u32 %v5255_v55, 16  ;;  %v7012_v43 = vld [vmem:[%s6928_s5 + $0x28] sm:$0xf]  ;;  %s4928_s15 = scalar_lea.sflag [#allocation4], %s6924_s19 }
  0x81   : > { %v5300_v2 = vcombine.low %v2131_v56, %v2141_v62  ;;  %v343_v3 = vrot.slane %v342_v59, 4  ;;  %v2146_v6 = vshll.u32 %v5255_v55, 16  ;;  %v352_v7 = vor.u32 %v351_v63, %v347_v52  ;;  %v7018_v46 = vld [vmem:[%s6928_s5 + $0x2c] sm:$0x1]  ;;  %s6619_s28 = scalar_lea.vmem %s8715_s30, 4096  ;;  %p8871_p12 = scmp.ne.s32.totalorder %s8800_s27, 0 }
  0x82   : > { %v2152_v8 = vshll.u32 %v6983_v60, 16  ;;  %v2156_v9 = vshrl.u32 %v6983_v60, 16  ;;  %v2162_v10 = vshll.u32 %v6986_v61, 16  ;;  %v2145_v13 = vrot.slane %v2143_v5, 4  ;;  %p6620_p8 = scmp.ne.s32.totalorder %s8715_s30, %s6619_s28  ;;  %s6714_s6 = smov [#allocation8]  }
  0x83   : > { %5902 = vmatprep.mubr.msk.bf16.mxu0 %vm745_vm4, %v5300_v2  ;;  %v348_v12 = vsel %vm6966_vm3, %v343_v3, %v347_v52  ;;  %v2148_v11 = vrot.slane %v2146_v6, 5  ;;  %v2869_v15 = vrot.slane %v6983_v60, 5  ;;  %v353_v17 = vrot.slane %v352_v7, 4  ;;  %v265_v52 = vld [vmem:[%s6928_s5 + $0x24] sm:$0xf]  ;;  %s6623_s21 = sshll.u32 %s6714_s6, 4  ;;  %s6624_s21 = int_to_ptr.vmem [resolvable:$false] %s6623_s21 }
  0x84   : > { %v2154_v18 = vrot.slane %v2152_v8, 5  ;;  %v2158_v20 = vrot.slane %v2156_v9, 4  ;;  %v2164_v21 = vrot.slane %v2162_v10, 5  ;;  %v2872_v26 = vrot.slane %v6986_v61, 5  ;;  %p6621_p1 = pnand %p6620_p8, %p8871_p12  ;;  %s6625_s8 = scalar_lea.vmem %s6624_s21, 8192 }
  0x85   : > { %v2149_v23 = vor.u32 %v2148_v11, %v2145_v13  ;;  %v7002_v25 = vrot.slane %v2869_v15, 4  ;;  %v3071_v27 = vsel %vm794_vm0, %v6957_v24, 0  ;;  %v358_v29 = vsel %vm6966_vm3, %v353_v17, %v357_v0  ;;  %v5261_v13 = vld [vmem:[%s6928_s5 + $0x30] sm:$0xf]  ;;  %p6626_p3 = scmp.lt.s32.totalorder %s8715_s30, %s6624_s21  ;;  %p6627_p5 = scmp.lt.s32.totalorder %s6625_s8, %s6619_s28 }
  0x86   : > { %v2159_v31 = vor.u32 %v2158_v20, %v2154_v18  ;;  %v360_v32 = vshrl.u32 %v263_v16, 16  ;;  %v363_v33 = vshll.u32 %v263_v16, 16  ;;  %v5077_v35 = vcombine.low %v348_v12, %v358_v29  ;;  %v295_v12 = vld [vmem:[%s6928_s5 + $0x2c] sm:$0x1]  ;;  %p6622_p10 = pneg %p6621_p1 }
  0x87   : > { %v2150_v36 = vrot.slane %v2149_v23, 4  ;;  %v369_v37 = vshll.u32 %v264_v22, 16  ;;  %v373_v38 = vshrl.u32 %v264_v22, 16  ;;  %v379_v42 = vshll.u32 %v294_v28, 16  ;;  %p6628_p9 = por %p6627_p5, %p6626_p3 }
  0x88   : > { %v2160_v39 = vrot.slane %v2159_v31, 4  ;;  %v362_v40 = vrot.slane %v360_v32, 4  ;;  %v365_v41 = vrot.slane %v363_v33, 5  ;;  %5767 = vmatmul.mubr.msk.bf16.vlgmr.msra.gmra.mrb[0].mxu1 %vm745_vm4, %v5077_v35  ;;  %v2167_v47 = vshrl.u32 %v5258_v34, 16 }
  0x89   : > { %v2155_v24 = vsel %vm6966_vm3, %v2150_v36, %v2154_v18  ;;  %v371_v44 = vrot.slane %v369_v37, 5  ;;  %v375_v45 = vrot.slane %v373_v38, 4  ;;  %5799 = vmatpush3.bf16.msra.mxu1 %v1088_v1  ;;  %v381_v50 = vrot.slane %v379_v42, 5  ;;  %v266_v1 = vld [vmem:[%s6928_s5 + $0x28] sm:$0xf]  ;;  %p6629_p2 = pnand %p6628_p9, %p6622_p10 }
  0x8a   : > { %v2165_v48 = vsel %vm6966_vm3, %v2160_v39, %v2164_v21  ;;  %v366_v49 = vor.u32 %v365_v41, %v362_v40  ;;  %v2170_v51 = vshll.u32 %v5258_v34, 16  ;;  %v2169_v55 = vrot.slane %v2167_v47, 4  ;;  %v7041_v36 = vld [vmem:[%s6928_s5 + $0x38] sm:$0x1]  ;;  %v267_v42 = vld [vmem:[%s6928_s5 + $0x30] sm:$0xf] }
  0x8b   : > { %v5301_v53 = vcombine.low %v2155_v24, %v2165_v48  ;;  %v376_v54 = vor.u32 %v375_v45, %v371_v44  ;;  %v2176_v56 = vshll.u32 %v7012_v43, 16  ;;  %v2180_v63 = vshrl.u32 %v7012_v43, 16  ;;  %v268_v48 = vld [vmem:[%s6928_s5 + $0x34] sm:$0xf] }
  0x8c   : > { %v367_v59 = vrot.slane %v366_v49, 4  ;;  %v2172_v62 = vrot.slane %v2170_v51, 5  ;;  %v2186_v0 = vshll.u32 %v7018_v46, 16  ;;  %v384_v5 = vshrl.u32 %v265_v52, 16 }
  0x8d   : > { %5903 = vmatmul.mubr.msk.bf16.vlgmr.msra.gmra.mrb[0].mxu0 %vm745_vm4, %v5301_v53  ;;  %v377_v2 = vrot.slane %v376_v54, 4  ;;  %v2178_v3 = vrot.slane %v2176_v56, 5  ;;  %v387_v6 = vshll.u32 %v265_v52, 16  ;;  %v2182_v9 = vrot.slane %v2180_v63, 4  ;;  %v296_v56 = vld [vmem:[%s6928_s5 + $0x38] sm:$0x1] }
  0x8e   : > { %5935 = vmatpush3.bf16.msra.mxu0 %v3071_v27  ;;  %v372_v7 = vsel %vm6966_vm3, %v367_v59, %v371_v44  ;;  %v2173_v8 = vor.u32 %v2172_v62, %v2169_v55  ;;  %v2188_v10 = vrot.slane %v2186_v0, 5  ;;  %v386_v16 = vrot.slane %v384_v5, 4  ;;  %v7035_v27 = vld [vmem:[%s6928_s5 + $0x34] sm:$0xf] }
  0x8f   : > { %v382_v11 = vsel %vm6966_vm3, %v377_v2, %v381_v50  ;;  %v389_v17 = vrot.slane %v387_v6, 5  ;;  %v393_v18 = vshll.u32 %v266_v1, 16  ;;  %v2183_v22 = vor.u32 %v2182_v9, %v2178_v3  ;;  %v5264_v2 = vld [vmem:[%s6928_s5 + $0x3c] sm:$0xf] }
  0x90   : > { %v5078_v20 = vcombine.low %v372_v7, %v382_v11  ;;  %v2174_v21 = vrot.slane %v2173_v8, 4  ;;  %v397_v23 = vshrl.u32 %v266_v1, 16  ;;  %v403_v31 = vshll.u32 %v295_v12, 16  ;;  %v7058_v8 = vld [vmem:[%s6928_s5 + $0x40] sm:$0xf] }
  0x91   : > { %v390_v28 = vor.u32 %v389_v17, %v386_v16  ;;  %v395_v29 = vrot.slane %v393_v18, 5  ;;  %v2191_v32 = vshrl.u32 %v5261_v13, 16  ;;  %v2184_v34 = vrot.slane %v2183_v22, 4  ;;  %v7063_v18 = vld [vmem:[%s6928_s5 + $0x44] sm:$0x1] }
  0x92   : > { %5770 = vmatprep.mubr.msk.bf16.mxu1 %vm745_vm4, %v5078_v20  ;;  %v2179_v33 = vsel %vm6966_vm3, %v2174_v21, %v2178_v3  ;;  %v399_v35 = vrot.slane %v397_v23, 4  ;;  %v2194_v37 = vshll.u32 %v5261_v13, 16  ;;  %v405_v39 = vrot.slane %v403_v31, 5  ;;  %v7068_v31 = vld [vmem:[#allocation5 + $0xc] sm:$0x3] }
  0x93   : > { %v391_v38 = vrot.slane %v390_v28, 4  ;;  %v2193_v40 = vrot.slane %v2191_v32, 4  ;;  %v2200_v41 = vshll.u32 %v7035_v27, 16  ;;  %v2189_v24 = vsel %vm6966_vm3, %v2184_v34, %v2188_v10  ;;  %6335 = vmatprep.subr.msk.bf16.mxu0 %vm794_vm0, %v7068_v31 }
  0x94   : > { %v400_v44 = vor.u32 %v399_v35, %v395_v29  ;;  %v2196_v45 = vrot.slane %v2194_v37, 5  ;;  %v2204_v47 = vshrl.u32 %v7035_v27, 16  ;;  %v5302_v49 = vcombine.low %v2179_v33, %v2189_v24 }
  0x95   : > { %v396_v50 = vsel %vm6966_vm3, %v391_v38, %v395_v29  ;;  %v2202_v51 = vrot.slane %v2200_v41, 5  ;;  %v2210_v52 = vshll.u32 %v7041_v36, 16  ;;  %v408_v59 = vshrl.u32 %v267_v42, 16  ;;  %v269_v29 = vld [vmem:[%s6928_s5 + $0x3c] sm:$0xf] }
  0x96   : > { %v401_v53 = vrot.slane %v400_v44, 4  ;;  %v2197_v54 = vor.u32 %v2196_v45, %v2193_v40  ;;  %v2206_v55 = vrot.slane %v2204_v47, 4  ;;  %5906 = vmatprep.mubr.msk.bf16.mxu0 %vm745_vm4, %v5302_v49  ;;  %v411_v63 = vshll.u32 %v267_v42, 16  ;;  %v270_v44 = vld [vmem:[%s6928_s5 + $0x40] sm:$0xf] }
  0x97   : > { %v2212_v62 = vrot.slane %v2210_v52, 5  ;;  %v417_v0 = vshll.u32 %v268_v48, 16  ;;  %v421_v1 = vshrl.u32 %v268_v48, 16  ;;  %v410_v7 = vrot.slane %v408_v59, 4  ;;  %v5267_v52 = vld [vmem:[%s6928_s5 + $0x48] sm:$0xf] }
  0x98   : > { %v406_v3 = vsel %vm6966_vm3, %v401_v53, %v405_v39  ;;  %v2198_v5 = vrot.slane %v2197_v54, 4  ;;  %v2207_v6 = vor.u32 %v2206_v55, %v2202_v51  ;;  %v413_v10 = vrot.slane %v411_v63, 5 }
  0x99   : > { %v5079_v9 = vcombine.low %v396_v50, %v406_v3  ;;  %v419_v12 = vrot.slane %v417_v0, 5  ;;  %v423_v13 = vrot.slane %v421_v1, 4  ;;  %v427_v17 = vshll.u32 %v296_v56, 16  ;;  %v297_v50 = vld [vmem:[%s6928_s5 + $0x44] sm:$0x1] }
  0x9a   : > { %v2203_v11 = vsel %vm6966_vm3, %v2198_v5, %v2202_v51  ;;  %v2208_v16 = vrot.slane %v2207_v6, 4  ;;  %v2215_v20 = vshrl.u32 %v5264_v2, 16  ;;  %v414_v21 = vor.u32 %v413_v10, %v410_v7  ;;  %v7086_v3 = vld [vmem:[%s6928_s5 + $0x4c] sm:$0xf] }
  0x9b   : > { %5771 = vmatmul.mubr.msk.bf16.gmra.mrb[4].mxu1 %vm745_vm4, %v5079_v9  ;;  %v424_v22 = vor.u32 %v423_v13, %v419_v12  ;;  %v2218_v23 = vshll.u32 %v5264_v2, 16  ;;  %v2224_v28 = vshll.u32 %v7058_v8, 16  ;;  %v429_v33 = vrot.slane %v427_v17, 5  ;;  %v7091_v13 = vld [vmem:[%s6928_s5 + $0x50] sm:$0x1] }
  0x9c   : > { %v2213_v32 = vsel %vm6966_vm3, %v2208_v16, %v2212_v62  ;;  %v2217_v34 = vrot.slane %v2215_v20, 4  ;;  %v2228_v35 = vshrl.u32 %v7058_v8, 16  ;;  %v415_v38 = vrot.slane %v414_v21, 4 }
  0x9d   : > { %v5303_v37 = vcombine.low %v2203_v11, %v2213_v32  ;;  %v425_v39 = vrot.slane %v424_v22, 4  ;;  %v2220_v40 = vrot.slane %v2218_v23, 5  ;;  %v2226_v41 = vrot.slane %v2224_v28, 5  ;;  %v7094_v11 = vld [vmem:[%s6928_s5 + $0x48] sm:$0xf] }
  0x9e   : > { %v2230_v42 = vrot.slane %v2228_v35, 4  ;;  %v2234_v24 = vshll.u32 %v7063_v18, 16  ;;  %v432_v45 = vshrl.u32 %v269_v29, 16  ;;  %v420_v47 = vsel %vm6966_vm3, %v415_v38, %v419_v12  ;;  %v7102_v35 = vld [vmem:[%s6928_s5 + $0x4c] sm:$0xf] }
  0x9f   : > { %5907 = vmatmul.mubr.msk.bf16.gmra.mrb[4].mxu0 %vm745_vm4, %v5303_v37  ;;  %v430_v48 = vsel %vm6966_vm3, %v425_v39, %v429_v33  ;;  %v2221_v49 = vor.u32 %v2220_v40, %v2217_v34  ;;  %v435_v51 = vshll.u32 %v269_v29, 16  ;;  %v441_v63 = vshll.u32 %v270_v44, 16 }
  0xa0   : > { %v5080_v53 = vcombine.low %v420_v47, %v430_v48  ;;  %v2231_v54 = vor.u32 %v2230_v42, %v2226_v41  ;;  %v2236_v55 = vrot.slane %v2234_v24, 5  ;;  %v434_v56 = vrot.slane %v432_v45, 4  ;;  %v5270_v48 = vld [vmem:[%s6928_s5 + $0x54] sm:$0xf] }
  0xa1   : > { %v2222_v59 = vrot.slane %v2221_v49, 4  ;;  %v437_v62 = vrot.slane %v435_v51, 5  ;;  %v445_v0 = vshrl.u32 %v270_v44, 16  ;;  %v451_v2 = vshll.u32 %v297_v50, 16 }
  0xa2   : > { %5774 = vmatprep.mubr.msk.bf16.mxu1 %vm745_vm4, %v5080_v53  ;;  %v2232_v1 = vrot.slane %v2231_v54, 4  ;;  %v2239_v5 = vshrl.u32 %v5267_v52, 16  ;;  %v2242_v6 = vshll.u32 %v5267_v52, 16  ;;  %v443_v10 = vrot.slane %v441_v63, 5  ;;  %v7116_v53 = vld [vmem:[%s6928_s5 + $0x58] sm:$0xf] }
  0xa3   : > { %v2227_v7 = vsel %vm6966_vm3, %v2222_v59, %v2226_v41  ;;  %v438_v9 = vor.u32 %v437_v62, %v434_v56  ;;  %v447_v12 = vrot.slane %v445_v0, 4  ;;  %v453_v17 = vrot.slane %v451_v2, 5  ;;  %v298_v41 = vld [vmem:[%s6928_s5 + $0x50] sm:$0x1] }
  0xa4   : > { %v2237_v16 = vsel %vm6966_vm3, %v2232_v1, %v2236_v55  ;;  %v2241_v20 = vrot.slane %v2239_v5, 4  ;;  %v2244_v21 = vrot.slane %v2242_v6, 5  ;;  %v2248_v29 = vshll.u32 %v7086_v3, 16  ;;  %v7121_v1 = vld [vmem:[%s6928_s5 + $0x5c] sm:$0x1] }
  0xa5   : > { %v5304_v22 = vcombine.low %v2227_v7, %v2237_v16  ;;  %v439_v23 = vrot.slane %v438_v9, 4  ;;  %v448_v28 = vor.u32 %v447_v12, %v443_v10  ;;  %v2252_v33 = vshrl.u32 %v7086_v3, 16 }
  0xa6   : > { %v2245_v32 = vor.u32 %v2244_v21, %v2241_v20  ;;  %v2258_v34 = vshll.u32 %v7091_v13, 16  ;;  %v456_v37 = vshrl.u32 %v7094_v11, 16  ;;  %v2250_v40 = vrot.slane %v2248_v29, 5  ;;  %v7127_v20 = vld [vmem:[%s6928_s5 + $0x54] sm:$0xf] }
  0xa7   : > { %5910 = vmatprep.mubr.msk.bf16.mxu0 %vm745_vm4, %v5304_v22  ;;  %v444_v38 = vsel %vm6966_vm3, %v439_v23, %v443_v10  ;;  %v449_v39 = vrot.slane %v448_v28, 4  ;;  %v459_v42 = vshll.u32 %v7094_v11, 16  ;;  %v2254_v44 = vrot.slane %v2252_v33, 4  ;;  %v7133_v29 = vld [vmem:[%s6928_s5 + $0x58] sm:$0xf] }
  0xa8   : > { %v2246_v24 = vrot.slane %v2245_v32, 4  ;;  %v2260_v45 = vrot.slane %v2258_v34, 5  ;;  %v458_v47 = vrot.slane %v456_v37, 4  ;;  %v465_v51 = vshll.u32 %v7102_v35, 16 }
  0xa9   : > { %v454_v49 = vsel %vm6966_vm3, %v449_v39, %v453_v17  ;;  %v461_v50 = vrot.slane %v459_v42, 5  ;;  %v469_v52 = vshrl.u32 %v7102_v35, 16  ;;  %v2255_v56 = vor.u32 %v2254_v44, %v2250_v40 }
  0xaa   : > { %v5081_v54 = vcombine.low %v444_v38, %v454_v49  ;;  %v2251_v55 = vsel %vm6966_vm3, %v2246_v24, %v2250_v40  ;;  %v475_v59 = vshll.u32 %v298_v41, 16  ;;  %v467_v63 = vrot.slane %v465_v51, 5  ;;  %v299_v40 = vld [vmem:[%s6928_s5 + $0x5c] sm:$0x1] }
  0xab   : > { %v462_v62 = vor.u32 %v461_v50, %v458_v47  ;;  %v471_v0 = vrot.slane %v469_v52, 4  ;;  %v2263_v2 = vshrl.u32 %v5270_v48, 16  ;;  %v2256_v5 = vrot.slane %v2255_v56, 4  ;;  %v7146_v49 = vld [vmem:[#allocation5 + $0x4] sm:$0x3] }
  0xac   : > { %5775 = vmatmul.mubr.msk.bf16.gmra.mrb[8].mxu1 %vm745_vm4, %v5081_v54  ;;  %v477_v6 = vrot.slane %v475_v59, 5  ;;  %v2266_v7 = vshll.u32 %v5270_v48, 16  ;;  %v2272_v9 = vshll.u32 %v7116_v53, 16  ;;  %v2276_v17 = vshrl.u32 %v7116_v53, 16  ;;  %v5273_v48 = vld [vmem:[%s6928_s5 + $0x60] sm:$0xf]  ;;  %6330 = vmatprep.subr.msk.bf16.mxu1 %vm794_vm0, %v7146_v49 }
  0xad   : > { %v463_v10 = vrot.slane %v462_v62, 4  ;;  %v472_v12 = vor.u32 %v471_v0, %v467_v63  ;;  %v2265_v16 = vrot.slane %v2263_v2, 4  ;;  %v2261_v21 = vsel %vm6966_vm3, %v2256_v5, %v2260_v45  ;;  %v7157_v5 = vld [vmem:[%s6928_s5 + $0x68] sm:$0x1] }
  0xae   : > { %v2268_v22 = vrot.slane %v2266_v7, 5  ;;  %v2274_v23 = vrot.slane %v2272_v9, 5  ;;  %v2282_v28 = vshll.u32 %v7121_v1, 16  ;;  %v5305_v32 = vcombine.low %v2251_v55, %v2261_v21  ;;  %v7149_v55 = vld [vmem:[%s6928_s5 + $0x64] sm:$0xf] }
  0xaf   : > { %v468_v33 = vsel %vm6966_vm3, %v463_v10, %v467_v63  ;;  %v473_v34 = vrot.slane %v472_v12, 4  ;;  %v2278_v37 = vrot.slane %v2276_v17, 4  ;;  %v480_v41 = vshrl.u32 %v7127_v20, 16  ;;  %v7163_v17 = vld [vmem:[%s6928_s5 + $0x60] sm:$0xf] }
  0xb0   : > { %v2269_v38 = vor.u32 %v2268_v22, %v2265_v16  ;;  %v2284_v39 = vrot.slane %v2282_v28, 5  ;;  %v483_v42 = vshll.u32 %v7127_v20, 16  ;;  %vm1299_vm5 = vcmask 1042432   ;;  %5911 = vmatmul.mubr.msk.bf16.gmra.mrb[8].mxu0 %vm745_vm4, %v5305_v32 }
  0xb1   : > { %vm1300_vm6 = vcmask 1046532   ;;  %v478_v24 = vsel %vm6966_vm3, %v473_v34, %v477_v6  ;;  %v2279_v44 = vor.u32 %v2278_v37, %v2274_v23  ;;  %v489_v45 = vshll.u32 %v7133_v29, 16 }
  0xb2   : > { %v493_v47 = vshrl.u32 %v7133_v29, 16  ;;  %v5082_v50 = vcombine.low %v468_v33, %v478_v24  ;;  %v2270_v51 = vrot.slane %v2269_v38, 4  ;;  %v482_v52 = vrot.slane %v480_v41, 4  ;;  %v300_v41 = vld [vmem:[%s6928_s5 + $0x68] sm:$0x1]  ;;  %vm7186_vm7 = vmor %vm1299_vm5, %vm1300_vm6 }
  0xb3   : > { %v485_v54 = vrot.slane %v483_v42, 5  ;;  %v2280_v56 = vrot.slane %v2279_v44, 4  ;;  %v491_v59 = vrot.slane %v489_v45, 5  ;;  %v499_v63 = vshll.u32 %v299_v40, 16 }
  0xb4   : > { %v495_v62 = vrot.slane %v493_v47, 4  ;;  %5778 = vmatprep.mubr.msk.bf16.mxu1 %vm745_vm4, %v5082_v50  ;;  %v2275_v0 = vsel %vm6966_vm3, %v2270_v51, %v2274_v23  ;;  %v2287_v6 = vshrl.u32 %v5273_v48, 16  ;;  %v2290_v7 = vshll.u32 %v5273_v48, 16  ;;  %v7166_v23 = vld [vmem:[%s6928_s5 + $0x64] sm:$0xf] }
  0xb5   : > { %v486_v2 = vor.u32 %v485_v54, %v482_v52  ;;  %v2285_v9 = vsel %vm6966_vm3, %v2280_v56, %v2284_v39  ;;  %v501_v12 = vrot.slane %v499_v63, 5  ;;  %v2296_v16 = vshll.u32 %v7149_v55, 16  ;;  %v5332_v50 = vld [vmem:[%s6928_s5 + $0xc] sm:$0xe] }
  0xb6   : > { %v496_v10 = vor.u32 %v495_v62, %v491_v59  ;;  %v5306_v21 = vcombine.low %v2275_v0, %v2285_v9  ;;  %v2289_v28 = vrot.slane %v2287_v6, 4  ;;  %v2292_v32 = vrot.slane %v2290_v7, 5 }
  0xb7   : > { %v487_v22 = vrot.slane %v486_v2, 4  ;;  %v2298_v34 = vrot.slane %v2296_v16, 5  ;;  %v2300_v37 = vshrl.u32 %v7149_v55, 16  ;;  %v2306_v38 = vshll.u32 %v7157_v5, 16 }
  0xb8   : > { %v497_v33 = vrot.slane %v496_v10, 4  ;;  %5914 = vmatprep.mubr.msk.bf16.mxu0 %vm745_vm4, %v5306_v21  ;;  %v2293_v40 = vor.u32 %v2292_v32, %v2289_v28  ;;  %v504_v42 = vshrl.u32 %v7163_v17, 16  ;;  %v507_v24 = vshll.u32 %v7163_v17, 16  ;;  %v7196_v28 = vld [vmem:[%s6928_s5 + $0x70] sm:$0xf] }
  0xb9   : > { %v492_v39 = vsel %vm6966_vm3, %v487_v22, %v491_v59  ;;  %v2302_v45 = vrot.slane %v2300_v37, 4  ;;  %v2308_v47 = vrot.slane %v2306_v38, 5  ;;  %v513_v48 = vshll.u32 %v7166_v23, 16  ;;  %v7181_v59 = vld [vmem:[%s6928_s5 + $0x6c] sm:$0xf] }
  0xba   : > { %v502_v44 = vsel %vm6966_vm3, %v497_v33, %v501_v12  ;;  %v2294_v52 = vrot.slane %v2293_v40, 4  ;;  %v506_v54 = vrot.slane %v504_v42, 4  ;;  %v509_v56 = vrot.slane %v507_v24, 5  ;;  %v301_v38 = vld [vmem:[%s6928_s5 + $0x74] sm:$0x1] }
  0xbb   : > { %v5083_v51 = vcombine.low %v492_v39, %v502_v44  ;;  %v2303_v62 = vor.u32 %v2302_v45, %v2298_v34  ;;  %v515_v63 = vrot.slane %v513_v48, 5  ;;  %v517_v0 = vshrl.u32 %v7166_v23, 16  ;;  %v5333_v40 = vld [vmem:[%s6928_s5 + $0x18] sm:$0xe]  ;;  %v7219_v48 = vld [vmem:[%s6928_s5 + $0x7c] sm:$0xf] }
  0xbc   : > { %v523_v2 = vshll.u32 %v300_v41, 16  ;;  %v2299_v7 = vsel %vm6966_vm3, %v2294_v52, %v2298_v34  ;;  %v510_v9 = vor.u32 %v509_v56, %v506_v54  ;;  %v5348_v10 = vrot.slane %v5332_v50, 9  ;;  %v302_v54 = vld [vmem:[%s6928_s5 + $0x80] sm:$0x1]  ;;  %v5334_v56 = vld [vmem:[%s6928_s5 + $0x24] sm:$0xe] }
  0xbd   : > { %5779 = vmatmul.mubr.msk.bf16.gmra.mrb[12].mxu1 %vm745_vm4, %v5083_v51  ;;  %v2864_v12 = vrot.slane %v2862_v57, 4  ;;  %v2304_v16 = vrot.slane %v2303_v62, 4  ;;  %v519_v21 = vrot.slane %v517_v0, 4  ;;  %v528_v32 = vshrl.u32 %v7181_v59, 16 }
  0xbe   : > { %v525_v22 = vrot.slane %v523_v2, 5  ;;  %v511_v33 = vrot.slane %v510_v9, 4  ;;  %v2863_v34 = vsel %vm7186_vm7, %v5348_v10, %v2862_v57  ;;  %v531_v39 = vshll.u32 %v7181_v59, 16 }
  0xbf   : > { %v2866_v37 = vsel %vm7186_vm7, %v2864_v12, %v2865_v58  ;;  %v2309_v41 = vsel %vm6966_vm3, %v2304_v16, %v2308_v47  ;;  %v520_v42 = vor.u32 %v519_v21, %v515_v63  ;;  %v530_v14 = vrot.slane %v528_v32, 4  ;;  %v7216_v58 = vld [vmem:[%s6928_s5 + $0x78] sm:$0xf]  ;;  %v7240_v12 = vld [vmem:[%s6928_s5 + $0x84] sm:$0xf] }
  0xc0   : > { %v5364_v24 = vcombine.low %v2863_v34, %v2866_v37  ;;  %v5307_v44 = vcombine.low %v2299_v7, %v2309_v41  ;;  %v516_v57 = vsel %vm6966_vm3, %v511_v33, %v515_v63  ;;  %v533_v19 = vrot.slane %v531_v39, 5 }
  0xc1   : > { %v537_v45 = vshll.u32 %v7196_v28, 16  ;;  %v521_v50 = vrot.slane %v520_v42, 4  ;;  %v541_v51 = vshrl.u32 %v7196_v28, 16  ;;  %v547_v52 = vshll.u32 %v301_v38, 16  ;;  %v7250_v38 = vld [vmem:[%s6928_s5 + $0x88] sm:$0xf] }
  0xc2   : > { %v5349_v47 = vrot.slane %v5333_v40, 9  ;;  %5915 = vmatmul.mubr.msk.bf16.gmra.mrb[12].mxu0 %vm745_vm4, %v5307_v44  ;;  %v534_v62 = vor.u32 %v533_v19, %v530_v14  ;;  %v2873_v63 = vsel %vm7186_vm7, %v7002_v25, %v2872_v26  ;;  %v3433_v2 = vsel %vm794_vm0, %v7068_v31, 0  ;;  %v5335_v14 = vld [vmem:[%s6928_s5 + $0x30] sm:$0xe]  ;;  %v7254_v44 = vld [vmem:[#allocation5 + $0xe] sm:$0x3] }
  0xc3   : > { %v539_v0 = vrot.slane %v537_v45, 5  ;;  %v526_v7 = vsel %vm6966_vm3, %v521_v50, %v525_v22  ;;  %5936 = vmatprep.mubr.msk.bf16.mxu0 %vm745_vm4, %v5364_v24  ;;  %v543_v9 = vrot.slane %v541_v51, 4  ;;  %v549_v10 = vrot.slane %v547_v52, 5  ;;  %v303_v24 = vld [vmem:[%s6928_s5 + $0x8c] sm:$0x1] }
  0xc4   : > { %v2870_v61 = vsel %vm7186_vm7, %v5349_v47, %v2869_v15  ;;  %v5084_v16 = vcombine.low %v516_v57, %v526_v7  ;;  %v535_v25 = vrot.slane %v534_v62, 4  ;;  %v552_v31 = vshrl.u32 %v7216_v58, 16 }
  0xc5   : > { %v5365_v26 = vcombine.low %v2870_v61, %v2873_v63  ;;  %v544_v21 = vor.u32 %v543_v9, %v539_v0  ;;  %v555_v22 = vshll.u32 %v7216_v58, 16  ;;  %v561_v32 = vshll.u32 %v7219_v48, 16 }
  0xc6   : > { %v565_v60 = vshrl.u32 %v7219_v48, 16  ;;  %5782 = vmatprep.mubr.msk.bf16.mxu1 %vm745_vm4, %v5084_v16  ;;  %v540_v15 = vsel %vm6966_vm3, %v535_v25, %v539_v0  ;;  %v554_v33 = vrot.slane %v552_v31, 4  ;;  %v571_v34 = vshll.u32 %v302_v54, 16 }
  0xc7   : > { %v5350_v37 = vrot.slane %v5334_v56, 9  ;;  %v545_v39 = vrot.slane %v544_v21, 4  ;;  %v557_v40 = vrot.slane %v555_v22, 5  ;;  %v563_v41 = vrot.slane %v561_v32, 5  ;;  %v7280_v32 = vld [vmem:[%s6928_s5 + $0x94] sm:$0xf] }
  0xc8   : > { %v567_v42 = vrot.slane %v565_v60, 4  ;;  %v573_v57 = vrot.slane %v571_v34, 5  ;;  %v2876_v19 = vrot.slane %v7012_v43, 5  ;;  %v2879_v45 = vrot.slane %v7018_v46, 5  ;;  %v7266_v43 = vld [vmem:[%s6928_s5 + $0x90] sm:$0xf] }
  0xc9   : > { %v576_v50 = vshrl.u32 %v7240_v12, 16  ;;  %v550_v51 = vsel %vm6966_vm3, %v545_v39, %v549_v10  ;;  %v558_v52 = vor.u32 %v557_v40, %v554_v33  ;;  %v579_v54 = vshll.u32 %v7240_v12, 16 }
  0xca   : > { %v568_v47 = vor.u32 %v567_v42, %v563_v41  ;;  %v5085_v56 = vcombine.low %v540_v15, %v550_v51  ;;  %5937 = vmatmul.mubr.msk.bf16.vlgmr.msra.gmra.mrb[0].mxu0 %vm745_vm4, %v5365_v26  ;;  %v2877_v62 = vsel %vm7186_vm7, %v5350_v37, %v2876_v19  ;;  %v2878_v0 = vrot.slane %v2876_v19, 4  ;;  %v304_v37 = vld [vmem:[%s6928_s5 + $0x98] sm:$0x1] }
  0xcb   : > { %v578_v63 = vrot.slane %v576_v50, 4  ;;  %5969 = vmatpush3.bf16.msra.mxu0 %v3433_v2  ;;  %v559_v46 = vrot.slane %v558_v52, 4  ;;  %v581_v9 = vrot.slane %v579_v54, 5  ;;  %v585_v10 = vshll.u32 %v7250_v38, 16  ;;  %v7297_v52 = vld [vmem:[%s6928_s5 + $0x9c] sm:$0xf] }
  0xcc   : > { %v569_v7 = vrot.slane %v568_v47, 4  ;;  %5783 = vmatmul.mubr.msk.bf16.gmra.mrb[16].mxu1 %vm745_vm4, %v5085_v56  ;;  %v2880_v61 = vsel %vm7186_vm7, %v2878_v0, %v2879_v45  ;;  %v589_v16 = vshrl.u32 %v7250_v38, 16  ;;  %v595_v25 = vshll.u32 %v303_v24, 16  ;;  %6336 = vmatprep.subr.msk.bf16.mxu0 %vm794_vm0, %v7254_v44  ;;  %v5336_v45 = vld [vmem:[%s6928_s5 + $0x3c] sm:$0xe] }
  0xcd   : > { %v5351_v26 = vrot.slane %v5335_v14, 9  ;;  %v564_v2 = vsel %vm6966_vm3, %v559_v46, %v563_v41  ;;  %v5366_v21 = vcombine.low %v2877_v62, %v2880_v61  ;;  %v582_v22 = vor.u32 %v581_v9, %v578_v63  ;;  %v7300_v0 = vld [vmem:[%s6928_s5 + $0xa0] sm:$0xf] }
  0xce   : > { %v574_v31 = vsel %vm6966_vm3, %v569_v7, %v573_v57  ;;  %v587_v15 = vrot.slane %v585_v10, 5  ;;  %v591_v33 = vrot.slane %v589_v16, 4  ;;  %v597_v34 = vrot.slane %v595_v25, 5 }
  0xcf   : > { %v5086_v60 = vcombine.low %v564_v2, %v574_v31  ;;  %5940 = vmatprep.mubr.msk.bf16.mxu0 %vm745_vm4, %v5366_v21  ;;  %v583_v39 = vrot.slane %v582_v22, 4  ;;  %v2883_v40 = vrot.slane %v7035_v27, 5  ;;  %v2886_v41 = vrot.slane %v7041_v36, 5 }
  0xd0   : > { %v600_v42 = vshrl.u32 %v7266_v43, 16  ;;  %v592_v24 = vor.u32 %v591_v33, %v587_v15  ;;  %v603_v14 = vshll.u32 %v7266_v43, 16  ;;  %v609_v57 = vshll.u32 %v7280_v32, 16 }
  0xd1   : > { %5786 = vmatprep.mubr.msk.bf16.mxu1 %vm745_vm4, %v5086_v60  ;;  %v613_v19 = vshrl.u32 %v7280_v32, 16  ;;  %v588_v50 = vsel %vm6966_vm3, %v583_v39, %v587_v15  ;;  %v2884_v27 = vsel %vm7186_vm7, %v5351_v26, %v2883_v40  ;;  %v2885_v36 = vrot.slane %v2883_v40, 4  ;;  %v305_v26 = vld [vmem:[%s6928_s5 + $0xa4] sm:$0x1]  ;;  %v5337_v60 = vld [vmem:[%s6928_s5 + $0x48] sm:$0xe] }
  0xd2   : > { %v602_v51 = vrot.slane %v600_v42, 4  ;;  %v593_v47 = vrot.slane %v592_v24, 4  ;;  %v605_v54 = vrot.slane %v603_v14, 5  ;;  %v611_v56 = vrot.slane %v609_v57, 5 }
  0xd3   : > { %v615_v62 = vrot.slane %v613_v19, 4  ;;  %v2887_v63 = vsel %vm7186_vm7, %v2885_v36, %v2886_v41  ;;  %v619_v46 = vshll.u32 %v304_v37, 16  ;;  %v5352_v7 = vrot.slane %v5336_v45, 9  ;;  %v7315_v37 = vld [vmem:[%s6928_s5 + $0xa8] sm:$0xf] }
  0xd4   : > { %v2890_v9 = vrot.slane %v7058_v8, 5  ;;  %v598_v10 = vsel %vm6966_vm3, %v593_v47, %v597_v34  ;;  %v5367_v61 = vcombine.low %v2884_v27, %v2887_v63  ;;  %v606_v16 = vor.u32 %v605_v54, %v602_v51  ;;  %v7328_v19 = vld [vmem:[%s6928_s5 + $0xac] sm:$0xf]  ;;  %v306_v51 = vld [vmem:[%s6928_s5 + $0xb0] sm:$0x1] }
  0xd5   : > { %v616_v25 = vor.u32 %v615_v62, %v611_v56  ;;  %v5087_v2 = vcombine.low %v588_v50, %v598_v10  ;;  %v621_v31 = vrot.slane %v619_v46, 5  ;;  %v2893_v33 = vrot.slane %v7063_v18, 5 }
  0xd6   : > { %v2891_v21 = vsel %vm7186_vm7, %v5352_v7, %v2890_v9  ;;  %v2892_v22 = vrot.slane %v2890_v9, 4  ;;  %5941 = vmatmul.mubr.msk.bf16.gmra.mrb[4].mxu0 %vm745_vm4, %v5367_v61  ;;  %v607_v15 = vrot.slane %v606_v16, 4  ;;  %v624_v34 = vshrl.u32 %v7297_v52, 16 }
  0xd7   : > { %v617_v8 = vrot.slane %v616_v25, 4  ;;  %5787 = vmatmul.mubr.msk.bf16.gmra.mrb[20].mxu1 %vm745_vm4, %v5087_v2  ;;  %v627_v39 = vshll.u32 %v7297_v52, 16  ;;  %v633_v40 = vshll.u32 %v7300_v0, 16  ;;  %v637_v41 = vshrl.u32 %v7300_v0, 16 }
  0xd8   : > { %v643_v42 = vshll.u32 %v305_v26, 16  ;;  %v612_v24 = vsel %vm6966_vm3, %v607_v15, %v611_v56  ;;  %v2894_v14 = vsel %vm7186_vm7, %v2892_v22, %v2893_v33  ;;  %v626_v57 = vrot.slane %v624_v34, 4 }
  0xd9   : > { %v622_v18 = vsel %vm6966_vm3, %v617_v8, %v621_v31  ;;  %v5368_v50 = vcombine.low %v2891_v21, %v2894_v14  ;;  %v629_v27 = vrot.slane %v627_v39, 5  ;;  %v635_v36 = vrot.slane %v633_v40, 5  ;;  %v7347_v40 = vld [vmem:[%s6928_s5 + $0xb4] sm:$0xf]  ;;  %v7353_v14 = vld [vmem:[%s6928_s5 + $0xb8] sm:$0xf] }
  0xda   : > { %v5088_v45 = vcombine.low %v612_v24, %v622_v18  ;;  %v639_v47 = vrot.slane %v637_v41, 4  ;;  %v645_v54 = vrot.slane %v643_v42, 5  ;;  %v5353_v62 = vrot.slane %v5337_v60, 9 }
  0xdb   : > { %v2897_v56 = vrot.slane %v7086_v3, 5  ;;  %5944 = vmatprep.mubr.msk.bf16.mxu0 %vm745_vm4, %v5368_v50  ;;  %v630_v63 = vor.u32 %v629_v27, %v626_v57  ;;  %v2900_v46 = vrot.slane %v7091_v13, 5  ;;  %v648_v7 = vshrl.u32 %v7315_v37, 16  ;;  %v5338_v3 = vld [vmem:[%s6928_s5 + $0x54] sm:$0xe] }
  0xdc   : > { %5790 = vmatprep.mubr.msk.bf16.mxu1 %vm745_vm4, %v5088_v45  ;;  %v651_v9 = vshll.u32 %v7315_v37, 16  ;;  %v640_v10 = vor.u32 %v639_v47, %v635_v36  ;;  %v657_v25 = vshll.u32 %v7328_v19, 16  ;;  %v661_v21 = vshrl.u32 %v7328_v19, 16 }
  0xdd   : > { %v2898_v61 = vsel %vm7186_vm7, %v5353_v62, %v2897_v56  ;;  %v2899_v16 = vrot.slane %v2897_v56, 4  ;;  %v631_v26 = vrot.slane %v630_v63, 4  ;;  %v650_v2 = vrot.slane %v648_v7, 4 }
  0xde   : > { %v653_v31 = vrot.slane %v651_v9, 5  ;;  %v641_v13 = vrot.slane %v640_v10, 4  ;;  %v659_v60 = vrot.slane %v657_v25, 5  ;;  %v667_v15 = vshll.u32 %v306_v51, 16 }
  0xdf   : > { %v2901_v22 = vsel %vm7186_vm7, %v2899_v16, %v2900_v46  ;;  %v636_v8 = vsel %vm6966_vm3, %v631_v26, %v635_v36  ;;  %v663_v39 = vrot.slane %v661_v21, 4  ;;  %v5354_v24 = vrot.slane %v5338_v3, 9  ;;  %v7358_v36 = vld [vmem:[%s6928_s5 + $0xbc] sm:$0x1]  ;;  %v5339_v46 = vld [vmem:[%s6928_s5 + $0x60] sm:$0xe] }
  0xe0   : > { %v5369_v33 = vcombine.low %v2898_v61, %v2901_v22  ;;  %v654_v34 = vor.u32 %v653_v31, %v650_v2  ;;  %v646_v41 = vsel %vm6966_vm3, %v641_v13, %v645_v54  ;;  %v669_v42 = vrot.slane %v667_v15, 5  ;;  %v5340_v16 = vld [vmem:[%s6928_s5 + $0x6c] sm:$0xe]  ;;  %v5277_v31 = vld [vmem:[%s6928_s5 + $0x70] sm:$0xf] }
  0xe1   : > { %v2904_v18 = vrot.slane %v7116_v53, 5  ;;  %v5089_v57 = vcombine.low %v636_v8, %v646_v41  ;;  %v664_v50 = vor.u32 %v663_v39, %v659_v60  ;;  %v2907_v27 = vrot.slane %v7121_v1, 5  ;;  %v5278_v21 = vld [vmem:[%s6928_s5 + $0x74] sm:$0x1] }
  0xe2   : > { %5945 = vmatmul.mubr.msk.bf16.gmra.mrb[8].mxu0 %vm745_vm4, %v5369_v33  ;;  %v655_v45 = vrot.slane %v654_v34, 4  ;;  %v672_v54 = vshrl.u32 %v7347_v40, 16  ;;  %v675_v53 = vshll.u32 %v7347_v40, 16  ;;  %v681_v1 = vshll.u32 %v7353_v14, 16 }
  0xe3   : > { %v2905_v51 = vsel %vm7186_vm7, %v5354_v24, %v2904_v18  ;;  %v2906_v47 = vrot.slane %v2904_v18, 4  ;;  %5791 = vmatmul.mubr.msk.bf16.gmra.mrb[24].mxu1 %vm745_vm4, %v5089_v57  ;;  %v665_v56 = vrot.slane %v664_v50, 4  ;;  %v685_v63 = vshrl.u32 %v7353_v14, 16 }
  0xe4   : > { %v660_v62 = vsel %vm6966_vm3, %v655_v45, %v659_v60  ;;  %v674_v9 = vrot.slane %v672_v54, 4  ;;  %v677_v10 = vrot.slane %v675_v53, 5  ;;  %v691_v61 = vshll.u32 %v7358_v36, 16  ;;  %v6478_v54 = vld [vmem:[%s6928_s5] sm:$0xf] }
  0xe5   : > { %v2908_v7 = vsel %vm7186_vm7, %v2906_v47, %v2907_v27  ;;  %v670_v25 = vsel %vm6966_vm3, %v665_v56, %v669_v42  ;;  %v683_v26 = vrot.slane %v681_v1, 5  ;;  %v687_v2 = vrot.slane %v685_v63, 4  ;;  %v5341_v27 = vld [vmem:[%s6928_s5 + $0x78] sm:$0xe]  ;;  %v7395_v53 = vld [vmem:[%s6928_s5 + $0x4] sm:$0xf] }
  0xe6   : > { %v5370_v3 = vcombine.low %v2905_v51, %v2908_v7  ;;  %v5090_v13 = vcombine.low %v660_v62, %v670_v25  ;;  %v678_v22 = vor.u32 %v677_v10, %v674_v9  ;;  %v693_v60 = vrot.slane %v691_v61, 5  ;;  %v7399_v56 = vld [vmem:[%s6928_s5 + $0x7c] sm:$0xf]  ;;  %v7402_v1 = vld [vmem:[%s6928_s5 + $0x80] sm:$0x1] }
  0xe7   : > { %v5355_v15 = vrot.slane %v5339_v46, 9  ;;  %v688_v8 = vor.u32 %v687_v2, %v683_v26  ;;  %v2911_v33 = vrot.slane %v7149_v55, 5  ;;  %v2914_v34 = vrot.slane %v7157_v5, 5  ;;  %v5342_v63 = vld [vmem:[%s6928_s5 + $0x84] sm:$0xe] }
  0xe8   : > { %5948 = vmatprep.mubr.msk.bf16.mxu0 %vm745_vm4, %v5370_v3  ;;  %v5356_v39 = vrot.slane %v5340_v16, 9  ;;  %5794 = vmatprep.mubr.msk.bf16.mxu1 %vm745_vm4, %v5090_v13  ;;  %v679_v41 = vrot.slane %v678_v22, 4  ;;  %v2918_v42 = vrot.slane %v5277_v31, 5  ;;  %v2921_v24 = vrot.slane %v5278_v21, 5  ;;  %v5283_v10 = vld [vmem:[%s6928_s5 + $0x88] sm:$0xf] }
  0xe9   : > { %v689_v18 = vrot.slane %v688_v8, 4  ;;  %v2912_v57 = vsel %vm7186_vm7, %v5355_v15, %v2911_v33  ;;  %v2913_v45 = vrot.slane %v2911_v33, 4  ;;  %v5108_v62 = vcombine.low %v6478_v54, %v7395_v53  ;;  %v5284_v61 = vld [vmem:[%s6928_s5 + $0x8c] sm:$0x1]  ;;  %v5286_v3 = vld [vmem:[%s6928_s5 + $0x94] sm:$0xf] }
  0xea   : > { %v684_v55 = vsel %vm6966_vm3, %v679_v41, %v683_v26  ;;  %v2919_v5 = vsel %vm7186_vm7, %v5356_v39, %v2918_v42  ;;  %v2920_v50 = vrot.slane %v2918_v42, 4  ;;  %v5357_v25 = vrot.slane %v5341_v27, 9  ;;  %v5287_v22 = vld [vmem:[%s6928_s5 + $0x98] sm:$0x1]  ;;  %v6480_v39 = vld [vmem:[%s6928_s5 + $0xc] sm:$0xf] }
  0xeb   : > { %v694_v51 = vsel %vm6966_vm3, %v689_v18, %v693_v60  ;;  %v2915_v47 = vsel %vm7186_vm7, %v2913_v45, %v2914_v34  ;;  %v2925_v26 = vrot.slane %v7399_v56, 5  ;;  %v2928_v2 = vrot.slane %v7402_v1, 5  ;;  %v5343_v60 = vld [vmem:[%s6928_s5 + $0x90] sm:$0xe]  ;;  %v5289_v34 = vld [vmem:[%s6928_s5 + $0xa0] sm:$0xf] }
  0xec   : > { %v5091_v46 = vcombine.low %v684_v55, %v694_v51  ;;  %v5371_v7 = vcombine.low %v2912_v57, %v2915_v47  ;;  %v2922_v9 = vsel %vm7186_vm7, %v2920_v50, %v2921_v24  ;;  %v5358_v31 = vrot.slane %v5342_v63, 9  ;;  %v7423_v41 = vld [vmem:[%s6928_s5 + $0x10] sm:$0xf]  ;;  %v5290_v57 = vld [vmem:[%s6928_s5 + $0xa4] sm:$0x1] }
  0xed   : > { %v5372_v16 = vcombine.low %v2919_v5, %v2922_v9  ;;  %v2932_v21 = vrot.slane %v5283_v10, 5  ;;  %v2935_v13 = vrot.slane %v5284_v61, 5  ;;  %v2926_v15 = vsel %vm7186_vm7, %v5357_v25, %v2925_v26  ;;  %v5344_v45 = vld [vmem:[%s6928_s5 + $0x9c] sm:$0xe]  ;;  %v6482_v5 = vld [vmem:[%s6928_s5 + $0x18] sm:$0xf] }
  0xee   : > { %5795 = vmatmul.mubr.msk.bf16.gmra.mrb[28].mxu1 %vm745_vm4, %v5091_v46  ;;  %5949 = vmatmul.mubr.msk.bf16.gmra.mrb[12].mxu0 %vm745_vm4, %v5371_v7  ;;  %v2927_v8 = vrot.slane %v2925_v26, 4  ;;  %v2939_v33 = vrot.slane %v5286_v3, 5  ;;  %v5109_v42 = vcombine.low %v6480_v39, %v7423_v41  ;;  %v7434_v50 = vld [vmem:[%s6928_s5 + $0x1c] sm:$0xf]  ;;  %v5359_v51 = vrot.slane %v5343_v60, 9 }
  0xef   : > { %5800 = vmatprep.mubr.msk.bf16.mxu1 %vm745_vm4, %v5108_v62  ;;  %5952 = vmatprep.mubr.msk.bf16.mxu0 %vm745_vm4, %v5372_v16  ;;  %v2933_v24 = vsel %vm7186_vm7, %v5358_v31, %v2932_v21  ;;  %v2934_v18 = vrot.slane %v2932_v21, 4  ;;  %v5110_v27 = vcombine.low %v6482_v5, %v7434_v50  ;;  %v2942_v47 = vrot.slane %v5287_v22, 5  ;;  %v5292_v7 = vld [vmem:[%s6928_s5 + $0xac] sm:$0xf]  ;;  %v5295_v9 = vld [vmem:[%s6928_s5 + $0xb8] sm:$0xf] }
  0xf0   : > { %v2929_v55 = vsel %vm7186_vm7, %v2927_v8, %v2928_v2  ;;  %v2941_v63 = vrot.slane %v2939_v33, 4  ;;  %v2946_v46 = vrot.slane %v5289_v34, 5  ;;  %v1513_v10 = vsel %vm794_vm0, %v7146_v49, 0  ;;  %v7443_v26 = vld [vmem:[#allocation5 + $0x6] sm:$0x3] }
  0xf1   : > { %v5373_v54 = vcombine.low %v2926_v15, %v2929_v55  ;;  %v2936_v62 = vsel %vm7186_vm7, %v2934_v18, %v2935_v13  ;;  %v5360_v16 = vrot.slane %v5344_v45, 9  ;;  %v2949_v25 = vrot.slane %v5290_v57, 5  ;;  %v5293_v31 = vld [vmem:[%s6928_s5 + $0xb0] sm:$0x1]  ;;  %v5345_v60 = vld [vmem:[%s6928_s5 + $0xa8] sm:$0xe] }
  0xf2   : > { %v5374_v61 = vcombine.low %v2933_v24, %v2936_v62  ;;  %v2948_v3 = vrot.slane %v2946_v46, 4  ;;  %v2940_v49 = vsel %vm7186_vm7, %v5359_v51, %v2939_v33  ;;  %v2943_v2 = vsel %vm7186_vm7, %v2941_v63, %v2942_v47  ;;  %v5296_v8 = vld [vmem:[%s6928_s5 + $0xbc] sm:$0x1]  ;;  %v5346_v33 = vld [vmem:[%s6928_s5 + $0xb4] sm:$0xe] }
  0xf3   : > { %v2953_v21 = vrot.slane %v5292_v7, 5  ;;  %v2947_v13 = vsel %vm7186_vm7, %v5360_v16, %v2946_v46  ;;  %v2960_v15 = vrot.slane %v5295_v9, 5  ;;  %v6484_v34 = vld [vmem:[%s6928_s5 + $0x24] sm:$0xf]  ;;  %v7465_v39 = vld [vmem:[%s6928_s5 + $0x28] sm:$0xf]  ;;  %v5375_v24 = vcombine.low %v2940_v49, %v2943_v2 }
  0xf4   : > { %v2950_v22 = vsel %vm7186_vm7, %v2948_v3, %v2949_v25  ;;  %v6486_v18 = vld [vmem:[%s6928_s5 + $0x30] sm:$0xf]  ;;  %v7470_v57 = vld [vmem:[%s6928_s5 + $0x34] sm:$0xf]  ;;  %v5298_v55 = vld [vmem:[%s6928_s5 + $0xc4] sm:$0xf] }
  0xf5   : > { %v5112_v45 = vcombine.low %v6486_v18, %v7470_v57  ;;  %v5376_v5 = vcombine.low %v2947_v13, %v2950_v22  ;;  %v2955_v51 = vrot.slane %v2953_v21, 4  ;;  %v2956_v47 = vrot.slane %v5293_v31, 5  ;;  %v5299_v16 = vld [vmem:[%s6928_s5 + $0xc8] sm:$0x1]  ;;  %v5347_v25 = vld [vmem:[%s6928_s5 + $0xc0] sm:$0xe] }
  0xf6   : > { %5801 = vmatmul.mubr.msk.bf16.vlgmr.msra.gmra.mrb[0].mxu1 %vm745_vm4, %v5109_v42  ;;  %5953 = vmatmul.mubr.msk.bf16.gmra.mrb[16].mxu0 %vm745_vm4, %v5373_v54  ;;  %v5111_v42 = vcombine.low %v6484_v34, %v7465_v39  ;;  %v5362_v54 = vrot.slane %v5346_v33, 9  ;;  %v2962_v62 = vrot.slane %v2960_v15, 4  ;;  %v2963_v63 = vrot.slane %v5296_v8, 5  ;;  %v6488_v3 = vld [vmem:[%s6928_s5 + $0x3c] sm:$0xf] }
  0xf7   : > { %5833 = vmatpush3.bf16.msra.mxu1 %v1513_v10  ;;  %5804 = vmatprep.mubr.msk.bf16.mxu1 %vm745_vm4, %v5110_v27  ;;  %v5361_v27 = vrot.slane %v5345_v60, 9  ;;  %v2957_v7 = vsel %vm7186_vm7, %v2955_v51, %v2956_v47  ;;  %v2967_v9 = vrot.slane %v5298_v55, 5  ;;  %v7490_v49 = vld [vmem:[%s6928_s5 + $0x40] sm:$0xf]  ;;  %v5363_v22 = vrot.slane %v5347_v25, 9  ;;  %v6441_v25 = vld [vmem:[%s6928_s5 + $0x24] sm:$0xff]  }
  0xf8   : > { %5956 = vmatprep.mubr.msk.bf16.mxu0 %vm745_vm4, %v5374_v61  ;;  %6331 = vmatprep.subr.msk.bf16.mxu1 %vm794_vm0, %v7443_v26  ;;  %v2961_v10 = vsel %vm7186_vm7, %v5362_v54, %v2960_v15  ;;  %v2964_v61 = vsel %vm7186_vm7, %v2962_v62, %v2963_v63  ;;  %v5113_v2 = vcombine.low %v6488_v3, %v7490_v49  ;;  %v2970_v8 = vrot.slane %v5299_v16, 5  ;;  %v1252_v51 = vld [vmem:[%s6928_s5 + $0xc] sm:$0xe]  ;;  %v7519_v47 = vld [vmem:[%s6928_s5 + $0x8] sm:$0x1] }
  0xf9   : > { %v2954_v46 = vsel %vm7186_vm7, %v5361_v27, %v2953_v21  ;;  %v5114_v21 = vcombine.low %v7094_v11, %v7102_v35  ;;  %v5378_v13 = vcombine.low %v2961_v10, %v2964_v61  ;;  %v2969_v60 = vrot.slane %v2967_v9, 4  ;;  %v1253_v63 = vld [vmem:[%s6928_s5 + $0x18] sm:$0xe]  ;;  %v1254_v61 = vld [vmem:[%s6928_s5 + $0x24] sm:$0xe] }
  0xfa   : > { %v5377_v31 = vcombine.low %v2954_v46, %v2957_v7  ;;  %v2344_v15 = vshll.u32 %v7399_v56, 16  ;;  %v2348_v33 = vshrl.u32 %v7399_v56, 16  ;;  %v2968_v11 = vsel %vm7186_vm7, %v5363_v22, %v2967_v9  ;;  %v1255_v16 = vld [vmem:[%s6928_s5 + $0x30] sm:$0xe] }
  0xfb   : > { %v2971_v35 = vsel %vm7186_vm7, %v2969_v60, %v2970_v8  ;;  %v5116_v18 = vcombine.low %v7163_v17, %v7166_v23  ;;  %v1311_v27 = vrot.slane %v7423_v41, 5  ;;  %v1251_v23 = vld [vmem:[%s6928_s5] sm:$0xe]  ;;  %v5117_v54 = vcombine.low %v7181_v59, %v7196_v28 }
  0xfc   : > { %v7505_v34 = vrot.slane %v2344_v15, 5  ;;  %v2350_v56 = vrot.slane %v2348_v33, 4  ;;  %v1304_v62 = vrot.slane %v7395_v53, 5  ;;  %v4159_v46 = vsel %vm794_vm0, %v7254_v44, 0  ;;  %v1256_v44 = vld [vmem:[%s6928_s5 + $0x3c] sm:$0xe] }
  0xfd   : > { %v5141_v7 = vrot.slane %v1252_v51, 9  ;;  %v1313_v9 = vrot.slane %v1311_v27, 4  ;;  %v1318_v10 = vrot.slane %v7434_v50, 5  ;;  %v5118_v3 = vcombine.low %v7216_v58, %v7219_v48  ;;  %v6443_v53 = vld [vmem:[%s6928_s5 + $0x30] sm:$0xff]   ;;  %v7552_v58 = vld [vmem:[#allocation5 + $0x10] sm:$0x3] }
  0xfe   : > { %5805 = vmatmul.mubr.msk.bf16.gmra.mrb[4].mxu1 %vm745_vm4, %v5111_v42  ;;  %5957 = vmatmul.mubr.msk.bf16.gmra.mrb[20].mxu0 %vm745_vm4, %v5375_v24  ;;  %8809 = vst [vmem:[#allocation13_spill] sm:$0xff] %v7505_v34  ;;  %v5115_v42 = vcombine.low %v7127_v20, %v7133_v29  ;;  %v5379_v24 = vcombine.low %v2968_v11, %v2971_v35  ;;  %v1307_v20 = vrot.slane %v7519_v47, 5  ;;  %v6491_v29 = vld [vmem:[%s6928_s5 + $0x14] sm:$0x1]  ;;  %v1325_v28 = vrot.slane %v7465_v39, 5 }
  0xff   : > { %5808 = vmatprep.mubr.msk.bf16.mxu1 %vm745_vm4, %v5112_v45  ;;  %5960 = vmatprep.mubr.msk.bf16.mxu0 %vm745_vm4, %v5376_v5  ;;  %v6439_v45 = vld [vmem:[%s6928_s5 + $0x18] sm:$0xff]   ;;  %v2351_v55 = vor.u32 %v2350_v56, %v7505_v34  ;;  %v2354_v5 = vshll.u32 %v7402_v1, 16  ;;  %v1314_v17 = vrot.slane %v6491_v29, 5  ;;  %v5120_v59 = vcombine.low %v7266_v43, %v7280_v32  ;;  %v6492_v33 = vld [vmem:[%s6928_s5 + $0x20] sm:$0x1] }
 0x100   : > { %v1306_v60 = vrot.slane %v1304_v62, 4  ;;  %v1339_v39 = vrot.slane %v7490_v49, 5  ;;  %v7561_v8 = vsel %vm7186_vm7, %v5141_v7, %v1311_v27  ;;  %v1321_v11 = vrot.slane %v6492_v33, 5  ;;  %v6493_v56 = vld [vmem:[%s6928_s5 + $0x2c] sm:$0x1] }
 0x101   : > { %v7526_v1 = vrot.slane %v2351_v55, 4  ;;  %v7528_v41 = vrot.slane %v2354_v5, 5  ;;  %v7565_v15 = vsel %vm7186_vm7, %v1313_v9, %v1314_v17  ;;  %v5143_v49 = vrot.slane %v1254_v61, 9  ;;  %v1257_v27 = vld [vmem:[%s6928_s5 + $0x48] sm:$0xe]  ;;  %v6445_v17 = vld [vmem:[%s6928_s5 + $0x3c] sm:$0xff]  }
 0x102   : > { %v1327_v35 = vrot.slane %v1325_v28, 4  ;;  %v5145_v5 = vrot.slane %v1256_v44, 9  ;;  %v6495_v51 = vld [vmem:[%s6928_s5 + $0x4c] sm:$0xf]  ;;  %v7592_v9 = vsel %vm7186_vm7, %v1306_v60, %v1307_v20  ;;  %v5146_v44 = vrot.slane %v1257_v27, 9 }
 0x103   : > { %8810 = vst [vmem:[#allocation14_spill] sm:$0xff] %v7526_v1  ;;  %8811 = vst [vmem:[#allocation15_spill] sm:$0xff] %v7528_v41  ;;  %v1346_v29 = vrot.slane %v6495_v51, 5  ;;  %v7609_v47 = vsel %vm7186_vm7, %v5143_v49, %v1325_v28  ;;  %v6497_v60 = vld [vmem:[%s6928_s5 + $0x50] sm:$0x1] }
 0x104   : > { %v6499_v51 = vld [vmem:[%s6928_s5 + $0x5c] sm:$0x1]  ;;  %v5462_v43 = vld [vmem:[%s6928_s5 + $0x20] sm:$0x1]  ;;  %v5464_v32 = vld [vmem:[%s6928_s5 + $0x28] sm:$0xf] }
 0x105   : > { %v1348_v28 = vrot.slane %v1346_v29, 4  ;;  %v7869_v34 = vld [vmem:[%s6928_s5 + $0x64] sm:$0xf] }
 0x106   : > { %5809 = vmatmul.mubr.msk.bf16.gmra.mrb[8].mxu1 %vm745_vm4, %v5113_v2  ;;  %5961 = vmatmul.mubr.msk.bf16.gmra.mrb[24].mxu0 %vm745_vm4, %v5377_v31  ;;  %v5119_v2 = vcombine.low %v7240_v12, %v7250_v38  ;;  %v5140_v31 = vrot.slane %v1251_v23, 9  ;;  %v5463_v12 = vld [vmem:[%s6928_s5 + $0x24] sm:$0xf]  ;;  %8824 = vst [vmem:[#allocation22_spill] sm:$0xff] %v7869_v34 }
 0x107   : > { %5812 = vmatprep.mubr.msk.bf16.mxu1 %vm745_vm4, %v5114_v21  ;;  %5964 = vmatprep.mubr.msk.bf16.mxu0 %vm745_vm4, %v5378_v13  ;;  %v5142_v21 = vrot.slane %v1253_v63, 9  ;;  %v1332_v13 = vrot.slane %v7470_v57, 5  ;;  %v1320_v57 = vrot.slane %v1318_v10, 4  ;;  %v1341_v63 = vrot.slane %v1339_v39, 4 }
 0x108   : > { %v7579_v23 = vsel %vm7186_vm7, %v5140_v31, %v1304_v62 }
 0x109   : > { %v7602_v61 = vsel %vm7186_vm7, %v1320_v57, %v1321_v11  ;;  %v1349_v57 = vrot.slane %v6497_v60, 5  ;;  %v3704_v60 = vshll.u32 %v5463_v12, 16 }
 0x10b   : > { %v3706_v50 = vrot.slane %v3704_v60, 5  ;;  %v7726_v60 = vld [vmem:[%s6928_s5 + $0x38] sm:$0x1] }
 0x10c   : > { %8815 = vst [vmem:[#allocation17_spill] sm:$0xff] %v7726_v60 }
 0x10e   : > { %5813 = vmatmul.mubr.msk.bf16.gmra.mrb[12].mxu1 %vm745_vm4, %v5115_v42  ;;  %5965 = vmatmul.mubr.msk.bf16.gmra.mrb[28].mxu0 %vm745_vm4, %v5379_v24  ;;  %v1328_v42 = vrot.slane %v6493_v56, 5  ;;  %v5144_v24 = vrot.slane %v1255_v16, 9  ;;  %v1258_v16 = vld [vmem:[%s6928_s5 + $0x54] sm:$0xe] }
 0x10f   : > { %5816 = vmatprep.mubr.msk.bf16.mxu1 %vm745_vm4, %v5116_v18  ;;  %5970 = vmatprep.mubr.msk.bf16.mxu0 %vm745_vm4, %v6439_v45  ;;  %v1334_v18 = vrot.slane %v1332_v13, 4  ;;  %v6494_v45 = vld [vmem:[%s6928_s5 + $0x38] sm:$0x1] }
 0x110   : > { %v1335_v55 = vrot.slane %v6494_v45, 5  ;;  %v7613_v20 = vsel %vm7186_vm7, %v1327_v35, %v1328_v42  ;;  %v3710_v45 = vshll.u32 %v5464_v32, 16 }
 0x112   : > { %v7622_v31 = vsel %vm7186_vm7, %v1334_v18, %v1335_v55  ;;  %v7651_v55 = vsel %vm7186_vm7, %v5146_v44, %v1346_v29  ;;  %v1356_v29 = vrot.slane %v6499_v51, 5  ;;  %v1260_v51 = vld [vmem:[%s6928_s5 + $0x6c] sm:$0xe]  ;;  %v6451_v18 = vld [vmem:[%s6928_s5 + $0x60] sm:$0xff]  }
 0x116   : > { %5817 = vmatmul.mubr.msk.bf16.gmra.mrb[16].mxu1 %vm745_vm4, %v5117_v54  ;;  %5971 = vmatmul.mubr.msk.bf16.vlgmr.msra.gmra.mrb[0].mxu0 %vm745_vm4, %v6441_v25  ;;  %v7583_v54 = vsel %vm794_vm0, %v7443_v26, 0  ;;  %v7598_v26 = vsel %vm7186_vm7, %v5142_v21, %v1318_v10  ;;  %v5460_v25 = vld [vmem:[%s6928_s5 + $0x18] sm:$0xf]  ;;  %v7617_v10 = vsel %vm7186_vm7, %v5144_v24, %v1332_v13  ;;  %v7626_v21 = vsel %vm7186_vm7, %v5145_v5, %v1339_v39  ;;  %v7638_v39 = vld [vmem:[%s6928_s5 + $0x60] sm:$0xe] }
 0x117   : > { %6003 = vmatpush3.bf16.msra.mxu0 %v4159_v46  ;;  %5820 = vmatprep.mubr.msk.bf16.mxu1 %vm745_vm4, %v5118_v3  ;;  %v6496_v46 = vld [vmem:[%s6928_s5 + $0x44] sm:$0x1]  ;;  %v6447_v3 = vld [vmem:[%s6928_s5 + $0x48] sm:$0xff]   ;;  %v5147_v13 = vrot.slane %v1258_v16, 9  ;;  %v3677_v11 = vshrl.u32 %v5460_v25, 16  ;;  %v3680_v49 = vshll.u32 %v5460_v25, 16  ;;  %v8827_v4 = vcombine.low %v7617_v10, %v7622_v31 }
 0x118   : > { %5974 = vmatprep.mubr.msk.bf16.mxu0 %vm745_vm4, %v6443_v53  ;;  %v1342_v7 = vrot.slane %v6496_v46, 5  ;;  %6337 = vmatprep.subr.msk.bf16.mxu0 %vm794_vm0, %v7552_v58  ;;  %v5461_v53 = vld [vmem:[%s6928_s5 + $0x1c] sm:$0xf]  ;;  %v6498_v5 = vld [vmem:[%s6928_s5 + $0x58] sm:$0xf] }
 0x119   : > { %v3686_v42 = vshll.u32 %v5461_v53, 16  ;;  %v3690_v24 = vshrl.u32 %v5461_v53, 16  ;;  %v1353_v27 = vrot.slane %v6498_v5, 5  ;;  %v6449_v46 = vld [vmem:[%s6928_s5 + $0x54] sm:$0xff]   ;;  %v3679_v16 = vrot.slane %v3677_v11, 4 }
 0x11a   : > { %v7631_v33 = vsel %vm7186_vm7, %v1341_v63, %v1342_v7  ;;  %v5148_v7 = vrot.slane %v7638_v39, 9  ;;  %v3682_v25 = vrot.slane %v3680_v49, 5  ;;  %v6502_v39 = vld [vmem:[%s6928_s5 + $0x68] sm:$0x1] }
 0x11b   : > { %v7677_v44 = vrot.slane %v3686_v42, 5  ;;  %v3692_v53 = vrot.slane %v3690_v24, 4  ;;  %v1355_v5 = vrot.slane %v1353_v27, 4  ;;  %v1363_v11 = vrot.slane %v6502_v39, 5  ;;  %v6503_v39 = vld [vmem:[%s6928_s5 + $0x74] sm:$0x1] }
 0x11c   : > { %v3683_v35 = vor.u32 %v3682_v25, %v3679_v16  ;;  %v3696_v42 = vshll.u32 %v5462_v43, 16  ;;  %v7691_v16 = vrot.slane %v3710_v45, 5  ;;  %v8813_v25 = vcombine.low %v7315_v37, %v7328_v19  ;;  %v7707_v45 = vld [vmem:[%s6928_s5 + $0x2c] sm:$0x1] }
 0x11d   : > { %8814 = vst [vmem:[#allocation16_spill] sm:$0xff] %v7707_v45 }
 0x11e   : > { %5821 = vmatmul.mubr.msk.bf16.gmra.mrb[20].mxu1 %vm745_vm4, %v5119_v2  ;;  %5975 = vmatmul.mubr.msk.bf16.gmra.mrb[4].mxu0 %vm745_vm4, %v6445_v17  ;;  %v7664_v2 = vsel %vm7186_vm7, %v1348_v28, %v1349_v57  ;;  %v6500_v17 = vld [vmem:[%s6928_s5 + $0x64] sm:$0xf]  ;;  %v3701_v28 = vshrl.u32 %v5463_v12, 16  ;;  %v5467_v57 = vld [vmem:[%s6928_s5 + $0x34] sm:$0xf]  ;;  %v3693_v12 = vor.u32 %v3692_v53, %v7677_v44 }
 0x11f   : > { %5824 = vmatprep.mubr.msk.bf16.mxu1 %vm745_vm4, %v5120_v59  ;;  %5978 = vmatprep.mubr.msk.bf16.mxu0 %vm745_vm4, %v6447_v3  ;;  %v1360_v63 = vrot.slane %v6500_v17, 5  ;;  %v7673_v59 = vsel %vm7186_vm7, %v5147_v13, %v1353_v27  ;;  %v5466_v3 = vld [vmem:[%s6928_s5 + $0x30] sm:$0xf]  ;;  %v3714_v13 = vshrl.u32 %v5464_v32, 16  ;;  %v3734_v22 = vshll.u32 %v5467_v57, 16 }
 0x120   : > { %v6501_v17 = vld [vmem:[%s6928_s5 + $0x70] sm:$0xf]  ;;  %v3725_v62 = vshrl.u32 %v5466_v3, 16  ;;  %v3728_v49 = vshll.u32 %v5466_v3, 16  ;;  %v3738_v24 = vshrl.u32 %v5467_v57, 16  ;;  %v5149_v27 = vrot.slane %v1260_v51, 9 }
 0x121   : > { %v1367_v38 = vrot.slane %v6501_v17, 5  ;;  %v1362_v56 = vrot.slane %v1360_v63, 4  ;;  %v3703_v48 = vrot.slane %v3701_v28, 4  ;;  %v8812_v32 = vcombine.low %v7297_v52, %v7300_v0  ;;  %v6504_v51 = vld [vmem:[%s6928_s5 + $0x7c] sm:$0xf] }
 0x122   : > { %v1370_v3 = vrot.slane %v6503_v39, 5  ;;  %v3716_v43 = vrot.slane %v3714_v13, 4  ;;  %v7700_v52 = vsel %vm7186_vm7, %v1355_v5, %v1356_v29  ;;  %v7704_v0 = vsel %vm7186_vm7, %v5148_v7, %v1360_v63  ;;  %v1261_v5 = vld [vmem:[%s6928_s5 + $0x78] sm:$0xe]  ;;  %v5469_v39 = vld [vmem:[%s6928_s5 + $0x3c] sm:$0xf] }
 0x123   : > { %v1369_v17 = vrot.slane %v1367_v38, 4  ;;  %v3730_v37 = vrot.slane %v3728_v49, 5  ;;  %v7711_v19 = vsel %vm7186_vm7, %v1362_v56, %v1363_v11  ;;  %v7715_v53 = vrot.slane %v3734_v22, 5  ;;  %v6453_v56 = vld [vmem:[%s6928_s5 + $0x6c] sm:$0xff]  }
 0x124   : > { %v3740_v29 = vrot.slane %v3738_v24, 4  ;;  %v7717_v28 = vrot.slane %v3693_v12, 4  ;;  %v7719_v63 = vrot.slane %v3696_v42, 5  ;;  %v7723_v7 = vsel %vm7186_vm7, %v5149_v27, %v1367_v38  ;;  %v6454_v38 = vld [vmem:[%s6928_s5 + $0x78] sm:$0xff]   ;;  %v1262_v27 = vld [vmem:[%s6928_s5 + $0x84] sm:$0xe] }
 0x125   : > { %v3717_v22 = vor.u32 %v3716_v43, %v7691_v16  ;;  %v3720_v57 = vshll.u32 %v7707_v45, 16  ;;  %v1374_v13 = vrot.slane %v6504_v51, 5  ;;  %v3744_v12 = vshll.u32 %v7726_v60, 16  ;;  %v6506_v51 = vld [vmem:[%s6928_s5 + $0x80] sm:$0x1] }
 0x126   : > { %5825 = vmatmul.mubr.msk.bf16.gmra.mrb[24].mxu1 %vm745_vm4, %v8812_v32  ;;  %5979 = vmatmul.mubr.msk.bf16.gmra.mrb[8].mxu0 %vm745_vm4, %v6449_v46  ;;  %v3727_v46 = vrot.slane %v3725_v62, 4  ;;  %v3707_v62 = vor.u32 %v3706_v50, %v3703_v48  ;;  %v3741_v24 = vor.u32 %v3740_v29, %v7715_v53  ;;  %v6505_v32 = vld [vmem:[%s6928_s5 + $0x88] sm:$0xf]  ;;  %v6507_v43 = vld [vmem:[%s6928_s5 + $0x8c] sm:$0x1] }
 0x127   : > { %5828 = vmatprep.mubr.msk.bf16.mxu1 %vm745_vm4, %v8813_v25  ;;  %5982 = vmatprep.mubr.msk.bf16.mxu0 %vm745_vm4, %v6451_v18  ;;  %v7713_v18 = vrot.slane %v3683_v35, 4  ;;  %v7731_v35 = vsel %vm7186_vm7, %v1369_v17, %v1370_v3  ;;  %v1381_v17 = vrot.slane %v6505_v32, 5  ;;  %v3699_v3 = vsel %vm6966_vm3, %v7717_v28, %v7719_v63  ;;  %v7766_v28 = vld [vmem:[%s6928_s5 + $0x40] sm:$0xf] }
 0x128   : > { %v3731_v49 = vor.u32 %v3730_v37, %v3727_v46  ;;  %v3708_v25 = vrot.slane %v3707_v62, 4  ;;  %v8816_v46 = vcombine.low %v7347_v40, %v7353_v14  ;;  %v3718_v37 = vrot.slane %v3717_v22, 4  ;;  %8817 = vst [vmem:[#allocation18_spill] sm:$0xff] %v7766_v28 }
 0x129   : > { %v3689_v42 = vsel %vm6966_vm3, %v7713_v18, %v7677_v44  ;;  %v5150_v44 = vrot.slane %v1261_v5, 9  ;;  %v3722_v18 = vrot.slane %v3720_v57, 5  ;;  %v1376_v29 = vrot.slane %v1374_v13, 4  ;;  %v5472_v5 = vld [vmem:[%s6928_s5 + $0x48] sm:$0xf] }
 0x12a   : > { %v1377_v32 = vrot.slane %v6506_v51, 5  ;;  %v8818_v63 = vcombine.low %v7579_v23, %v7592_v9  ;;  %v3732_v40 = vrot.slane %v3731_v49, 4  ;;  %v5151_v62 = vrot.slane %v1262_v27, 9  ;;  %v7785_v27 = vld [vmem:[%s6928_s5 + $0x4c] sm:$0xf] }
 0x12b   : > { %v3752_v22 = vshll.u32 %v5469_v39, 16  ;;  %v3742_v57 = vrot.slane %v3741_v24, 4  ;;  %v1383_v51 = vrot.slane %v1381_v17, 4  ;;  %v1384_v11 = vrot.slane %v6507_v43, 5  ;;  %v6455_v24 = vld [vmem:[%s6928_s5 + $0x84] sm:$0xff]  }
 0x12c   : > { %v3713_v23 = vsel %vm6966_vm3, %v3708_v25, %v7691_v16  ;;  %v7780_v9 = vsel %vm7186_vm7, %v5150_v44, %v1374_v13  ;;  %v3762_v49 = vshrl.u32 %v7766_v28, 16  ;;  %v3773_v43 = vshrl.u32 %v5472_v5, 16  ;;  %v7802_v44 = vld [vmem:[%s6928_s5 + $0x44] sm:$0x1] }
 0x12d   : > { %v3776_v16 = vshll.u32 %v5472_v5, 16  ;;  %v3737_v13 = vsel %vm6966_vm3, %v3732_v40, %v7715_v53  ;;  %v7799_v25 = vsel %vm7186_vm7, %v5151_v62, %v1381_v17  ;;  %8819 = vst [vmem:[#allocation19_spill] sm:$0xff] %v7802_v44  ;;  %v3754_v48 = vrot.slane %v3752_v22, 5  ;;  %v5475_v22 = vld [vmem:[%s6928_s5 + $0x54] sm:$0xf] }
 0x12e   : > { %5829 = vmatmul.mubr.msk.bf16.gmra.mrb[28].mxu1 %vm745_vm4, %v8816_v46  ;;  %5983 = vmatmul.mubr.msk.bf16.gmra.mrb[12].mxu0 %vm745_vm4, %v6453_v56  ;;  %v3749_v56 = vshrl.u32 %v5469_v39, 16  ;;  %v3746_v46 = vrot.slane %v3744_v12, 5  ;;  %v3723_v12 = vsel %vm6966_vm3, %v3718_v37, %v3722_v18  ;;  %v7792_v39 = vsel %vm7186_vm7, %v1376_v29, %v1377_v32  ;;  %v6456_v37 = vld [vmem:[%s6928_s5 + $0x90] sm:$0xff]  }
 0x12f   : > { %5834 = vmatprep.mubr.msk.bf16.mxu1 %vm745_vm4, %v8818_v63  ;;  %5986 = vmatprep.mubr.msk.bf16.mxu0 %vm745_vm4, %v6454_v38  ;;  %v3758_v38 = vshll.u32 %v7766_v28, 16  ;;  %v7809_v29 = vsel %vm7186_vm7, %v1383_v51, %v1384_v11  ;;  %v3782_v32 = vshll.u32 %v7785_v27, 16  ;;  %v3786_v53 = vshrl.u32 %v7785_v27, 16  ;;  %v1264_v11 = vld [vmem:[%s6928_s5 + $0x9c] sm:$0xe] }
 0x130   : > { %v3751_v63 = vrot.slane %v3749_v56, 4  ;;  %v3747_v18 = vsel %vm6966_vm3, %v3742_v57, %v3746_v46  ;;  %v7813_v40 = vcombine.low %v3689_v42, %v3699_v3  ;;  %v7815_v17 = vcombine.low %v3713_v23, %v3723_v12  ;;  %v7829_v46 = vld [vmem:[%s6928_s5 + $0x58] sm:$0xf] }
 0x131   : > { %v7817_v62 = vrot.slane %v3758_v38, 5  ;;  %v3764_v56 = vrot.slane %v3762_v49, 4  ;;  %v8820_v5 = vcombine.low %v7561_v8, %v7565_v15  ;;  %v3768_v42 = vshll.u32 %v7802_v44, 16  ;;  %8821 = vst [vmem:[#allocation20_spill] sm:$0xff] %v7829_v46  ;;  %v1263_v49 = vld [vmem:[%s6928_s5 + $0x90] sm:$0xe] }
 0x132   : > { %v3775_v3 = vrot.slane %v3773_v43, 4  ;;  %v3778_v57 = vrot.slane %v3776_v16, 5  ;;  %v8822_v51 = vcombine.low %v7598_v26, %v7602_v61  ;;  %v7838_v8 = vsel %vm794_vm0, %v7552_v58, 0  ;;  %v5478_v58 = vld [vmem:[%s6928_s5 + $0x60] sm:$0xf] }
 0x133   : > { %v7840_v15 = vcombine.low %v3737_v13, %v3747_v18  ;;  %v3755_v38 = vor.u32 %v3754_v48, %v3751_v63  ;;  %v3788_v26 = vrot.slane %v3786_v53, 4  ;;  %v3797_v61 = vshrl.u32 %v5475_v22, 16  ;;  %v6508_v12 = vld [vmem:[#allocation5 + $0x8] sm:$0x3]  ;;  %v6509_v48 = vld [vmem:[%s6928_s5 + $0x94] sm:$0xf] }
 0x134   : > { %v3765_v43 = vor.u32 %v3764_v56, %v7817_v62  ;;  %v1388_v16 = vrot.slane %v6509_v48, 5  ;;  %v7853_v13 = vld [vmem:[%s6928_s5 + $0x50] sm:$0x1]  ;;  %v3806_v63 = vshll.u32 %v7829_v46, 16  ;;  %v6457_v18 = vld [vmem:[%s6928_s5 + $0x9c] sm:$0xff]   ;;  %v7859_v53 = vrot.slane %v3768_v42, 5 }
 0x135   : > { %8823 = vst [vmem:[#allocation21_spill] sm:$0xff] %v7853_v13  ;;  %v7862_v56 = vrot.slane %v3755_v38, 4  ;;  %v6511_v23 = vld [vmem:[%s6928_s5 + $0x98] sm:$0x1]  ;;  %v3821_v50 = vshrl.u32 %v5478_v58, 16  ;;  %v3824_v44 = vshll.u32 %v5478_v58, 16 }
 0x136   : > { %5835 = vmatmul.mubr.msk.bf16.vlgmr.msra.gmra.mrb[0].mxu1 %vm745_vm4, %v8820_v5  ;;  %5987 = vmatmul.mubr.msk.bf16.gmra.mrb[16].mxu0 %vm745_vm4, %v6455_v24  ;;  %v3800_v24 = vshll.u32 %v5475_v22, 16  ;;  %v5152_v22 = vrot.slane %v1263_v49, 9  ;;  %v3779_v5 = vor.u32 %v3778_v57, %v3775_v3  ;;  %v1391_v48 = vrot.slane %v6511_v23, 5  ;;  %v7872_v49 = vld [vmem:[%s6928_s5 + $0x5c] sm:$0x1] }
 0x137   : > { %5867 = vmatpush3.bf16.msra.mxu1 %v7583_v54  ;;  %5838 = vmatprep.mubr.msk.bf16.mxu1 %vm745_vm4, %v8822_v51  ;;  %v7846_v54 = vrot.slane %v3782_v32, 5  ;;  %v6458_v32 = vld [vmem:[%s6928_s5 + $0xa8] sm:$0xff]   ;;  %v6510_v51 = vld [vmem:[%s6928_s5 + $0xa0] sm:$0xf]  ;;  %v3792_v60 = vshll.u32 %v7853_v13, 16  ;;  %v3799_v45 = vrot.slane %v3797_v61, 4  ;;  %v8826_v23 = vcombine.low %v7609_v47, %v7613_v20 }
 0x138   : > { %5990 = vmatprep.mubr.msk.bf16.mxu0 %vm745_vm4, %v6456_v37  ;;  %6333 = vmatprep.subr.msk.bf16.mxu1 %vm794_vm0, %v6508_v12  ;;  %v3810_v37 = vshrl.u32 %v7829_v46, 16  ;;  %v1395_v12 = vrot.slane %v6510_v51, 5  ;;  %v3802_v42 = vrot.slane %v3800_v24, 5  ;;  %v3766_v3 = vrot.slane %v3765_v43, 4  ;;  %8825 = vst [vmem:[#allocation23_spill] sm:$0xff] %v7872_v49 }
 0x139   : > { %v3789_v28 = vor.u32 %v3788_v26, %v7846_v54  ;;  %v1390_v57 = vrot.slane %v1388_v16, 4  ;;  %v7874_v38 = vrot.slane %v3806_v63, 5  ;;  %v3780_v26 = vrot.slane %v3779_v5, 4  ;;  %v6512_v24 = vld [vmem:[%s6928_s5 + $0xa4] sm:$0x1] }
 0x13a   : > { %v3812_v51 = vrot.slane %v3810_v37, 4  ;;  %v5153_v58 = vrot.slane %v1264_v11, 9  ;;  %v1397_v61 = vrot.slane %v1395_v12, 4  ;;  %v1398_v43 = vrot.slane %v6512_v24, 5 }
 0x13b   : > { %v3823_v47 = vrot.slane %v3821_v50, 4  ;;  %v3826_v20 = vrot.slane %v3824_v44, 5  ;;  %v3830_v63 = vshll.u32 %v7869_v34, 16  ;;  %v3834_v37 = vshrl.u32 %v7869_v34, 16  ;;  %v1265_v50 = vld [vmem:[%s6928_s5 + $0xa8] sm:$0xe] }
 0x13c   : > { %v3790_v11 = vrot.slane %v3789_v28, 4  ;;  %v3803_v5 = vor.u32 %v3802_v42, %v3799_v45  ;;  %v7896_v10 = vsel %vm7186_vm7, %v5152_v22, %v1388_v16  ;;  %v3813_v31 = vor.u32 %v3812_v51, %v7874_v38  ;;  %v6513_v44 = vld [vmem:[%s6928_s5 + $0xac] sm:$0xf]  ;;  %v7917_v22 = vld [vmem:[%s6928_s5 + $0x68] sm:$0x1] }
 0x13d   : > { %v1402_v28 = vrot.slane %v6513_v44, 5  ;;  %v3771_v45 = vsel %vm6966_vm3, %v3766_v3, %v7859_v53  ;;  %v7914_v16 = vsel %vm7186_vm7, %v5153_v58, %v1395_v12  ;;  %8829 = vst [vmem:[#allocation25_spill] sm:$0xff] %v7917_v22  ;;  %v7922_v42 = vsel %vm7186_vm7, %v1397_v61, %v1398_v43  ;;  %v1266_v58 = vld [vmem:[%s6928_s5 + $0xb4] sm:$0xe]  ;;  %v6514_v61 = vld [vmem:[%s6928_s5 + $0xb0] sm:$0x1] }
 0x13e   : > { %5839 = vmatmul.mubr.msk.bf16.gmra.mrb[4].mxu1 %vm745_vm4, %v8826_v23  ;;  %5991 = vmatmul.mubr.msk.bf16.gmra.mrb[20].mxu0 %vm745_vm4, %v6457_v18  ;;  %v3794_v18 = vrot.slane %v3792_v60, 5  ;;  %v3816_v23 = vshll.u32 %v7872_v49, 16  ;;  %v7907_v60 = vsel %vm7186_vm7, %v1390_v57, %v1391_v48  ;;  %8828 = vst [vmem:[#allocation24_spill] sm:$0xff] %v7914_v16  ;;  %8830 = vst [vmem:[#allocation26_spill] sm:$0xff] %v7922_v42  ;;  %v7924_v3 = vrot.slane %v3830_v63, 5 }
 0x13f   : > { %5842 = vmatprep.mubr.msk.bf16.mxu1 %vm745_vm4, %v8827_v4  ;;  %5994 = vmatprep.mubr.msk.bf16.mxu0 %vm745_vm4, %v6458_v32  ;;  %v3761_v4 = vsel %vm6966_vm3, %v7862_v56, %v7817_v62  ;;  %v6459_v32 = vld [vmem:[%s6928_s5 + $0xb4] sm:$0xff]   ;;  %v3785_v62 = vsel %vm6966_vm3, %v3780_v26, %v7846_v54  ;;  %v6460_v56 = vld [vmem:[%s6928_s5 + $0xc0] sm:$0xff]   ;;  %v3827_v53 = vor.u32 %v3826_v20, %v3823_v47  ;;  %v3836_v48 = vrot.slane %v3834_v37, 4  ;;  %v5481_v57 = vld [vmem:[%s6928_s5 + $0x6c] sm:$0xf] }
 0x140   : > { %v3795_v54 = vsel %vm6966_vm3, %v3790_v11, %v3794_v18  ;;  %v7929_v51 = vrot.slane %v3803_v5, 4  ;;  %v7931_v26 = vrot.slane %v3816_v23, 5  ;;  %v5154_v12 = vrot.slane %v1265_v50, 9  ;;  %v6461_v50 = vld [vmem:[%s6928_s5 + $0xcc] sm:$0xff]   ;;  %v8051_v34 = vld [vmem:[%s6928_s5 + $0x98] sm:$0x1] }
 0x141   : > { %v7934_v24 = vrot.slane %v3813_v31, 4  ;;  %v1404_v44 = vrot.slane %v1402_v28, 4  ;;  %v1405_v43 = vrot.slane %v6514_v61, 5  ;;  %v3840_v47 = vshll.u32 %v7917_v22, 16  ;;  %v7957_v31 = vld [vmem:[%s6928_s5 + $0x70] sm:$0xf] }
 0x142   : > { %v8831_v20 = vcombine.low %v7626_v21, %v7631_v33  ;;  %v7943_v63 = vcombine.low %v3761_v4, %v3771_v45  ;;  %v3845_v11 = vshrl.u32 %v5481_v57, 16  ;;  %v3848_v18 = vshll.u32 %v5481_v57, 16  ;;  %8833 = vst [vmem:[#allocation27_spill] sm:$0xff] %v7957_v31  ;;  %v7985_v57 = vld [vmem:[%s6928_s5 + $0x7c] sm:$0xf] }
 0x143   : > { %v8832_v5 = vcombine.low %v7651_v55, %v7664_v2  ;;  %v7952_v21 = vrot.slane %v3827_v53, 4  ;;  %v3837_v33 = vor.u32 %v3836_v48, %v7924_v3  ;;  %v5155_v23 = vrot.slane %v1266_v58, 9  ;;  %8834 = vst [vmem:[#allocation28_spill] sm:$0xff] %v7985_v57  ;;  %v8014_v48 = vld [vmem:[%s6928_s5 + $0x94] sm:$0xf] }
 0x144   : > { %v1409_v4 = vrot.slane %v7353_v14, 5  ;;  %v7970_v45 = vsel %vm7186_vm7, %v5154_v12, %v1402_v28  ;;  %v7981_v53 = vrot.slane %v3840_v47, 5  ;;  %v5487_v28 = vld [vmem:[%s6928_s5 + $0x84] sm:$0xf]  ;;  %v7990_v12 = vrot.slane %v3848_v18, 5  ;;  %8837 = vst [vmem:[#allocation31_spill] sm:$0xff] %v8014_v48 }
 0x145   : > { %v3854_v58 = vshll.u32 %v7957_v31, 16  ;;  %v3858_v61 = vshrl.u32 %v7957_v31, 16  ;;  %v8008_v18 = vld [vmem:[%s6928_s5 + $0x74] sm:$0x1]  ;;  %v3878_v14 = vshll.u32 %v7985_v57, 16  ;;  %v3882_v37 = vshrl.u32 %v7985_v57, 16 }
 0x146   : > { %5843 = vmatmul.mubr.msk.bf16.gmra.mrb[8].mxu1 %vm745_vm4, %v8831_v20  ;;  %5995 = vmatmul.mubr.msk.bf16.gmra.mrb[24].mxu0 %vm745_vm4, %v6459_v32  ;;  %v7960_v32 = vcombine.low %v3785_v62, %v3795_v54  ;;  %v7979_v62 = vsel %vm7186_vm7, %v1404_v44, %v1405_v43  ;;  %v7988_v54 = vrot.slane %v3845_v11, 4  ;;  %v7995_v20 = vld [vmem:[%s6928_s5 + $0x88] sm:$0xf]  ;;  %v8001_v43 = vrot.slane %v3837_v33, 4  ;;  %8836 = vst [vmem:[#allocation30_spill] sm:$0xff] %v8008_v18 }
 0x147   : > { %5846 = vmatprep.mubr.msk.bf16.mxu1 %vm745_vm4, %v8832_v5  ;;  %5998 = vmatprep.mubr.msk.bf16.mxu0 %vm745_vm4, %v6460_v56  ;;  %v5484_v56 = vld [vmem:[%s6928_s5 + $0x78] sm:$0xf]  ;;  %8835 = vst [vmem:[#allocation29_spill] sm:$0xff] %v7995_v20  ;;  %v8005_v47 = vsel %vm7186_vm7, %v5155_v23, %v1409_v4  ;;  %v1411_v11 = vrot.slane %v1409_v4, 4  ;;  %v5490_v5 = vld [vmem:[%s6928_s5 + $0x90] sm:$0xf]  ;;  %v8838_v4 = vcombine.low %v7673_v59, %v7700_v52 }
 0x148   : > { %v3869_v55 = vshrl.u32 %v5484_v56, 16  ;;  %v3872_v2 = vshll.u32 %v5484_v56, 16  ;;  %v3893_v44 = vshrl.u32 %v5487_v28, 16  ;;  %v3896_v33 = vshll.u32 %v5487_v28, 16  ;;  %v5493_v31 = vld [vmem:[%s6928_s5 + $0x9c] sm:$0xf] }
 0x149   : > { %v3902_v1 = vshll.u32 %v7995_v20, 16  ;;  %v3906_v23 = vshrl.u32 %v7995_v20, 16  ;;  %v3851_v56 = vor.u32 %v7990_v12, %v7988_v54  ;;  %v8025_v41 = vrot.slane %v3854_v58, 5  ;;  %v8038_v12 = vld [vmem:[%s6928_s5 + $0xa0] sm:$0xf] }
 0x14a   : > { %v3860_v28 = vrot.slane %v3858_v61, 4  ;;  %v3864_v57 = vshll.u32 %v8008_v18, 16  ;;  %v8839_v20 = vcombine.low %v7704_v0, %v7711_v19  ;;  %v3917_v59 = vshrl.u32 %v5490_v5, 16  ;;  %8840 = vst [vmem:[#allocation32_spill] sm:$0xff] %v8038_v12  ;;  %v8041_v58 = vld [vmem:[%s6928_s5 + $0x80] sm:$0x1] }
 0x14b   : > { %v3920_v52 = vshll.u32 %v5490_v5, 16  ;;  %v3930_v54 = vshrl.u32 %v8014_v48, 16  ;;  %v3871_v61 = vrot.slane %v3869_v55, 4  ;;  %v8043_v18 = vrot.slane %v3878_v14, 5  ;;  %v8046_v19 = vld [vmem:[%s6928_s5 + $0x8c] sm:$0x1] }
 0x14c   : > { %v3884_v0 = vrot.slane %v3882_v37, 4  ;;  %v8048_v22 = vrot.slane %v3902_v1, 5  ;;  %v3908_v5 = vrot.slane %v3906_v23, 4  ;;  %v3941_v49 = vshrl.u32 %v5493_v31, 16 }
 0x14d   : > { %v3950_v42 = vshll.u32 %v8038_v12, 16  ;;  %v3954_v16 = vshrl.u32 %v8038_v12, 16  ;;  %v3919_v55 = vrot.slane %v3917_v59, 4  ;;  %v3932_v37 = vrot.slane %v3930_v54, 4 }
 0x14e   : > { %5847 = vmatmul.mubr.msk.bf16.gmra.mrb[12].mxu1 %vm745_vm4, %v8838_v4  ;;  %5999 = vmatmul.mubr.msk.bf16.gmra.mrb[28].mxu0 %vm745_vm4, %v6461_v50  ;;  %v3926_v50 = vshll.u32 %v8014_v48, 16  ;;  %v3874_v4 = vrot.slane %v3872_v2, 5  ;;  %v3944_v48 = vshll.u32 %v5493_v31, 16  ;;  %v3922_v2 = vrot.slane %v3920_v52, 5 }
 0x14f   : > { %5850 = vmatprep.mubr.msk.bf16.mxu1 %vm745_vm4, %v8839_v20  ;;  %6004 = vmatprep.mubr.msk.bf16.mxu0 %vm745_vm4, %v7813_v40  ;;  %v3895_v20 = vrot.slane %v3893_v44, 4  ;;  %v3898_v40 = vrot.slane %v3896_v33, 5  ;;  %v3861_v46 = vor.u32 %v3860_v28, %v8025_v41  ;;  %v3885_v1 = vor.u32 %v3884_v0, %v8043_v18 }
 0x150   : > { %v8055_v14 = vrot.slane %v3926_v50, 5  ;;  %v3875_v44 = vor.u32 %v3874_v4, %v3871_v61  ;;  %v3888_v33 = vshll.u32 %v8041_v58, 16  ;;  %v3909_v31 = vor.u32 %v3908_v5, %v8048_v22  ;;  %v5496_v4 = vld [vmem:[%s6928_s5 + $0xa8] sm:$0xf] }
 0x151   : > { %v3899_v23 = vor.u32 %v3898_v40, %v3895_v20  ;;  %v3912_v13 = vshll.u32 %v8046_v19, 16  ;;  %v3936_v12 = vshll.u32 %v8051_v34, 16  ;;  %v8841_v59 = vcombine.low %v7723_v7, %v7731_v35 }
 0x152   : > { %v3943_v28 = vrot.slane %v3941_v49, 4  ;;  %v3946_v52 = vrot.slane %v3944_v48, 5  ;;  %v8069_v50 = vrot.slane %v3950_v42, 5  ;;  %v3956_v54 = vrot.slane %v3954_v16, 4  ;;  %v8084_v42 = vld [vmem:[%s6928_s5 + $0xa4] sm:$0x1] }
 0x153   : > { %v8842_v61 = vcombine.low %v7780_v9, %v7792_v39  ;;  %v8843_v7 = vrot.slane %v7358_v36, 5  ;;  %v3923_v49 = vor.u32 %v3922_v2, %v3919_v55  ;;  %v3933_v48 = vor.u32 %v3932_v37, %v8055_v14  ;;  %v8092_v2 = vld [vmem:[%s6928_s5 + $0xac] sm:$0xf] }
 0x154   : > { %v3862_v9 = vrot.slane %v3861_v46, 4  ;;  %v3876_v39 = vrot.slane %v3875_v44, 4  ;;  %v3890_v16 = vrot.slane %v3888_v33, 5  ;;  %v3886_v36 = vrot.slane %v3885_v1, 4 }
 0x155   : > { %v8080_v35 = vsel %vm7186_vm7, %v1411_v11, %v8843_v7  ;;  %v3900_v0 = vrot.slane %v3899_v23, 4  ;;  %v3910_v20 = vrot.slane %v3909_v31, 4  ;;  %v3914_v11 = vrot.slane %v3912_v13, 5 }
 0x156   : > { %5851 = vmatmul.mubr.msk.bf16.gmra.mrb[16].mxu1 %vm745_vm4, %v8841_v59  ;;  %6005 = vmatmul.mubr.msk.bf16.vlgmr.msra.gmra.mrb[0].mxu0 %vm745_vm4, %v7815_v17  ;;  %v3866_v17 = vrot.slane %v3864_v57, 5  ;;  %v3938_v40 = vrot.slane %v3936_v12, 5  ;;  %v3947_v57 = vor.u32 %v3946_v52, %v3943_v28  ;;  %v3957_v5 = vor.u32 %v3956_v54, %v8069_v50 }
 0x157   : > { %6037 = vmatpush3.bf16.msra.mxu0 %v7838_v8  ;;  %5854 = vmatprep.mubr.msk.bf16.mxu1 %vm745_vm4, %v8842_v61  ;;  %v3852_v8 = vrot.slane %v3851_v56, 4  ;;  %v3960_v55 = vshll.u32 %v8084_v42, 16  ;;  %v3924_v37 = vrot.slane %v3923_v49, 4  ;;  %v3934_v59 = vrot.slane %v3933_v48, 4 }
 0x158   : > { %6008 = vmatprep.mubr.msk.bf16.mxu0 %vm745_vm4, %v7840_v15  ;;  %v3965_v15 = vshrl.u32 %v5496_v4, 16  ;;  %v3968_v56 = vshll.u32 %v5496_v4, 16  ;;  %v3843_v46 = vsel %vm6966_vm3, %v8001_v43, %v7981_v53  ;;  %v3867_v12 = vsel %vm6966_vm3, %v3862_v9, %v3866_v17  ;;  %v5545_v9 = vld [vmem:[%s6928_s5 + $0x54] sm:$0xe] }
 0x159   : > { %v3857_v13 = vsel %vm6966_vm3, %v3852_v8, %v8025_v41  ;;  %v3881_v44 = vsel %vm6966_vm3, %v3876_v39, %v8043_v18  ;;  %v3891_v1 = vsel %vm6966_vm3, %v3886_v36, %v3890_v16  ;;  %v3905_v33 = vsel %vm6966_vm3, %v3900_v0, %v8048_v22 }
 0x15a   : > { %v3974_v53 = vshll.u32 %v8092_v2, 16  ;;  %v3978_v43 = vshrl.u32 %v8092_v2, 16  ;;  %v8844_v41 = vcombine.low %v7799_v25, %v7809_v29  ;;  %v3915_v18 = vsel %vm6966_vm3, %v3910_v20, %v3914_v11 }
 0x15b   : > { %v3948_v23 = vrot.slane %v3947_v57, 4  ;;  %v3958_v31 = vrot.slane %v3957_v5, 4  ;;  %v3962_v22 = vrot.slane %v3960_v55, 5  ;;  %v8845_v28 = vcombine.low %v7896_v10, %v7907_v60 }
 0x15c   : > { %v3929_v25 = vsel %vm6966_vm3, %v3924_v37, %v8055_v14  ;;  %v3939_v29 = vsel %vm6966_vm3, %v3934_v59, %v3938_v40  ;;  %v8134_v52 = vrot.slane %v3968_v56, 5  ;;  %v8846_v10 = vsel %vm6966_vm3, %v7934_v24, %v7931_v26  ;;  %v8156_v26 = vld [vmem:[%s6928_s5 + $0xb0] sm:$0x1]  ;;  %v5499_v24 = vld [vmem:[%s6928_s5 + $0xb4] sm:$0xf] }
 0x15d   : > { %v8847_v60 = vsel %vm6966_vm3, %v7929_v51, %v7874_v38  ;;  %v5170_v14 = vcombine.low %v7970_v45, %v7979_v62  ;;  %v8848_v54 = vsel %vm6966_vm3, %v7952_v21, %v7924_v3  ;;  %v5171_v7 = vcombine.low %v8005_v47, %v8080_v35  ;;  %v8166_v45 = vld [vmem:[%s6928_s5 + $0xb8] sm:$0xf]  ;;  %v5544_v62 = vld [vmem:[%s6928_s5 + $0x48] sm:$0xe]  ;;  %v5547_v56 = vld [vmem:[%s6928_s5 + $0x6c] sm:$0xe] }
 0x15e   : > { %5855 = vmatmul.mubr.msk.bf16.gmra.mrb[20].mxu1 %vm745_vm4, %v8844_v41  ;;  %6009 = vmatmul.mubr.msk.bf16.gmra.mrb[4].mxu0 %vm745_vm4, %v7943_v63  ;;  %v8132_v63 = vrot.slane %v3965_v15, 4  ;;  %v5514_v61 = vcombine.low %v8848_v54, %v3843_v46  ;;  %v8159_v17 = vcombine.low %v3857_v13, %v3867_v12  ;;  %v8161_v38 = vcombine.low %v3881_v44, %v3891_v1  ;;  %v8849_v40 = vld [vmem:[#allocation21_spill] sm:$0xff]  ;;  %v8850_v59 = vld [vmem:[#allocation20_spill] sm:$0xff]  ;;  %v8852_v13 = vld [vmem:[#allocation26_spill] sm:$0xff] }
 0x15f   : > { %5858 = vmatprep.mubr.msk.bf16.mxu1 %vm745_vm4, %v8845_v28  ;;  %6012 = vmatprep.mubr.msk.bf16.mxu0 %vm745_vm4, %v7960_v32  ;;  %v5513_v32 = vcombine.low %v8847_v60, %v8846_v10  ;;  %v8163_v51 = vrot.slane %v3974_v53, 5  ;;  %v3980_v49 = vrot.slane %v3978_v43, 4  ;;  %v8169_v48 = vcombine.low %v3905_v33, %v3915_v18  ;;  %v8851_v46 = vld [vmem:[#allocation24_spill] sm:$0xff]  ;;  %v8854_v33 = vld [vmem:[#allocation23_spill] sm:$0xff] }
 0x160   : > { %v8171_v3 = vcombine.low %v3929_v25, %v3939_v29  ;;  %v3953_v21 = vsel %vm6966_vm3, %v3948_v23, %v8069_v50  ;;  %v3963_v8 = vsel %vm6966_vm3, %v3958_v31, %v3962_v22  ;;  %v3971_v39 = vor.u32 %v8134_v52, %v8132_v63  ;;  %v5546_v50 = vld [vmem:[%s6928_s5 + $0x60] sm:$0xe]  ;;  %v8856_v25 = vld [vmem:[#allocation25_spill] sm:$0xff]  ;;  %v8278_v47 = vld [vmem:[%s6928_s5 + $0xbc] sm:$0x1] }
 0x161   : > { %v3984_v16 = vshll.u32 %v8156_v26, 16  ;;  %v3989_v4 = vshrl.u32 %v5499_v24, 16  ;;  %v3992_v36 = vshll.u32 %v5499_v24, 16  ;;  %v3998_v0 = vshll.u32 %v8166_v45, 16  ;;  %v8855_v23 = vld [vmem:[#allocation22_spill] sm:$0xff]  ;;  %v8857_v52 = vld [vmem:[#allocation27_spill] sm:$0xff] }
 0x162   : > { %v5560_v20 = vrot.slane %v5544_v62, 9  ;;  %v4448_v11 = vrot.slane %v7785_v27, 5  ;;  %v4451_v57 = vrot.slane %v8849_v40, 5  ;;  %v8186_v5 = vcombine.low %v3953_v21, %v3963_v8  ;;  %v5502_v22 = vld [vmem:[%s6928_s5 + $0xc0] sm:$0xf] }
 0x163   : > { %v3981_v55 = vor.u32 %v3980_v49, %v8163_v51  ;;  %v5561_v37 = vrot.slane %v5545_v9, 9  ;;  %v4455_v15 = vrot.slane %v8850_v59, 5  ;;  %v8853_v12 = vcombine.low %v8851_v46, %v8852_v13  ;;  %v8858_v21 = vld [vmem:[#allocation30_spill] sm:$0xff]  ;;  %v6462_v9 = vld [vmem:[%s6928_s5 + $0xc] sm:$0xff]  }
 0x164   : > { %v4002_v27 = vshrl.u32 %v8166_v45, 16  ;;  %v8199_v44 = vsel %vm7186_vm7, %v5560_v20, %v4448_v11  ;;  %v4450_v1 = vrot.slane %v4448_v11, 4  ;;  %v4458_v53 = vrot.slane %v8854_v33, 5  ;;  %v5549_v33 = vld [vmem:[%s6928_s5 + $0x84] sm:$0xe] }
 0x165   : > { %v8206_v43 = vsel %vm7186_vm7, %v5561_v37, %v4455_v15  ;;  %v4457_v41 = vrot.slane %v4455_v15, 4  ;;  %v5562_v18 = vrot.slane %v5546_v50, 9  ;;  %v4462_v31 = vrot.slane %v8855_v23, 5  ;;  %v5548_v50 = vld [vmem:[%s6928_s5 + $0x78] sm:$0xe]  ;;  %v8860_v23 = vld [vmem:[#allocation15_spill] sm:$0xff] }
 0x166   : > { %5859 = vmatmul.mubr.msk.bf16.gmra.mrb[24].mxu1 %vm745_vm4, %v8853_v12  ;;  %6013 = vmatmul.mubr.msk.bf16.gmra.mrb[8].mxu0 %vm745_vm4, %v5513_v32  ;;  %v8212_v28 = vsel %vm7186_vm7, %v4450_v1, %v4451_v57  ;;  %v4465_v29 = vrot.slane %v8856_v25, 5  ;;  %v5563_v63 = vrot.slane %v5547_v56, 9  ;;  %v4469_v10 = vrot.slane %v8857_v52, 5  ;;  %v8859_v1 = vld [vmem:[#allocation28_spill] sm:$0xff] }
 0x167   : > { %5862 = vmatprep.mubr.msk.bf16.mxu1 %vm745_vm4, %v5170_v14  ;;  %6016 = vmatprep.mubr.msk.bf16.mxu0 %vm745_vm4, %v5514_v61  ;;  %v5576_v60 = vcombine.low %v8199_v44, %v8212_v28  ;;  %v8220_v32 = vsel %vm7186_vm7, %v4457_v41, %v4458_v53  ;;  %v8224_v14 = vsel %vm7186_vm7, %v5562_v18, %v4462_v31  ;;  %v4464_v54 = vrot.slane %v4462_v31, 4  ;;  %v8227_v61 = vld [vmem:[%s6928_s5 + $0xc4] sm:$0xf]  ;;  %v8861_v31 = vld [vmem:[#allocation14_spill] sm:$0xff] }
 0x168   : > { %v5577_v24 = vcombine.low %v8206_v43, %v8220_v32  ;;  %v8233_v49 = vsel %vm7186_vm7, %v5563_v63, %v4469_v10  ;;  %v4471_v62 = vrot.slane %v4469_v10, 4  ;;  %v4472_v8 = vrot.slane %v8858_v21, 5  ;;  %v6463_v63 = vld [vmem:[%s6928_s5 + $0x18] sm:$0xff]  }
 0x169   : > { %v8237_v20 = vrot.slane %v3984_v16, 5  ;;  %v8239_v11 = vrot.slane %v3989_v4, 4  ;;  %v4013_v40 = vshrl.u32 %v5502_v22, 16  ;;  %v8243_v57 = vsel %vm7186_vm7, %v4464_v54, %v4465_v29  ;;  %v5279_v4 = vld [vmem:[%s6928_s5 + $0x78] sm:$0xf] }
 0x16a   : > { %v8246_v37 = vrot.slane %v3971_v39, 4  ;;  %v8248_v59 = vrot.slane %v3992_v36, 5  ;;  %v5578_v15 = vcombine.low %v8224_v14, %v8243_v57  ;;  %v8254_v16 = vsel %vm7186_vm7, %v4471_v62, %v4472_v8  ;;  %v8862_v54 = vld [vmem:[#allocation29_spill] sm:$0xff]  ;;  %v6464_v8 = vld [vmem:[%s6928_s5 + $0x24] sm:$0xff]  }
 0x16b   : > { %v8257_v56 = vrot.slane %v3981_v55, 4  ;;  %v8259_v46 = vrot.slane %v3998_v0, 5  ;;  %v4016_v13 = vshll.u32 %v5502_v22, 16  ;;  %v5579_v39 = vcombine.low %v8233_v49, %v8254_v16  ;;  %v5291_v57 = vld [vmem:[%s6928_s5 + $0xa8] sm:$0xf] }
 0x16c   : > { %v8269_v36 = vrot.slane %v4002_v27, 4  ;;  %v4022_v12 = vshll.u32 %v8227_v61, 16  ;;  %v5564_v55 = vrot.slane %v5548_v50, 9  ;;  %v4476_v0 = vrot.slane %v8859_v1, 5  ;;  %v5505_v50 = vld [vmem:[%s6928_s5 + $0xcc] sm:$0xf] }
 0x16d   : > { %v4015_v35 = vrot.slane %v4013_v40, 4  ;;  %v2338_v27 = vshll.u32 %v5279_v4, 16  ;;  %v4026_v53 = vshrl.u32 %v8227_v61, 16  ;;  %v4018_v22 = vrot.slane %v4016_v13, 5 }
 0x16e   : > { %5863 = vmatmul.mubr.msk.bf16.gmra.mrb[28].mxu1 %vm745_vm4, %v5171_v7  ;;  %6017 = vmatmul.mubr.msk.bf16.gmra.mrb[12].mxu0 %vm745_vm4, %v8159_v17  ;;  %v4479_v7 = vrot.slane %v8041_v58, 5  ;;  %v2335_v17 = vshrl.u32 %v5279_v4, 16  ;;  %v8284_v41 = vsel %vm7186_vm7, %v5564_v55, %v4476_v0  ;;  %v4478_v18 = vrot.slane %v4476_v0, 4  ;;  %v8307_v4 = vld [vmem:[%s6928_s5 + $0xd0] sm:$0xf] }
 0x16f   : > { %5868 = vmatprep.mubr.msk.bf16.mxu1 %vm745_vm4, %v6462_v9  ;;  %6020 = vmatprep.mubr.msk.bf16.mxu0 %vm745_vm4, %v8161_v38  ;;  %v2357_v38 = vsel %vm6966_vm3, %v8861_v31, %v8860_v23  ;;  %v2340_v58 = vrot.slane %v2338_v27, 5  ;;  %v5565_v29 = vrot.slane %v5549_v33, 9  ;;  %v4008_v52 = vshll.u32 %v8278_v47, 16 }
 0x170   : > { %v2337_v25 = vrot.slane %v2335_v17, 4  ;;  %v8294_v10 = vsel %vm7186_vm7, %v4478_v18, %v4479_v7  ;;  %v4483_v62 = vrot.slane %v8862_v54, 5  ;;  %v4486_v21 = vrot.slane %v8046_v19, 5  ;;  %v5550_v7 = vld [vmem:[%s6928_s5 + $0x90] sm:$0xe] }
 0x171   : > { %v3977_v9 = vsel %vm6966_vm3, %v8246_v37, %v8163_v51  ;;  %v3995_v40 = vor.u32 %v8248_v59, %v8239_v11  ;;  %v5580_v13 = vcombine.low %v8284_v41, %v8294_v10  ;;  %v8311_v1 = vrot.slane %v4022_v12, 5  ;;  %v8325_v37 = vld [vmem:[%s6928_s5 + $0xc8] sm:$0x1] }
 0x172   : > { %v2341_v55 = vor.u32 %v2340_v58, %v2337_v25  ;;  %v4028_v0 = vrot.slane %v4026_v53, 4  ;;  %v8315_v19 = vsel %vm7186_vm7, %v5565_v29, %v4483_v62  ;;  %v4485_v33 = vrot.slane %v4483_v62, 4  ;;  %v6465_v29 = vld [vmem:[%s6928_s5 + $0x30] sm:$0xff]   ;;  %v8865_v62 = vld [vmem:[#allocation31_spill] sm:$0xff] }
 0x173   : > { %v3987_v51 = vsel %vm6966_vm3, %v8257_v56, %v8237_v20  ;;  %v4005_v11 = vor.u32 %v8269_v36, %v8259_v46  ;;  %v4019_v59 = vor.u32 %v4018_v22, %v4015_v35  ;;  %v4037_v17 = vshrl.u32 %v5505_v50, 16  ;;  %v8863_v56 = vld [vmem:[#allocation12_spill] sm:$0xff]  ;;  %v8864_v35 = vld [vmem:[#allocation13_spill] sm:$0xff] }
 0x174   : > { %v2342_v12 = vrot.slane %v2341_v55, 4  ;;  %v4040_v27 = vshll.u32 %v5505_v50, 16  ;;  %v4046_v53 = vshll.u32 %v8307_v4, 16  ;;  %v8333_v20 = vsel %vm7186_vm7, %v4485_v33, %v4486_v21 }
 0x175   : > { %v4050_v36 = vshrl.u32 %v8307_v4, 16  ;;  %v5566_v23 = vrot.slane %v5550_v7, 9  ;;  %v4010_v31 = vrot.slane %v4008_v52, 5  ;;  %v4029_v22 = vor.u32 %v4028_v0, %v8311_v1  ;;  %v8355_v52 = vld [vmem:[%s6928_s5 + $0xd4] sm:$0x1] }
 0x176   : > { %5869 = vmatmul.mubr.msk.bf16.vlgmr.msra.gmra.mrb[0].mxu1 %vm745_vm4, %v6463_v63  ;;  %6021 = vmatmul.mubr.msk.bf16.gmra.mrb[16].mxu0 %vm745_vm4, %v8169_v48  ;;  %v2347_v18 = vsel %vm6966_vm3, %v2342_v12, %v8864_v35  ;;  %v5581_v48 = vcombine.low %v8315_v19, %v8333_v20  ;;  %v4032_v25 = vshll.u32 %v8325_v37, 16  ;;  %v5520_v63 = vcombine.low %v3977_v9, %v3987_v51  ;;  %v6466_v12 = vld [vmem:[%s6928_s5 + $0x3c] sm:$0xff]   ;;  %v6530_v19 = vld [vmem:[%s6928_s5 + $0xc4] sm:$0xf] }
 0x177   : > { %6071 = vmatpush3.bf16.msra.mxu1 %v8863_v56  ;;  %5872 = vmatprep.mubr.msk.bf16.mxu1 %vm745_vm4, %v6464_v8  ;;  %v8347_v58 = vcombine.low %v2347_v18, %v2357_v38  ;;  %v3996_v54 = vrot.slane %v3995_v40, 4  ;;  %v4490_v21 = vrot.slane %v8865_v62, 5  ;;  %v4493_v8 = vrot.slane %v8051_v34, 5  ;;  %v5552_v62 = vld [vmem:[%s6928_s5 + $0xa8] sm:$0xe] }
 0x178   : > { %6024 = vmatprep.mubr.msk.bf16.mxu0 %vm745_vm4, %v8171_v3  ;;  %v4006_v50 = vrot.slane %v4005_v11, 4  ;;  %v4020_v55 = vrot.slane %v4019_v59, 4  ;;  %v4039_v33 = vrot.slane %v4037_v17, 4  ;;  %v4042_v7 = vrot.slane %v4040_v27, 5  ;;  %v5551_v3 = vld [vmem:[%s6928_s5 + $0x9c] sm:$0xe] }
 0x179   : > { %v8357_v0 = vrot.slane %v4046_v53, 5  ;;  %v4052_v56 = vrot.slane %v4050_v36, 4  ;;  %v8361_v38 = vsel %vm7186_vm7, %v5566_v23, %v4490_v21  ;;  %v4492_v9 = vrot.slane %v4490_v21, 4  ;;  %v8866_v53 = vld [vmem:[#allocation32_spill] sm:$0xff]  ;;  %v5540_v23 = vld [vmem:[%s6928_s5 + $0x18] sm:$0xe] }
 0x17a   : > { %v4030_v40 = vrot.slane %v4029_v22, 4  ;;  %v4034_v51 = vrot.slane %v4032_v25, 5  ;;  %v4001_v34 = vsel %vm6966_vm3, %v3996_v54, %v8259_v46  ;;  %v5567_v59 = vrot.slane %v5551_v3, 9  ;;  %v6515_v25 = vld [vmem:[%s6928_s5 + $0x1c] sm:$0xf] }
 0x17b   : > { %v8368_v11 = vsel %vm7186_vm7, %v4492_v9, %v4493_v8  ;;  %v4011_v17 = vsel %vm6966_vm3, %v4006_v50, %v4010_v31  ;;  %v4056_v27 = vshll.u32 %v8355_v52, 16  ;;  %v4497_v36 = vrot.slane %v8866_v53, 5  ;;  %v6516_v9 = vld [vmem:[%s6928_s5 + $0x20] sm:$0x1] }
 0x17c   : > { %v5582_v46 = vcombine.low %v8361_v38, %v8368_v11  ;;  %v4043_v35 = vor.u32 %v4042_v7, %v4039_v33  ;;  %v4053_v18 = vor.u32 %v4052_v56, %v8357_v0  ;;  %v4500_v31 = vrot.slane %v8084_v42, 5 }
 0x17d   : > { %v4035_v22 = vsel %vm6966_vm3, %v4030_v40, %v4034_v51  ;;  %v4499_v54 = vrot.slane %v4497_v36, 4  ;;  %v5521_v21 = vcombine.low %v4001_v34, %v4011_v17  ;;  %v4058_v8 = vrot.slane %v4056_v27, 5  ;;  %v5541_v17 = vld [vmem:[%s6928_s5 + $0x24] sm:$0xe] }
 0x17e   : > { %5873 = vmatmul.mubr.msk.bf16.gmra.mrb[4].mxu1 %vm745_vm4, %v6465_v29  ;;  %6025 = vmatmul.mubr.msk.bf16.gmra.mrb[20].mxu0 %vm745_vm4, %v8186_v5  ;;  %v4025_v5 = vsel %vm6966_vm3, %v4020_v55, %v8311_v1  ;;  %v4420_v29 = vrot.slane %v6515_v25, 5  ;;  %v6467_v1 = vld [vmem:[%s6928_s5 + $0x48] sm:$0xff]   ;;  %v5556_v50 = vrot.slane %v5540_v23, 9  ;;  %v6468_v55 = vld [vmem:[%s6928_s5 + $0x54] sm:$0xff]   ;;  %v4044_v7 = vrot.slane %v4043_v35, 4 }
 0x17f   : > { %5876 = vmatprep.mubr.msk.bf16.mxu1 %vm745_vm4, %v6466_v12  ;;  %6028 = vmatprep.mubr.msk.bf16.mxu0 %vm745_vm4, %v5520_v63  ;;  %v8392_v63 = vsel %vm7186_vm7, %v5567_v59, %v4497_v36  ;;  %v8398_v42 = vsel %vm7186_vm7, %v4499_v54, %v4500_v31  ;;  %v5522_v33 = vcombine.low %v4025_v5, %v4035_v22  ;;  %v4054_v3 = vrot.slane %v4053_v18, 4  ;;  %v6517_v36 = vld [vmem:[%s6928_s5 + $0x28] sm:$0xf]  ;;  %v5553_v35 = vld [vmem:[%s6928_s5 + $0xb4] sm:$0xe] }
 0x180   : > { %v5583_v12 = vcombine.low %v8392_v63, %v8398_v42  ;;  %v4422_v56 = vrot.slane %v4420_v29, 4  ;;  %v4423_v40 = vrot.slane %v6516_v9, 5  ;;  %v5568_v51 = vrot.slane %v5552_v62, 9  ;;  %v5542_v31 = vld [vmem:[%s6928_s5 + $0x30] sm:$0xe] }
 0x181   : > { %v4504_v34 = vrot.slane %v8092_v2, 5  ;;  %v4507_v59 = vrot.slane %v8156_v26, 5  ;;  %v4049_v2 = vsel %vm6966_vm3, %v4044_v7, %v8357_v0  ;;  %v4059_v26 = vsel %vm6966_vm3, %v4054_v3, %v4058_v8  ;;  %v6518_v22 = vld [vmem:[%s6928_s5 + $0x34] sm:$0xf]  ;;  %v8867_v8 = vld [vmem:[#allocation16_spill] sm:$0xff] }
 0x182   : > { %v4427_v5 = vrot.slane %v6517_v36, 5  ;;  %v4421_v18 = vsel %vm7186_vm7, %v5556_v50, %v4420_v29  ;;  %v4424_v23 = vsel %vm7186_vm7, %v4422_v56, %v4423_v40  ;;  %v4434_v25 = vrot.slane %v6518_v22, 5 }
 0x183   : > { %v8411_v27 = vsel %vm7186_vm7, %v5568_v51, %v4504_v34  ;;  %v4506_v53 = vrot.slane %v4504_v34, 4  ;;  %v5557_v0 = vrot.slane %v5541_v17, 9  ;;  %v5569_v29 = vrot.slane %v5553_v35, 9  ;;  %v8868_v51 = vld [vmem:[#allocation17_spill] sm:$0xff]  ;;  %v5543_v35 = vld [vmem:[%s6928_s5 + $0x3c] sm:$0xe] }
 0x184   : > { %v4511_v50 = vrot.slane %v8166_v45, 5  ;;  %v5572_v7 = vcombine.low %v4421_v18, %v4424_v23  ;;  %v4429_v3 = vrot.slane %v4427_v5, 4  ;;  %v5558_v56 = vrot.slane %v5542_v31, 9  ;;  %v8869_v45 = vld [vmem:[#allocation18_spill] sm:$0xff] }
 0x185   : > { %v8430_v54 = vsel %vm7186_vm7, %v4506_v53, %v4507_v59  ;;  %v4514_v9 = vrot.slane %v8278_v47, 5  ;;  %v4436_v40 = vrot.slane %v4434_v25, 4  ;;  %v4437_v34 = vrot.slane %v8868_v51, 5  ;;  %v5554_v53 = vld [vmem:[%s6928_s5 + $0xc0] sm:$0xe] }
 0x186   : > { %5877 = vmatmul.mubr.msk.bf16.gmra.mrb[8].mxu1 %vm745_vm4, %v6467_v1  ;;  %6029 = vmatmul.mubr.msk.bf16.gmra.mrb[24].mxu0 %vm745_vm4, %v5521_v21  ;;  %v5584_v62 = vcombine.low %v8411_v27, %v8430_v54  ;;  %v6469_v1 = vld [vmem:[%s6928_s5 + $0x60] sm:$0xff]   ;;  %v5523_v21 = vcombine.low %v4049_v2, %v4059_v26  ;;  %v8442_v59 = vsel %vm7186_vm7, %v5569_v29, %v4511_v50  ;;  %v4513_v17 = vrot.slane %v4511_v50, 4  ;;  %v5555_v50 = vld [vmem:[%s6928_s5 + $0xcc] sm:$0xe] }
 0x187   : > { %5880 = vmatprep.mubr.msk.bf16.mxu1 %vm745_vm4, %v6468_v55  ;;  %6032 = vmatprep.mubr.msk.bf16.mxu0 %vm745_vm4, %v5522_v33  ;;  %v4430_v55 = vrot.slane %v8867_v8, 5  ;;  %v6470_v33 = vld [vmem:[%s6928_s5 + $0x6c] sm:$0xff]   ;;  %v4441_v2 = vrot.slane %v8869_v45, 5  ;;  %v4428_v26 = vsel %vm7186_vm7, %v5557_v0, %v4427_v5  ;;  %v4435_v23 = vsel %vm7186_vm7, %v5558_v56, %v4434_v25  ;;  %v6471_v5 = vld [vmem:[%s6928_s5 + $0x78] sm:$0xff]  }
 0x188   : > { %v8450_v47 = vsel %vm7186_vm7, %v4513_v17, %v4514_v9  ;;  %v4438_v31 = vsel %vm7186_vm7, %v4436_v40, %v4437_v34  ;;  %v5570_v22 = vrot.slane %v5554_v53, 9  ;;  %v4521_v8 = vrot.slane %v8325_v37, 5  ;;  %v6519_v34 = vld [vmem:[%s6928_s5 + $0x70] sm:$0xf] }
 0x189   : > { %v4431_v36 = vsel %vm7186_vm7, %v4429_v3, %v4430_v55  ;;  %v5585_v18 = vcombine.low %v8442_v59, %v8450_v47  ;;  %v5559_v55 = vrot.slane %v5543_v35, 9  ;;  %v4443_v29 = vrot.slane %v4441_v2, 4  ;;  %v8870_v3 = vld [vmem:[#allocation19_spill] sm:$0xff] }
 0x18a   : > { %v5573_v0 = vcombine.low %v4428_v26, %v4431_v36  ;;  %v4444_v9 = vrot.slane %v8870_v3, 5  ;;  %v5571_v37 = vrot.slane %v5555_v50, 9  ;;  %v2320_v17 = vshll.u32 %v6519_v34, 16 }
 0x18b   : > { %v2324_v53 = vshrl.u32 %v6519_v34, 16  ;;  %v4525_v26 = vrot.slane %v8307_v4, 5  ;;  %v4442_v36 = vsel %vm7186_vm7, %v5559_v55, %v4441_v2  ;;  %v6474_v55 = vld [vmem:[%s6928_s5 + $0x9c] sm:$0xff]   ;;  %v5285_v34 = vld [vmem:[%s6928_s5 + $0x90] sm:$0xf]  ;;  %v2488_v20 = vshll.u32 %v6530_v19, 16 }
 0x18c   : > { %v4445_v35 = vsel %vm7186_vm7, %v4443_v29, %v4444_v9  ;;  %v5282_v29 = vld [vmem:[%s6928_s5 + $0x84] sm:$0xf]  ;;  %v2383_v28 = vshrl.u32 %v5285_v34, 16 }
 0x18d   : > { %v4527_v4 = vrot.slane %v4525_v26, 4  ;;  %v2359_v6 = vshrl.u32 %v5282_v29, 16  ;;  %v2362_v9 = vshll.u32 %v5282_v29, 16  ;;  %v2490_v38 = vrot.slane %v2488_v20, 5 }
 0x18e   : > { %5881 = vmatmul.mubr.msk.bf16.gmra.mrb[12].mxu1 %vm745_vm4, %v6469_v1  ;;  %6033 = vmatmul.mubr.msk.bf16.gmra.mrb[28].mxu0 %vm745_vm4, %v5523_v21  ;;  %v5276_v1 = vld [vmem:[%s6928_s5 + $0x6c] sm:$0xf]  ;;  %v4518_v21 = vrot.slane %v8227_v61, 5 }
 0x18f   : > { %5884 = vmatprep.mubr.msk.bf16.mxu1 %vm745_vm4, %v6470_v33  ;;  %6038 = vmatprep.mubr.msk.bf16.mxu0 %vm745_vm4, %v5572_v7  ;;  %v6472_v33 = vld [vmem:[%s6928_s5 + $0x84] sm:$0xff]   ;;  %v5574_v7 = vcombine.low %v4435_v23, %v4438_v31  ;;  %v2311_v40 = vshrl.u32 %v5276_v1, 16  ;;  %v2314_v51 = vshll.u32 %v5276_v1, 16  ;;  %v4528_v23 = vrot.slane %v8355_v52, 5 }
 0x190   : > { %v8474_v25 = vsel %vm7186_vm7, %v5570_v22, %v4518_v21  ;;  %v4520_v56 = vrot.slane %v4518_v21, 4  ;;  %v8495_v1 = vsel %vm7186_vm7, %v5571_v37, %v4525_v26  ;;  %v6473_v21 = vld [vmem:[%s6928_s5 + $0x90] sm:$0xff]  }
 0x191   : > { %v2313_v31 = vrot.slane %v2311_v40, 4  ;;  %v2316_v22 = vrot.slane %v2314_v51, 5  ;;  %v8500_v2 = vsel %vm7186_vm7, %v4527_v4, %v4528_v23  ;;  %v5288_v23 = vld [vmem:[%s6928_s5 + $0x9c] sm:$0xf] }
 0x192   : > { %v8478_v61 = vsel %vm7186_vm7, %v4520_v56, %v4521_v8  ;;  %v5575_v8 = vcombine.low %v4442_v36, %v4445_v35  ;;  %v5587_v52 = vcombine.low %v8495_v1, %v8500_v2  ;;  %v6521_v56 = vld [vmem:[%s6928_s5 + $0x88] sm:$0xf]  ;;  %v2361_v36 = vrot.slane %v2359_v6, 4 }
 0x193   : > { %v5586_v45 = vcombine.low %v8474_v25, %v8478_v61  ;;  %v2317_v50 = vor.u32 %v2316_v22, %v2313_v31  ;;  %v2368_v40 = vshll.u32 %v6521_v56, 16  ;;  %v2372_v51 = vshrl.u32 %v6521_v56, 16  ;;  %v6476_v31 = vld [vmem:[%s6928_s5 + $0xb4] sm:$0xff]  }
 0x194   : > { %v2364_v35 = vrot.slane %v2362_v9, 5  ;;  %v2410_v29 = vshll.u32 %v5288_v23, 16 }
 0x195   : > { %v2318_v37 = vrot.slane %v2317_v50, 4  ;;  %v8519_v22 = vrot.slane %v2368_v40, 5  ;;  %v2374_v44 = vrot.slane %v2372_v51, 4 }
 0x196   : > { %5885 = vmatmul.mubr.msk.bf16.gmra.mrb[16].mxu1 %vm745_vm4, %v6471_v5  ;;  %6039 = vmatmul.mubr.msk.bf16.vlgmr.msra.gmra.mrb[0].mxu0 %vm745_vm4, %v5573_v0  ;;  %v2322_v5 = vrot.slane %v2320_v17, 5  ;;  %v2326_v0 = vrot.slane %v2324_v53, 4  ;;  %v6475_v17 = vld [vmem:[%s6928_s5 + $0xa8] sm:$0xff]   ;;  %v2365_v43 = vor.u32 %v2364_v35, %v2361_v36 }
 0x197   : > { %5888 = vmatprep.mubr.msk.bf16.mxu1 %vm745_vm4, %v6472_v33  ;;  %6042 = vmatprep.mubr.msk.bf16.mxu0 %vm745_vm4, %v5574_v7  ;;  %v6520_v7 = vld [vmem:[%s6928_s5 + $0x74] sm:$0x1]  ;;  %v2375_v32 = vor.u32 %v2374_v44, %v8519_v22 }
 0x198   : > { %v2327_v33 = vor.u32 %v2326_v0, %v2322_v5  ;;  %v2330_v3 = vshll.u32 %v6520_v7, 16  ;;  %v2323_v4 = vsel %vm6966_vm3, %v2318_v37, %v2322_v5  ;;  %v2412_v37 = vrot.slane %v2410_v29, 5  ;;  %v6527_v29 = vld [vmem:[%s6928_s5 + $0xac] sm:$0xf] }
 0x199   : > { %v2376_v36 = vrot.slane %v2375_v32, 4 }
 0x19a   : > { %v2328_v53 = vrot.slane %v2327_v33, 4  ;;  %v2332_v26 = vrot.slane %v2330_v3, 5  ;;  %v6523_v33 = vld [vmem:[%s6928_s5 + $0x8c] sm:$0x1]  ;;  %v6524_v3 = vld [vmem:[%s6928_s5 + $0xa0] sm:$0xf] }
 0x19b   : > { %v2378_v7 = vshll.u32 %v6523_v33, 16  ;;  %v2416_v5 = vshll.u32 %v6524_v3, 16  ;;  %v2420_v6 = vshrl.u32 %v6524_v3, 16  ;;  %v2444_v33 = vshrl.u32 %v6527_v29, 16 }
 0x19c   : > { %v2333_v50 = vsel %vm6966_vm3, %v2328_v53, %v2332_v26 }
 0x19d   : > { %v2380_v53 = vrot.slane %v2378_v7, 5  ;;  %v8542_v26 = vrot.slane %v2416_v5, 5  ;;  %v2422_v14 = vrot.slane %v2420_v6, 4  ;;  %v6528_v6 = vld [vmem:[%s6928_s5 + $0xb8] sm:$0xf] }
 0x19e   : > { %5889 = vmatmul.mubr.msk.bf16.gmra.mrb[20].mxu1 %vm745_vm4, %v6473_v21  ;;  %6043 = vmatmul.mubr.msk.bf16.gmra.mrb[4].mxu0 %vm745_vm4, %v5575_v8  ;;  %v6522_v21 = vld [vmem:[%s6928_s5 + $0x94] sm:$0xf]  ;;  %v2468_v32 = vshrl.u32 %v6528_v6, 16 }
 0x19f   : > { %5892 = vmatprep.mubr.msk.bf16.mxu1 %vm745_vm4, %v6474_v55  ;;  %6046 = vmatprep.mubr.msk.bf16.mxu0 %vm745_vm4, %v5576_v60  ;;  %v2386_v60 = vshll.u32 %v5285_v34, 16  ;;  %v2392_v8 = vshll.u32 %v6522_v21, 16  ;;  %v2396_v0 = vshrl.u32 %v6522_v21, 16  ;;  %v2407_v55 = vshrl.u32 %v5288_v23, 16  ;;  %v6477_v34 = vld [vmem:[%s6928_s5 + $0xc0] sm:$0xff]  }
 0x1a0   : > { %v6525_v23 = vld [vmem:[%s6928_s5 + $0x98] sm:$0x1]  ;;  %v2381_v49 = vsel %vm6966_vm3, %v2376_v36, %v2380_v53 }
 0x1a1   : > { %v2388_v9 = vrot.slane %v2386_v60, 5  ;;  %v8539_v56 = vrot.slane %v2392_v8, 5  ;;  %v2398_v40 = vrot.slane %v2396_v0, 4  ;;  %v2409_v51 = vrot.slane %v2407_v55, 4  ;;  %v6526_v60 = vld [vmem:[%s6928_s5 + $0xa4] sm:$0x1] }
 0x1a2   : > { %v2426_v21 = vshll.u32 %v6526_v60, 16  ;;  %v2431_v8 = vshrl.u32 %v5291_v57, 16  ;;  %v5294_v0 = vld [vmem:[%s6928_s5 + $0xb4] sm:$0xf]  ;;  %v2434_v55 = vshll.u32 %v5291_v57, 16  ;;  %v2492_v60 = vshrl.u32 %v6530_v19, 16 }
 0x1a3   : > { %v2399_v44 = vor.u32 %v2398_v40, %v8539_v56  ;;  %v2455_v3 = vshrl.u32 %v5294_v0, 16  ;;  %v2458_v5 = vshll.u32 %v5294_v0, 16  ;;  %v5297_v57 = vld [vmem:[%s6928_s5 + $0xc0] sm:$0xf] }
 0x1a4   : > { %v2428_v41 = vrot.slane %v2426_v21, 5  ;;  %v2433_v10 = vrot.slane %v2431_v8, 4  ;;  %v2436_v40 = vrot.slane %v2434_v55, 5  ;;  %v6531_v8 = vld [vmem:[%s6928_s5 + $0xbc] sm:$0x1]  ;;  %v2494_v11 = vrot.slane %v2492_v60, 4 }
 0x1a5   : > { %v2474_v0 = vshll.u32 %v6531_v8, 16 }
 0x1a6   : > { %5893 = vmatmul.mubr.msk.bf16.gmra.mrb[24].mxu1 %vm745_vm4, %v6475_v17  ;;  %6047 = vmatmul.mubr.msk.bf16.gmra.mrb[8].mxu0 %vm745_vm4, %v5577_v24  ;;  %v2385_v24 = vrot.slane %v2383_v28, 4  ;;  %v5308_v17 = vcombine.low %v2323_v4, %v2333_v50  ;;  %v2413_v28 = vor.u32 %v2412_v37, %v2409_v51  ;;  %v2423_v4 = vor.u32 %v2422_v14, %v8542_v26 }
 0x1a7   : > { %5896 = vmatprep.mubr.msk.bf16.mxu1 %vm745_vm4, %v6476_v31  ;;  %6050 = vmatprep.mubr.msk.bf16.mxu0 %vm745_vm4, %v5578_v15  ;;  %v2366_v15 = vrot.slane %v2365_v43, 4  ;;  %v2402_v31 = vshll.u32 %v6525_v23, 16  ;;  %v2440_v50 = vshll.u32 %v6527_v29, 16  ;;  %v2464_v43 = vshll.u32 %v6528_v6, 16 }
 0x1a8   : > { %v2389_v35 = vor.u32 %v2388_v9, %v2385_v24  ;;  %v2400_v24 = vrot.slane %v2399_v44, 4  ;;  %v2414_v9 = vrot.slane %v2413_v28, 4  ;;  %v2470_v14 = vrot.slane %v2468_v32, 4  ;;  %v6529_v44 = vld [vmem:[%s6928_s5 + $0xb0] sm:$0x1] }
 0x1a9   : > { %v2371_v7 = vsel %vm6966_vm3, %v2366_v15, %v8519_v22  ;;  %v2442_v51 = vrot.slane %v2440_v50, 5  ;;  %v2446_v22 = vrot.slane %v2444_v33, 4  ;;  %v2466_v53 = vrot.slane %v2464_v43, 5  ;;  %v6532_v32 = vld [vmem:[%s6928_s5 + $0xc8] sm:$0x1] }
 0x1aa   : > { %v2390_v16 = vrot.slane %v2389_v35, 4  ;;  %v5310_v37 = vcombine.low %v2371_v7, %v2381_v49  ;;  %v2419_v35 = vsel %vm6966_vm3, %v2414_v9, %v8542_v26  ;;  %v2450_v28 = vshll.u32 %v6529_v44, 16 }
 0x1ab   : > { %v2482_v26 = vshll.u32 %v5297_v57, 16  ;;  %v2471_v21 = vor.u32 %v2470_v14, %v2466_v53  ;;  %v2495_v43 = vor.u32 %v2494_v11, %v2490_v38  ;;  %v8638_v14 = vld [vmem:[#allocation7] ss:$0 sm:$0xff] }
 0x1ac   : > { %v2395_v15 = vsel %vm6966_vm3, %v2390_v16, %v8539_v56  ;;  %v2437_v56 = vor.u32 %v2436_v40, %v2433_v10  ;;  %v2452_v33 = vrot.slane %v2450_v28, 5 }
 0x1ad   : > { %v2484_v49 = vrot.slane %v2482_v26, 5  ;;  %v2472_v16 = vrot.slane %v2471_v21, 4  ;;  %v2496_v10 = vrot.slane %v2495_v43, 4 }
 0x1ae   : > { %5897 = vmatmul.mubr.msk.bf16.gmra.mrb[28].mxu1 %vm745_vm4, %v6477_v34  ;;  %6051 = vmatmul.mubr.msk.bf16.gmra.mrb[12].mxu0 %vm745_vm4, %v5579_v39  ;;  %v2404_v39 = vrot.slane %v2402_v31, 5  ;;  %v2457_v34 = vrot.slane %v2455_v3, 4  ;;  %v2447_v31 = vor.u32 %v2446_v22, %v2442_v51  ;;  %v2438_v29 = vrot.slane %v2437_v56, 4 }
 0x1af   : > { %5918 = vmatprep.mubr.msk.bf16.mxu1 %vm745_vm4, %v5308_v17  ;;  %6054 = vmatprep.mubr.msk.bf16.mxu0 %vm745_vm4, %v5580_v13  ;;  %v2424_v13 = vrot.slane %v2423_v4, 4  ;;  %v2460_v17 = vrot.slane %v2458_v5, 5 }
 0x1b0   : > { %v2405_v36 = vsel %vm6966_vm3, %v2400_v24, %v2404_v39  ;;  %v2448_v50 = vrot.slane %v2447_v31, 4  ;;  %v2476_v39 = vrot.slane %v2474_v0, 5  ;;  %v2443_v3 = vsel %vm6966_vm3, %v2438_v29, %v2442_v51 }
 0x1b1   : > { %v2429_v23 = vsel %vm6966_vm3, %v2424_v13, %v2428_v41  ;;  %v5311_v4 = vcombine.low %v2395_v15, %v2405_v36  ;;  %v2498_v24 = vshll.u32 %v6532_v32, 16 }
 0x1b2   : > { %v5312_v55 = vcombine.low %v2419_v35, %v2429_v23  ;;  %v2453_v5 = vsel %vm6966_vm3, %v2448_v50, %v2452_v33  ;;  %v2477_v42 = vsel %vm6966_vm3, %v2472_v16, %v2476_v39 }
 0x1b3   : > { %v2500_v27 = vrot.slane %v2498_v24, 5 }
 0x1b6   : > { %5919 = vmatmul.mubr.msk.bf16.vlgmr.msra.gmra.mrb[16].mxu1 %vm745_vm4, %v8347_v58  ;;  %6055 = vmatmul.mubr.msk.bf16.gmra.mrb[16].mxu0 %vm745_vm4, %v5581_v48  ;;  %v2479_v58 = vshrl.u32 %v5297_v57, 16  ;;  %v2461_v48 = vor.u32 %v2460_v17, %v2457_v34 }
 0x1b7   : > { %5922 = vmatprep.mubr.msk.bf16.mxu1 %vm745_vm4, %v5310_v37  ;;  %6058 = vmatprep.mubr.msk.bf16.mxu0 %vm745_vm4, %v5582_v46 }
 0x1b8   : > { %v2481_v7 = vrot.slane %v2479_v58, 4  ;;  %v2462_v46 = vrot.slane %v2461_v48, 4 }
 0x1ba   : > { %v2485_v6 = vor.u32 %v2484_v49, %v2481_v7  ;;  %v2467_v63 = vsel %vm6966_vm3, %v2462_v46, %v2466_v53 }
 0x1bb   : > { %v5314_v9 = vcombine.low %v2467_v63, %v2477_v42 }
 0x1bc   : > { %v2486_v41 = vrot.slane %v2485_v6, 4 }
 0x1be   : > { %5923 = vmatmul.mubr.msk.bf16.gmra.mrb[20].mxu1 %vm745_vm4, %v5311_v4  ;;  %6059 = vmatmul.mubr.msk.bf16.gmra.mrb[20].mxu0 %vm745_vm4, %v5583_v12  ;;  %v5313_v12 = vcombine.low %v2443_v3, %v2453_v5  ;;  %v2491_v54 = vsel %vm6966_vm3, %v2486_v41, %v2490_v38 }
 0x1bf   : > { %5926 = vmatprep.mubr.msk.bf16.mxu1 %vm745_vm4, %v5312_v55  ;;  %6062 = vmatprep.mubr.msk.bf16.mxu0 %vm745_vm4, %v5584_v62  ;;  %v2501_v62 = vsel %vm6966_vm3, %v2496_v10, %v2500_v27 }
 0x1c0   : > { %v5315_v13 = vcombine.low %v2491_v54, %v2501_v62 }
 0x1c6   : > { %5927 = vmatmul.mubr.msk.bf16.gmra.mrb[24].mxu1 %vm745_vm4, %v5313_v12  ;;  %6063 = vmatmul.mubr.msk.bf16.gmra.mrb[24].mxu0 %vm745_vm4, %v5585_v18 }
 0x1c7   : > { %5930 = vmatprep.mubr.msk.bf16.mxu1 %vm745_vm4, %v5314_v9  ;;  %6066 = vmatprep.mubr.msk.bf16.mxu0 %vm745_vm4, %v5586_v45 }
 0x1ce   : > { %5931 = vmatmul.mubr.msk.bf16.gmra.mrb[28].mxu1 %vm745_vm4, %v5315_v13  ;;  %6067 = vmatmul.mubr.msk.bf16.gmra.mrb[28].mxu0 %vm745_vm4, %v5587_v52 }
 0x249   : > { %v5870_v59 = vpop.f32.mrb[0].mxu1 }
 0x24a   : > { %v1911_v47 = vpop.f32.mrb[1].mxu1 }
 0x24b   : > { %v5871_v18 = vpop.f32.mrb[2].mxu1 }
 0x24c   : > { %v1914_v25 = vpop.f32.mrb[3].mxu1 }
 0x251   : > { %v5874_v61 = vpop.f32.mrb[4].mxu1 }
 0x252   : > { %v1927_v45 = vpop.f32.mrb[5].mxu1 }
 0x253   : > { %v5875_v40 = vpop.f32.mrb[6].mxu1 }
 0x254   : > { %v1930_v51 = vpop.f32.mrb[7].mxu1 }
 0x259   : > { %v5878_v22 = vpop.f32.mrb[8].mxu1 }
 0x25a   : > { %v1943_v30 = vpop.f32.mrb[9].mxu1 }
 0x25b   : > { %v5879_v37 = vpop.f32.mrb[10].mxu1 }
 0x25c   : > { %v1946_v34 = vpop.f32.mrb[11].mxu1 }
 0x261   : > { %v8630_v17 = vpop.f32.mrb[12].mxu1 }
 0x262   : > { %v8632_v53 = vpop.f32.mrb[13].mxu1 }
 0x263   : > { %v8634_v1 = vpop.f32.mrb[14].mxu1 }
 0x264   : > { %v8636_v2 = vpop.f32.mrb[15].mxu1 }
 0x269   : > { %v6040_v52 = vpop.f32.mrb[0].mxu0 }
 0x26a   : > { %v6072_v57 = vadd.f32 %v6040_v52, %v5870_v59  ;;  %v4665_v15 = vpop.f32.mrb[1].mxu0 }
 0x26b   : > { %v6073_v36 = vadd.f32 %v4665_v15, %v1911_v47  ;;  %v6041_v35 = vpop.f32.mrb[2].mxu0 }
 0x26c   : > { %v4833_v23 = vadd.f32 %v6072_v57, %v8638_v14  ;;  %v6074_v56 = vadd.f32 %v6041_v35, %v5871_v18  ;;  %v4668_v31 = vpop.f32.mrb[3].mxu0 }
 0x26d   : > { %v4831_v44 = vadd.f32 %v6073_v36, %v8638_v14  ;;  %v6075_v28 = vadd.f32 %v4668_v31, %v1914_v25 }
 0x26e   : > { %v4865_v58 = vmax.f32 %v4833_v23, 0.0  ;;  %v4834_v26 = vadd.f32 %v6074_v56, %v8638_v14 }
 0x26f   : > { %v4863_v19 = vmax.f32 %v4831_v44, 0.0  ;;  %v4832_v20 = vadd.f32 %v6075_v28, %v8638_v14 }
 0x270   : > { %4897 = vst [vmem:[%s8645_s22 + $0x10] sm:$0xff] %v4865_v58  ;;  %v4866_v60 = vmax.f32 %v4834_v26, 0.0 }
 0x271   : > { %4895 = vst [vmem:[%s8645_s22] sm:$0xff] %v4863_v19  ;;  %v4864_v48 = vmax.f32 %v4832_v20, 0.0  ;;  %v6044_v21 = vpop.f32.mrb[4].mxu0 }
 0x272   : > { %4898 = vst [vmem:[%s8645_s22 + $0x18] sm:$0xff] %v4866_v60  ;;  %v6076_v8 = vadd.f32 %v6044_v21, %v5874_v61  ;;  %v4681_v0 = vpop.f32.mrb[5].mxu0 }
 0x273   : > { %4896 = vst [vmem:[%s8645_s22 + $0x8] sm:$0xff] %v4864_v48  ;;  %v6077_v4 = vadd.f32 %v4681_v0, %v1927_v45  ;;  %v6045_v55 = vpop.f32.mrb[6].mxu0 }
 0x274   : > { %v4837_v29 = vadd.f32 %v6076_v8, %v8638_v14  ;;  %v6078_v50 = vadd.f32 %v6045_v55, %v5875_v40  ;;  %v4684_v33 = vpop.f32.mrb[7].mxu0 }
 0x275   : > { %v4835_v7 = vadd.f32 %v6077_v4, %v8638_v14  ;;  %v6079_v49 = vadd.f32 %v4684_v33, %v1930_v51 }
 0x276   : > { %v4869_v38 = vmax.f32 %v4837_v29, 0.0  ;;  %v4838_v11 = vadd.f32 %v6078_v50, %v8638_v14 }
 0x277   : > { %v4867_v46 = vmax.f32 %v4835_v7, 0.0  ;;  %v4836_v16 = vadd.f32 %v6079_v49, %v8638_v14 }
 0x278   : > { %4901 = vst [vmem:[%s8645_s22 + $0x30] sm:$0xff] %v4869_v38  ;;  %v4870_v39 = vmax.f32 %v4838_v11, 0.0 }
 0x279   : > { %4899 = vst [vmem:[%s8645_s22 + $0x20] sm:$0xff] %v4867_v46  ;;  %v4868_v3 = vmax.f32 %v4836_v16, 0.0  ;;  %v6048_v5 = vpop.f32.mrb[8].mxu0 }
 0x27a   : > { %4902 = vst [vmem:[%s8645_s22 + $0x38] sm:$0xff] %v4870_v39  ;;  %v6080_v6 = vadd.f32 %v6048_v5, %v5878_v22  ;;  %v4697_v43 = vpop.f32.mrb[9].mxu0 }
 0x27b   : > { %4900 = vst [vmem:[%s8645_s22 + $0x28] sm:$0xff] %v4868_v3  ;;  %v6081_v32 = vadd.f32 %v4697_v43, %v1943_v30  ;;  %v6049_v24 = vpop.f32.mrb[10].mxu0 }
 0x27c   : > { %v4841_v63 = vadd.f32 %v6080_v6, %v8638_v14  ;;  %v6082_v42 = vadd.f32 %v6049_v24, %v5879_v37  ;;  %v4700_v12 = vpop.f32.mrb[11].mxu0 }
 0x27d   : > { %v4839_v9 = vadd.f32 %v6081_v32, %v8638_v14  ;;  %v6083_v41 = vadd.f32 %v4700_v12, %v1946_v34 }
 0x27e   : > { %v4873_v10 = vmax.f32 %v4841_v63, 0.0  ;;  %v4842_v27 = vadd.f32 %v6082_v42, %v8638_v14 }
 0x27f   : > { %v4871_v54 = vmax.f32 %v4839_v9, 0.0  ;;  %v4840_v62 = vadd.f32 %v6083_v41, %v8638_v14 }
 0x280   : > { %4905 = vst [vmem:[%s8645_s22 + $0x50] sm:$0xff] %v4873_v10  ;;  %v4874_v13 = vmax.f32 %v4842_v27, 0.0 }
 0x281   : > { %4903 = vst [vmem:[%s8645_s22 + $0x40] sm:$0xff] %v4871_v54  ;;  %v4872_v59 = vmax.f32 %v4840_v62, 0.0  ;;  %v6052_v47 = vpop.f32.mrb[12].mxu0 }
 0x282   : > { %4906 = vst [vmem:[%s8645_s22 + $0x58] sm:$0xff] %v4874_v13  ;;  %v6084_v18 = vadd.f32 %v6052_v47, %v8630_v17  ;;  %v4713_v25 = vpop.f32.mrb[13].mxu0 }
 0x283   : > { %4904 = vst [vmem:[%s8645_s22 + $0x48] sm:$0xff] %v4872_v59  ;;  %v6085_v61 = vadd.f32 %v4713_v25, %v8632_v53  ;;  %v6053_v45 = vpop.f32.mrb[14].mxu0 }
 0x284   : > { %v4845_v40 = vadd.f32 %v6084_v18, %v8638_v14  ;;  %v6086_v51 = vadd.f32 %v6053_v45, %v8634_v1  ;;  %v4716_v22 = vpop.f32.mrb[15].mxu0 }
 0x285   : > { %v4843_v30 = vadd.f32 %v6085_v61, %v8638_v14  ;;  %v6087_v37 = vadd.f32 %v4716_v22, %v8636_v2 }
 0x286   : > { %v4877_v34 = vmax.f32 %v4845_v40, 0.0  ;;  %v4846_v17 = vadd.f32 %v6086_v51, %v8638_v14 }
 0x287   : > { %v4875_v52 = vmax.f32 %v4843_v30, 0.0  ;;  %v4844_v57 = vadd.f32 %v6087_v37, %v8638_v14 }
 0x288   : > { %4909 = vst [vmem:[%s8645_s22 + $0x70] sm:$0xff] %v4877_v34  ;;  %v4878_v53 = vmax.f32 %v4846_v17, 0.0 }
 0x289   : > { %4907 = vst [vmem:[%s8645_s22 + $0x60] sm:$0xff] %v4875_v52  ;;  %v4876_v15 = vmax.f32 %v4844_v57, 0.0  ;;  %v5920_v36 = vpop.f32.mrb[16].mxu1  ;;  %v6056_v35 = vpop.f32.mrb[16].mxu0 }
 0x28a   : > { %4910 = vst [vmem:[%s8645_s22 + $0x78] sm:$0xff] %v4878_v53  ;;  %v6088_v1 = vadd.f32 %v6056_v35, %v5920_v36  ;;  %v2701_v23 = vpop.f32.mrb[17].mxu1  ;;  %v4729_v56 = vpop.f32.mrb[17].mxu0 }
 0x28b   : > { %4908 = vst [vmem:[%s8645_s22 + $0x68] sm:$0xff] %v4876_v15  ;;  %v6089_v2 = vadd.f32 %v4729_v56, %v2701_v23  ;;  %v5921_v31 = vpop.f32.mrb[18].mxu1  ;;  %v6057_v44 = vpop.f32.mrb[18].mxu0 }
 0x28c   : > { %v4849_v28 = vadd.f32 %v6088_v1, %v8638_v14  ;;  %v6090_v58 = vadd.f32 %v6057_v44, %v5921_v31  ;;  %v2704_v26 = vpop.f32.mrb[19].mxu1  ;;  %v4732_v19 = vpop.f32.mrb[19].mxu0 }
 0x28d   : > { %v4847_v20 = vadd.f32 %v6089_v2, %v8638_v14  ;;  %v6091_v60 = vadd.f32 %v4732_v19, %v2704_v26 }
 0x28e   : > { %v4881_v48 = vmax.f32 %v4849_v28, 0.0  ;;  %v4850_v21 = vadd.f32 %v6090_v58, %v8638_v14 }
 0x28f   : > { %v4879_v8 = vmax.f32 %v4847_v20, 0.0  ;;  %v4848_v0 = vadd.f32 %v6091_v60, %v8638_v14 }
 0x290   : > { %4913 = vst [vmem:[%s8645_s22 + $0x90] sm:$0xff] %v4881_v48  ;;  %v4882_v4 = vmax.f32 %v4850_v21, 0.0 }
 0x291   : > { %4911 = vst [vmem:[%s8645_s22 + $0x80] sm:$0xff] %v4879_v8  ;;  %v4880_v55 = vmax.f32 %v4848_v0, 0.0  ;;  %v5924_v29 = vpop.f32.mrb[20].mxu1  ;;  %v6060_v50 = vpop.f32.mrb[20].mxu0 }
 0x292   : > { %4914 = vst [vmem:[%s8645_s22 + $0x98] sm:$0xff] %v4882_v4  ;;  %v6092_v33 = vadd.f32 %v6060_v50, %v5924_v29  ;;  %v2717_v7 = vpop.f32.mrb[21].mxu1  ;;  %v4745_v49 = vpop.f32.mrb[21].mxu0 }
 0x293   : > { %4912 = vst [vmem:[%s8645_s22 + $0x88] sm:$0xff] %v4880_v55  ;;  %v6093_v38 = vadd.f32 %v4745_v49, %v2717_v7  ;;  %v5925_v11 = vpop.f32.mrb[22].mxu1  ;;  %v6061_v46 = vpop.f32.mrb[22].mxu0 }
 0x294   : > { %v4853_v16 = vadd.f32 %v6092_v33, %v8638_v14  ;;  %v6094_v39 = vadd.f32 %v6061_v46, %v5925_v11  ;;  %v2720_v3 = vpop.f32.mrb[23].mxu1  ;;  %v4748_v5 = vpop.f32.mrb[23].mxu0 }
 0x295   : > { %v4851_v6 = vadd.f32 %v6093_v38, %v8638_v14  ;;  %v6095_v43 = vadd.f32 %v4748_v5, %v2720_v3 }
 0x296   : > { %v4885_v32 = vmax.f32 %v4853_v16, 0.0  ;;  %v4854_v24 = vadd.f32 %v6094_v39, %v8638_v14 }
 0x297   : > { %v4883_v63 = vmax.f32 %v4851_v6, 0.0  ;;  %v4852_v42 = vadd.f32 %v6095_v43, %v8638_v14 }
 0x298   : > { %4917 = vst [vmem:[%s8645_s22 + $0xb0] sm:$0xff] %v4885_v32  ;;  %v4886_v12 = vmax.f32 %v4854_v24, 0.0 }
 0x299   : > { %4915 = vst [vmem:[%s8645_s22 + $0xa0] sm:$0xff] %v4883_v63  ;;  %v4884_v9 = vmax.f32 %v4852_v42, 0.0  ;;  %v5928_v41 = vpop.f32.mrb[24].mxu1  ;;  %v6064_v10 = vpop.f32.mrb[24].mxu0 }
 0x29a   : > { %4918 = vst [vmem:[%s8645_s22 + $0xb8] sm:$0xff] %v4886_v12  ;;  %v6096_v27 = vadd.f32 %v6064_v10, %v5928_v41  ;;  %v2733_v54 = vpop.f32.mrb[25].mxu1  ;;  %v4761_v62 = vpop.f32.mrb[25].mxu0 }
 0x29b   : > { %4916 = vst [vmem:[%s8645_s22 + $0xa8] sm:$0xff] %v4884_v9  ;;  %v6097_v13 = vadd.f32 %v4761_v62, %v2733_v54  ;;  %v5929_v59 = vpop.f32.mrb[26].mxu1  ;;  %v6065_v47 = vpop.f32.mrb[26].mxu0 }
 0x29c   : > { %v4857_v18 = vadd.f32 %v6096_v27, %v8638_v14  ;;  %v6098_v25 = vadd.f32 %v6065_v47, %v5929_v59  ;;  %v2736_v61 = vpop.f32.mrb[27].mxu1  ;;  %v4764_v45 = vpop.f32.mrb[27].mxu0 }
 0x29d   : > { %v4855_v40 = vadd.f32 %v6097_v13, %v8638_v14  ;;  %v6099_v51 = vadd.f32 %v4764_v45, %v2736_v61 }
 0x29e   : > { %v4889_v22 = vmax.f32 %v4857_v18, 0.0  ;;  %v4858_v30 = vadd.f32 %v6098_v25, %v8638_v14 }
 0x29f   : > { %v4887_v37 = vmax.f32 %v4855_v40, 0.0  ;;  %v4856_v34 = vadd.f32 %v6099_v51, %v8638_v14 }
 0x2a0   : > { %4921 = vst [vmem:[%s8645_s22 + $0xd0] sm:$0xff] %v4889_v22  ;;  %v4890_v17 = vmax.f32 %v4858_v30, 0.0 }
 0x2a1   : > { %4919 = vst [vmem:[%s8645_s22 + $0xc0] sm:$0xff] %v4887_v37  ;;  %v4888_v52 = vmax.f32 %v4856_v34, 0.0  ;;  %v5932_v57 = vpop.f32.mrb[28].mxu1  ;;  %v6068_v53 = vpop.f32.mrb[28].mxu0 }
 0x2a2   : > { %4922 = vst [vmem:[%s8645_s22 + $0xd8] sm:$0xff] %v4890_v17  ;;  %v6100_v15 = vadd.f32 %v6068_v53, %v5932_v57  ;;  %v2749_v36 = vpop.f32.mrb[29].mxu1  ;;  %v4777_v35 = vpop.f32.mrb[29].mxu0 }
 0x2a3   : > { %4920 = vst [vmem:[%s8645_s22 + $0xc8] sm:$0xff] %v4888_v52  ;;  %v6101_v1 = vadd.f32 %v4777_v35, %v2749_v36  ;;  %v5933_v23 = vpop.f32.mrb[30].mxu1  ;;  %v6069_v56 = vpop.f32.mrb[30].mxu0 }
 0x2a4   : > { %v4861_v2 = vadd.f32 %v6100_v15, %v8638_v14  ;;  %v6102_v31 = vadd.f32 %v6069_v56, %v5933_v23  ;;  %v2752_v44 = vpop.f32.mrb[31].mxu1  ;;  %v4780_v28 = vpop.f32.mrb[31].mxu0 }
 0x2a5   : > { %v4859_v58 = vadd.f32 %v6101_v1, %v8638_v14  ;;  %v6103_v26 = vadd.f32 %v4780_v28, %v2752_v44 }
 0x2a6   : > { %v4893_v19 = vmax.f32 %v4861_v2, 0.0  ;;  %v4862_v20 = vadd.f32 %v6102_v31, %v8638_v14 }
 0x2a7   : > { %v4891_v60 = vmax.f32 %v4859_v58, 0.0  ;;  %v4860_v48 = vadd.f32 %v6103_v26, %v8638_v14 }
 0x2a8   : > { %4925 = vst [vmem:[%s8645_s22 + $0xf0] sm:$0xff] %v4893_v19  ;;  %v4894_v21 = vmax.f32 %v4862_v20, 0.0 }
 0x2a9   : > { %4923 = vst [vmem:[%s8645_s22 + $0xe0] sm:$0xff] %v4891_v60  ;;  %v4892_v8 = vmax.f32 %v4860_v48, 0.0 }
 0x2aa   : > { %4926 = vst [vmem:[%s8645_s22 + $0xf8] sm:$0xff] %v4894_v21 }
 0x2ab   : > { %4924 = vst [vmem:[%s8645_s22 + $0xe8] sm:$0xff] %v4892_v8 }
 0x2ac   : > { %6632 = shalt.err (!%p6629_p2)
}
 0x2ad   : > { %s6633_s10 = scalar_lea.hbm %s8713_s9, 4096  ;;  %s6637_s29 = scalar_lea.hbm %s8770_s3, 8192 }
 0x2ae   : > { %p6634_p0 = scmp.ne.s32.totalorder %s8713_s9, %s6633_s10  ;;  %p6638_p6 = scmp.lt.u32.totalorder %s8713_s9, %s8770_s3 }
 0x2af   : > { %p6639_p7 = scmp.lt.u32.totalorder %s6637_s29, %s6633_s10  ;;  %p6641_p8 = scmp.lt.u32.totalorder %s6633_s10, %s8713_s9 }
 0x2b0   : > { %p6635_p4 = pnand %p6634_p0, %p8871_p12 }
 0x2b1   : > { %p6640_p11 = por %p6639_p7, %p6638_p6 }
 0x2b2   : > { %p6636_p13 = pneg %p6635_p4 }
 0x2b3   : > { %p6642_p1 = por %p6641_p8, %p6640_p11 }
 0x2b5   : > { %p6643_p10 = pnand %p6642_p1, %p6636_p13 }
 0x2b7   : > { %6646 = shalt.err (!%p6643_p10)
}
 0x2b8   : > { %s6715_s22 = smov 128   ;;  %s6716_s24 = smov 8  }
 0x2b9   : > { %6351 = dma.vmem_to_hbm [thread:$0]  (%p8871_p12), %s8715_s30, 4096, %s8713_s9, %s4928_s15, %s6715_s22, %s6715_s22, %s6716_s24  }
 0x2ba PF: > { %s4959_s7 = sand.u32 1, %s6685_s12   ;;  %p8872_p3 = scmp.ne.s32.totalorder %s8797_s23, 0 }
 0x2bb   : > { %p8873_p5 = scmp.ge.s32.totalorder %s6705_s17, 2  ;;  %s4960_s26 = scalar_lea.sflag [#allocation4], %s4959_s7 }
 0x2bd   : > { %p6365_p9 = pnand %p8873_p5, %p8872_p3 }
 0x2bf   : > { %6680 = dma.done.wait (!%p6365_p9), %s4960_s26, 4096  }
 0x2c0   : > { %6682 = vsyncadd (!%p6365_p9), %s4960_s26, 4294963200  ;;  %s20_s17 = sadd.s32 1, %s6705_s17   ;;  %s8874_s12 = smov %s6689_s13 }
 0x2c1   : > { %p17_p2 = scmp.ge.s32.totalorder %s20_s17, 4   ;;  %s8875_s13 = smov %s6693_s14 }
 0x2c2   : > { %s8876_s14 = smov %s6883_s4  ;;  %s8877_s15 = smov %s6701_s16 }
 0x2c3   : > { %s8878_s16 = smov %s8880_s18  ;;  %19 = sbr.rel (!%p17_p2) target bundleno = 7 (0x7), region = 98 }
 0x2ca   :  { %4965 = vsyncpa [#allocation3], 1 }
 0x2cb   :  { %4967 = vsyncpa [#allocation3 + $0x1], 1 }
 0x2cc   :  { %4968 = vsyncpa [#allocation6], 1 }
 0x2cd   :  { %4969 = vsyncpa [#allocation4], 1 }
 0x2ce   :  { %4971 = vsyncpa [#allocation4 + $0x1], 1 }

</bundles_post_ra>
